<compile_context>
chip_gen: v6e
topology: v6e:2x2x1
jax: 0.10.0
libtpu: 0.0.40
codegen_flags: <defaults>
</compile_context>

<pallas_src>
import jax
import jax.numpy as jnp
from jax import lax
from jax.experimental import pallas as pl
from jax.experimental.pallas import tpu as pltpu


def lstm_pool_fc_kernel(x_ref, mask_ref, inv_den_ref,
                        wih0_ref, b0_ref, whh0_ref,
                        wih1_ref, whh1_ref, b1_ref,
                        fcw_ref, fcb_ref,
                        out_ref,
                        xproj_ref):
    """2-layer LSTM recurrence + masked mean pooling + linear head (VMEM-resident)."""
    T, B, D = x_ref.shape
    H = whh0_ref.shape[0]
    G = 4 * H

    # ---- hoisted layer-0 input projection: one matmul for all timesteps ----
    x2d = x_ref[...].reshape(T * B, D)
    xproj = jnp.dot(x2d, wih0_ref[...],
                    preferred_element_type=jnp.float32) + b0_ref[...]
    xproj_ref[...] = xproj.reshape(T, B, G)

    # ---- hoisted weight / bias loads (recurrent weights arrive as bf16) ----
    whh0 = whh0_ref[...]
    wih1 = wih1_ref[...]
    whh1 = whh1_ref[...]
    b1b = jnp.broadcast_to(b1_ref[...], (B, G))   # hoisted, not per-step

    def gates_to_hc(gates, c):
        # host-permuted gate order: [i, f, o, g]
        sig = jax.nn.sigmoid(gates[:, :3 * H])    # one contiguous sigmoid: i, f, o
        i_g = sig[:, 0:H]
        f_g = sig[:, H:2 * H]
        o_g = sig[:, 2 * H:3 * H]
        g_g = jnp.tanh(gates[:, 3 * H:])          # one contiguous tanh: g
        c_new = f_g * c + i_g * g_g
        h_new = o_g * jnp.tanh(c_new)
        return h_new, c_new

    def body(t, carry):
        h0, c0, h1, c1, sum_h = carry
        # layer 0: input projection precomputed; only the recurrent matmul here
        g0 = xproj_ref[t] + jnp.dot(h0.astype(jnp.bfloat16), whh0,
                                    preferred_element_type=jnp.float32)
        h0, c0 = gates_to_hc(g0, c0)
        # layer 1
        g1 = (jnp.dot(h0.astype(jnp.bfloat16), wih1,
                      preferred_element_type=jnp.float32)
              + jnp.dot(h1.astype(jnp.bfloat16), whh1,
                        preferred_element_type=jnp.float32)
              + b1b)
        h1, c1 = gates_to_hc(g1, c1)
        sum_h = sum_h + h1 * mask_ref[t]
        return (h0, c0, h1, c1, sum_h)

    zeros_bh = jnp.zeros((B, H), jnp.float32)
    carry0 = (zeros_bh, zeros_bh, zeros_bh, zeros_bh, zeros_bh)
    # T is static and small: fully unroll so the LLO scheduler sees every step.
    _, _, _, _, sum_h = lax.fori_loop(0, T, body, carry0, unroll=True)

    pooled = sum_h * inv_den_ref[...]             # masked mean over time (B, H)
    out_ref[...] = (jnp.dot(pooled, fcw_ref[...],
                            preferred_element_type=jnp.float32)
                    + fcb_ref[...])


def _reorder_gates(w, H):
    """Permute the 4H axis from PyTorch's [i, f, g, o] to [i, f, o, g]."""
    return jnp.concatenate(
        [w[..., :2 * H], w[..., 3 * H:4 * H], w[..., 2 * H:3 * H]], axis=-1)


def student_lstm_forward(x, mask, params):
    """x: (B, T, D) float32, mask: (B, T) float32 -> (B, num_classes) float32."""
    B, T, D = x.shape
    H = params["whh0"].shape[0]
    C = params["fcw"].shape[1]

    # --- batch padded to the 8-sublane granularity; padded rows masked out ---
    B_pad = max(8, -(-B // 8) * 8)
    if B_pad != B:
        x = jnp.pad(x, ((0, B_pad - B), (0, 0), (0, 0)))
        mask = jnp.pad(mask, ((0, B_pad - B), (0, 0)))

    # --- classifier head padded to a lane-dense 128-wide output ---
    C_pad = max(128, -(-C // 128) * 128)
    fcw = jnp.pad(params["fcw"], ((0, 0), (0, C_pad - C)))
    fcb = jnp.pad(params["fcb"], ((0, 0), (0, C_pad - C)))

    # --- gate reorder + bf16 cast of matmul-only weights (halves their VMEM traffic) ---
    wih0 = _reorder_gates(params["wih0"], H)
    b0 = _reorder_gates(params["b0"], H)
    whh0 = _reorder_gates(params["whh0"], H).astype(jnp.bfloat16)
    wih1 = _reorder_gates(params["wih1"], H).astype(jnp.bfloat16)
    whh1 = _reorder_gates(params["whh1"], H).astype(jnp.bfloat16)
    b1 = _reorder_gates(params["b1"], H)

    x_tm = jnp.transpose(x, (1, 0, 2))                   # (T, B_pad, D)
    mask_tm = jnp.transpose(mask, (1, 0))[..., None]     # (T, B_pad, 1)
    # masked-mean denominator, guarded against all-zero mask rows (incl. padding)
    inv_den = 1.0 / jnp.maximum(mask.sum(axis=1, keepdims=True), 1.0)  # (B_pad, 1)

    args = (x_tm, mask_tm, inv_den,
            wih0, b0, whh0, wih1, whh1, b1, fcw, fcb)

    # TODO(synk): if batch is scaled up, add a ("parallel",) grid axis over batch
    # tiles so v7x's second TensorCore is used; pointless at B_pad=8.
    out = pl.pallas_call(
        lstm_pool_fc_kernel,
        out_shape=jax.ShapeDtypeStruct((B_pad, C_pad), jnp.float32),
        in_specs=[pl.BlockSpec(memory_space=pltpu.VMEM) for _ in args],
        out_specs=pl.BlockSpec(memory_space=pltpu.VMEM),
        scratch_shapes=[pltpu.VMEM((T, B_pad, 4 * H), jnp.float32)],
    )(*args)
    return out[:B, :C]


def init_params(key, input_dim=4, hidden_dim=128, num_classes=10):
    """Deterministic init mimicking PyTorch's uniform(-1/sqrt(H), 1/sqrt(H)).

    Weights are stored transposed for `x @ W`, in PyTorch gate order [i,f,g,o];
    the wrapper does the gate permutation / bf16 cast / padding.
    """
    H = hidden_dim
    bound = 1.0 / jnp.sqrt(jnp.float32(H))
    ks = jax.random.split(key, 12)

    def u(k, shape):
        return jax.random.uniform(k, shape, jnp.float32, -bound, bound)

    wih0 = u(ks[0], (4 * H, input_dim)).T
    whh0 = u(ks[1], (4 * H, H)).T
    b0 = (u(ks[2], (4 * H,)) + u(ks[3], (4 * H,)))[None, :]   # b_ih + b_hh
    wih1 = u(ks[4], (4 * H, H)).T
    whh1 = u(ks[5], (4 * H, H)).T
    b1 = (u(ks[6], (4 * H,)) + u(ks[7], (4 * H,)))[None, :]
    fcw = jax.random.uniform(ks[8], (num_classes, H), jnp.float32,
                             -bound, bound).T
    fcb = jax.random.uniform(ks[9], (num_classes,), jnp.float32,
                             -bound, bound)[None, :]
    return dict(wih0=wih0, whh0=whh0, b0=b0,
                wih1=wih1, whh1=whh1, b1=b1,
                fcw=fcw, fcb=fcb)


def reference_forward(x, mask, params, match_kernel_precision=False):
    """Pure-JAX reference of the PyTorch forward.

    With match_kernel_precision=True the recurrent / layer-1 matmul operands
    are cast to bf16 (f32 accumulate) exactly like the kernel, so the strict
    comparison isolates kernel bugs from the intentional bf16 operand cast.
    """
    H = params["whh0"].shape[0]
    cast = ((lambda a: a.astype(jnp.bfloat16)) if match_kernel_precision
            else (lambda a: a))

    def gates_to_hc(gates, c):
        i = jax.nn.sigmoid(gates[:, 0:H])
        f = jax.nn.sigmoid(gates[:, H:2 * H])
        g = jnp.tanh(gates[:, 2 * H:3 * H])
        o = jax.nn.sigmoid(gates[:, 3 * H:4 * H])
        c = f * c + i * g
        h = o * jnp.tanh(c)
        return h, c

    B, T, _ = x.shape

    def step(carry, x_t):
        h0, c0, h1, c1 = carry
        g0 = (x_t @ params["wih0"] + params["b0"]
              + jnp.dot(cast(h0), cast(params["whh0"]),
                        preferred_element_type=jnp.float32))
        h0, c0 = gates_to_hc(g0, c0)
        g1 = (jnp.dot(cast(h0), cast(params["wih1"]),
                      preferred_element_type=jnp.float32)
              + jnp.dot(cast(h1), cast(params["whh1"]),
                        preferred_element_type=jnp.float32)
              + params["b1"])
        h1, c1 = gates_to_hc(g1, c1)
        return (h0, c0, h1, c1), h1

    z = jnp.zeros((B, H), jnp.float32)
    _, hs = lax.scan(step, (z, z, z, z), jnp.transpose(x, (1, 0, 2)))
    hs = jnp.transpose(hs, (1, 0, 2))                            # (B, T, H)
    pooled = (hs * mask[..., None]).sum(axis=1) / jnp.maximum(
        mask.sum(axis=1, keepdims=True), 1.0)
    return pooled @ params["fcw"] + params["fcb"]


if __name__ == "__main__":
    B, T, D, H, C = 2, 8, 4, 128, 10
    key = jax.random.PRNGKey(0)
    k_x, k_p = jax.random.split(key)

    x = jax.random.normal(k_x, (B, T, D), jnp.float32)
    lengths = jnp.array([T, 5], jnp.int32)
    mask = (jnp.arange(T)[None, :] < lengths[:, None]).astype(jnp.float32)  # (B, T)

    params = init_params(k_p, input_dim=D, hidden_dim=H, num_classes=C)

    out = student_lstm_forward(x, mask, params)
    out = jax.block_until_ready(out)
    assert out.shape == (B, C)
    assert bool(jnp.all(jnp.isfinite(out)))

    # strict check vs a reference that mirrors the kernel's bf16 matmul operands
    ref_matched = reference_forward(x, mask, params, match_kernel_precision=True)
    assert jnp.allclose(out, ref_matched, atol=1e-3, rtol=1e-3), \
        "mismatch vs matched-precision reference"

    # loose check vs the full-f32 PyTorch-semantics reference (difference is
    # only the intentional bf16 rounding of recurrent matmul operands)
    ref_f32 = reference_forward(x, mask, params, match_kernel_precision=False)
    assert jnp.allclose(out, ref_f32, atol=3e-2, rtol=3e-2), \
        "mismatch vs f32 reference"

    print("KERNEL_OK")
</pallas_src>

<mosaic_0001>
module attributes {stable_mosaic.version = 11 : i64} {
  func.func @lstm_pool_fc_kernel(%arg0: memref<8x8x4xf32, #tpu.memory_space<vmem>>, %arg1: memref<8x8x1xf32, #tpu.memory_space<vmem>>, %arg2: memref<8x1xf32, #tpu.memory_space<vmem>>, %arg3: memref<4x512xf32, #tpu.memory_space<vmem>>, %arg4: memref<1x512xf32, #tpu.memory_space<vmem>>, %arg5: memref<128x512xbf16, #tpu.memory_space<vmem>>, %arg6: memref<128x512xbf16, #tpu.memory_space<vmem>>, %arg7: memref<128x512xbf16, #tpu.memory_space<vmem>>, %arg8: memref<1x512xf32, #tpu.memory_space<vmem>>, %arg9: memref<128x128xf32, #tpu.memory_space<vmem>>, %arg10: memref<1x128xf32, #tpu.memory_space<vmem>>, %arg11: memref<8x128xf32, #tpu.memory_space<vmem>>, %arg12: memref<8x8x512xf32, #tpu.memory_space<vmem>>) attributes {dimension_semantics = [], scalar_prefetch = 0 : i64, scratch_operands = 1 : i64, tpu.core_type = #tpu.core_type<tc>} {
    %c0 = arith.constant 0 : index
    %c0_0 = arith.constant 0 : index
    %c0_1 = arith.constant 0 : index
    %0 = vector.load %arg0[%c0, %c0_0, %c0_1] : memref<8x8x4xf32, #tpu.memory_space<vmem>>, vector<8x8x4xf32>
    %1 = vector.shape_cast %0 : vector<8x8x4xf32> to vector<64x4xf32>
    %c0_2 = arith.constant 0 : index
    %c0_3 = arith.constant 0 : index
    %2 = vector.load %arg3[%c0_2, %c0_3] : memref<4x512xf32, #tpu.memory_space<vmem>>, vector<4x512xf32>
    %cst = arith.constant dense<0.000000e+00> : vector<64x512xf32>
    %3 = tpu.matmul %1, %2, %cst {dimension_numbers = #tpu.dot_dimension_numbers<[1], [0], [0], [1], [0, 0, 1, 1], [], []>} : vector<64x4xf32>, vector<4x512xf32>, vector<64x512xf32> -> vector<64x512xf32>
    %c0_4 = arith.constant 0 : index
    %c0_5 = arith.constant 0 : index
    %4 = vector.load %arg4[%c0_4, %c0_5] : memref<1x512xf32, #tpu.memory_space<vmem>>, vector<1x512xf32>
    %5 = vector.broadcast %4 : vector<1x512xf32> to vector<64x512xf32>
    %6 = arith.addf %3, %5 : vector<64x512xf32>
    %7 = vector.shape_cast %6 : vector<64x512xf32> to vector<8x8x512xf32>
    %c0_6 = arith.constant 0 : index
    %c0_7 = arith.constant 0 : index
    %c0_8 = arith.constant 0 : index
    %8 = vector.load %arg12[%c0_6, %c0_7, %c0_8] : memref<8x8x512xf32, #tpu.memory_space<vmem>>, vector<8x8x512xf32>
    tpu.vector_store %arg12[%c0_6, %c0_7, %c0_8], %7 {strides = array<i32>} : memref<8x8x512xf32, #tpu.memory_space<vmem>>, vector<8x8x512xf32>,
    %c0_9 = arith.constant 0 : index
    %c0_10 = arith.constant 0 : index
    %9 = vector.load %arg5[%c0_9, %c0_10] : memref<128x512xbf16, #tpu.memory_space<vmem>>, vector<128x512xbf16>
    %c0_11 = arith.constant 0 : index
    %c0_12 = arith.constant 0 : index
    %10 = vector.load %arg6[%c0_11, %c0_12] : memref<128x512xbf16, #tpu.memory_space<vmem>>, vector<128x512xbf16>
    %c0_13 = arith.constant 0 : index
    %c0_14 = arith.constant 0 : index
    %11 = vector.load %arg7[%c0_13, %c0_14] : memref<128x512xbf16, #tpu.memory_space<vmem>>, vector<128x512xbf16>
    %c0_15 = arith.constant 0 : index
    %c0_16 = arith.constant 0 : index
    %12 = vector.load %arg8[%c0_15, %c0_16] : memref<1x512xf32, #tpu.memory_space<vmem>>, vector<1x512xf32>
    %13 = vector.shape_cast %12 : vector<1x512xf32> to vector<1x512xf32>
    %14 = vector.broadcast %13 : vector<1x512xf32> to vector<8x512xf32>
    %cst_17 = arith.constant 0.000000e+00 : f32
    %15 = vector.broadcast %cst_17 : f32 to vector<8x128xf32>
    %c0_i32 = arith.constant 0 : i32
    %16 = arith.index_cast %c0_i32 : i32 to index
    %c0_18 = arith.constant 0 : index
    %c0_19 = arith.constant 0 : index
    %17 = vector.load %arg12[%16, %c0_18, %c0_19] : memref<8x8x512xf32, #tpu.memory_space<vmem>>, vector<1x8x512xf32>
    %18 = vector.shape_cast %17 : vector<1x8x512xf32> to vector<8x512xf32>
    %19 = arith.truncf %15 : vector<8x128xf32> to vector<8x128xbf16>
    %cst_20 = arith.constant dense<0.000000e+00> : vector<8x512xf32>
    %20 = tpu.matmul %19, %9, %cst_20 {dimension_numbers = #tpu.dot_dimension_numbers<[1], [0], [0], [1], [0, 0, 1, 1], [], []>} : vector<8x128xbf16>, vector<128x512xbf16>, vector<8x512xf32> -> vector<8x512xf32>
    %21 = arith.addf %18, %20 : vector<8x512xf32>
    %22 = vector.extract_strided_slice %21 {offsets = [0, 0], sizes = [8, 384], strides = [1, 1]} : vector<8x512xf32> to vector<8x384xf32>
    %23 = arith.negf %22 : vector<8x384xf32>
    %24 = math.exp %23 : vector<8x384xf32>
    %cst_21 = arith.constant 1.000000e+00 : f32
    %25 = vector.broadcast %cst_21 : f32 to vector<8x384xf32>
    %26 = arith.addf %25, %24 : vector<8x384xf32>
    %27 = arith.divf %25, %26 : vector<8x384xf32>
    %28 = vector.extract_strided_slice %27 {offsets = [0, 0], sizes = [8, 128], strides = [1, 1]} : vector<8x384xf32> to vector<8x128xf32>
    %29 = vector.extract_strided_slice %27 {offsets = [0, 128], sizes = [8, 128], strides = [1, 1]} : vector<8x384xf32> to vector<8x128xf32>
    %30 = vector.extract_strided_slice %27 {offsets = [0, 256], sizes = [8, 128], strides = [1, 1]} : vector<8x384xf32> to vector<8x128xf32>
    %31 = vector.extract_strided_slice %21 {offsets = [0, 384], sizes = [8, 128], strides = [1, 1]} : vector<8x512xf32> to vector<8x128xf32>
    %32 = math.tanh %31 : vector<8x128xf32>
    %33 = arith.mulf %29, %15 : vector<8x128xf32>
    %34 = arith.mulf %28, %32 : vector<8x128xf32>
    %35 = arith.addf %33, %34 : vector<8x128xf32>
    %36 = math.tanh %35 : vector<8x128xf32>
    %37 = arith.mulf %30, %36 : vector<8x128xf32>
    %38 = arith.truncf %37 : vector<8x128xf32> to vector<8x128xbf16>
    %cst_22 = arith.constant dense<0.000000e+00> : vector<8x512xf32>
    %39 = tpu.matmul %38, %10, %cst_22 {dimension_numbers = #tpu.dot_dimension_numbers<[1], [0], [0], [1], [0, 0, 1, 1], [], []>} : vector<8x128xbf16>, vector<128x512xbf16>, vector<8x512xf32> -> vector<8x512xf32>
    %40 = arith.truncf %15 : vector<8x128xf32> to vector<8x128xbf16>
    %cst_23 = arith.constant dense<0.000000e+00> : vector<8x512xf32>
    %41 = tpu.matmul %40, %11, %cst_23 {dimension_numbers = #tpu.dot_dimension_numbers<[1], [0], [0], [1], [0, 0, 1, 1], [], []>} : vector<8x128xbf16>, vector<128x512xbf16>, vector<8x512xf32> -> vector<8x512xf32>
    %42 = arith.addf %39, %41 : vector<8x512xf32>
    %43 = arith.addf %42, %14 : vector<8x512xf32>
    %44 = vector.extract_strided_slice %43 {offsets = [0, 0], sizes = [8, 384], strides = [1, 1]} : vector<8x512xf32> to vector<8x384xf32>
    %45 = arith.negf %44 : vector<8x384xf32>
    %46 = math.exp %45 : vector<8x384xf32>
    %cst_24 = arith.constant 1.000000e+00 : f32
    %47 = vector.broadcast %cst_24 : f32 to vector<8x384xf32>
    %48 = arith.addf %47, %46 : vector<8x384xf32>
    %49 = arith.divf %47, %48 : vector<8x384xf32>
    %50 = vector.extract_strided_slice %49 {offsets = [0, 0], sizes = [8, 128], strides = [1, 1]} : vector<8x384xf32> to vector<8x128xf32>
    %51 = vector.extract_strided_slice %49 {offsets = [0, 128], sizes = [8, 128], strides = [1, 1]} : vector<8x384xf32> to vector<8x128xf32>
    %52 = vector.extract_strided_slice %49 {offsets = [0, 256], sizes = [8, 128], strides = [1, 1]} : vector<8x384xf32> to vector<8x128xf32>
    %53 = vector.extract_strided_slice %43 {offsets = [0, 384], sizes = [8, 128], strides = [1, 1]} : vector<8x512xf32> to vector<8x128xf32>
    %54 = math.tanh %53 : vector<8x128xf32>
    %55 = arith.mulf %51, %15 : vector<8x128xf32>
    %56 = arith.mulf %50, %54 : vector<8x128xf32>
    %57 = arith.addf %55, %56 : vector<8x128xf32>
    %58 = math.tanh %57 : vector<8x128xf32>
    %59 = arith.mulf %52, %58 : vector<8x128xf32>
    %60 = arith.index_cast %c0_i32 : i32 to index
    %c0_25 = arith.constant 0 : index
    %c0_26 = arith.constant 0 : index
    %61 = vector.load %arg1[%60, %c0_25, %c0_26] : memref<8x8x1xf32, #tpu.memory_space<vmem>>, vector<1x8x1xf32>
    %62 = vector.shape_cast %61 : vector<1x8x1xf32> to vector<8x1xf32>
    %63 = vector.broadcast %62 : vector<8x1xf32> to vector<8x128xf32>
    %64 = arith.mulf %59, %63 : vector<8x128xf32>
    %65 = arith.addf %15, %64 : vector<8x128xf32>
    %c1_i32 = arith.constant 1 : i32
    %66 = arith.index_cast %c1_i32 : i32 to index
    %c0_27 = arith.constant 0 : index
    %c0_28 = arith.constant 0 : index
    %67 = vector.load %arg12[%66, %c0_27, %c0_28] : memref<8x8x512xf32, #tpu.memory_space<vmem>>, vector<1x8x512xf32>
    %68 = vector.shape_cast %67 : vector<1x8x512xf32> to vector<8x512xf32>
    %69 = arith.truncf %37 : vector<8x128xf32> to vector<8x128xbf16>
    %cst_29 = arith.constant dense<0.000000e+00> : vector<8x512xf32>
    %70 = tpu.matmul %69, %9, %cst_29 {dimension_numbers = #tpu.dot_dimension_numbers<[1], [0], [0], [1], [0, 0, 1, 1], [], []>} : vector<8x128xbf16>, vector<128x512xbf16>, vector<8x512xf32> -> vector<8x512xf32>
    %71 = arith.addf %68, %70 : vector<8x512xf32>
    %72 = vector.extract_strided_slice %71 {offsets = [0, 0], sizes = [8, 384], strides = [1, 1]} : vector<8x512xf32> to vector<8x384xf32>
    %73 = arith.negf %72 : vector<8x384xf32>
    %74 = math.exp %73 : vector<8x384xf32>
    %cst_30 = arith.constant 1.000000e+00 : f32
    %75 = vector.broadcast %cst_30 : f32 to vector<8x384xf32>
    %76 = arith.addf %75, %74 : vector<8x384xf32>
    %77 = arith.divf %75, %76 : vector<8x384xf32>
    %78 = vector.extract_strided_slice %77 {offsets = [0, 0], sizes = [8, 128], strides = [1, 1]} : vector<8x384xf32> to vector<8x128xf32>
    %79 = vector.extract_strided_slice %77 {offsets = [0, 128], sizes = [8, 128], strides = [1, 1]} : vector<8x384xf32> to vector<8x128xf32>
    %80 = vector.extract_strided_slice %77 {offsets = [0, 256], sizes = [8, 128], strides = [1, 1]} : vector<8x384xf32> to vector<8x128xf32>
    %81 = vector.extract_strided_slice %71 {offsets = [0, 384], sizes = [8, 128], strides = [1, 1]} : vector<8x512xf32> to vector<8x128xf32>
    %82 = math.tanh %81 : vector<8x128xf32>
    %83 = arith.mulf %79, %35 : vector<8x128xf32>
    %84 = arith.mulf %78, %82 : vector<8x128xf32>
    %85 = arith.addf %83, %84 : vector<8x128xf32>
    %86 = math.tanh %85 : vector<8x128xf32>
    %87 = arith.mulf %80, %86 : vector<8x128xf32>
    %88 = arith.truncf %87 : vector<8x128xf32> to vector<8x128xbf16>
    %cst_31 = arith.constant dense<0.000000e+00> : vector<8x512xf32>
    %89 = tpu.matmul %88, %10, %cst_31 {dimension_numbers = #tpu.dot_dimension_numbers<[1], [0], [0], [1], [0, 0, 1, 1], [], []>} : vector<8x128xbf16>, vector<128x512xbf16>, vector<8x512xf32> -> vector<8x512xf32>
    %90 = arith.truncf %59 : vector<8x128xf32> to vector<8x128xbf16>
    %cst_32 = arith.constant dense<0.000000e+00> : vector<8x512xf32>
    %91 = tpu.matmul %90, %11, %cst_32 {dimension_numbers = #tpu.dot_dimension_numbers<[1], [0], [0], [1], [0, 0, 1, 1], [], []>} : vector<8x128xbf16>, vector<128x512xbf16>, vector<8x512xf32> -> vector<8x512xf32>
    %92 = arith.addf %89, %91 : vector<8x512xf32>
    %93 = arith.addf %92, %14 : vector<8x512xf32>
    %94 = vector.extract_strided_slice %93 {offsets = [0, 0], sizes = [8, 384], strides = [1, 1]} : vector<8x512xf32> to vector<8x384xf32>
    %95 = arith.negf %94 : vector<8x384xf32>
    %96 = math.exp %95 : vector<8x384xf32>
    %cst_33 = arith.constant 1.000000e+00 : f32
    %97 = vector.broadcast %cst_33 : f32 to vector<8x384xf32>
    %98 = arith.addf %97, %96 : vector<8x384xf32>
    %99 = arith.divf %97, %98 : vector<8x384xf32>
    %100 = vector.extract_strided_slice %99 {offsets = [0, 0], sizes = [8, 128], strides = [1, 1]} : vector<8x384xf32> to vector<8x128xf32>
    %101 = vector.extract_strided_slice %99 {offsets = [0, 128], sizes = [8, 128], strides = [1, 1]} : vector<8x384xf32> to vector<8x128xf32>
    %102 = vector.extract_strided_slice %99 {offsets = [0, 256], sizes = [8, 128], strides = [1, 1]} : vector<8x384xf32> to vector<8x128xf32>
    %103 = vector.extract_strided_slice %93 {offsets = [0, 384], sizes = [8, 128], strides = [1, 1]} : vector<8x512xf32> to vector<8x128xf32>
    %104 = math.tanh %103 : vector<8x128xf32>
    %105 = arith.mulf %101, %57 : vector<8x128xf32>
    %106 = arith.mulf %100, %104 : vector<8x128xf32>
    %107 = arith.addf %105, %106 : vector<8x128xf32>
    %108 = math.tanh %107 : vector<8x128xf32>
    %109 = arith.mulf %102, %108 : vector<8x128xf32>
    %110 = arith.index_cast %c1_i32 : i32 to index
    %c0_34 = arith.constant 0 : index
    %c0_35 = arith.constant 0 : index
    %111 = vector.load %arg1[%110, %c0_34, %c0_35] : memref<8x8x1xf32, #tpu.memory_space<vmem>>, vector<1x8x1xf32>
    %112 = vector.shape_cast %111 : vector<1x8x1xf32> to vector<8x1xf32>
    %113 = vector.broadcast %112 : vector<8x1xf32> to vector<8x128xf32>
    %114 = arith.mulf %109, %113 : vector<8x128xf32>
    %115 = arith.addf %65, %114 : vector<8x128xf32>
    %c2_i32 = arith.constant 2 : i32
    %116 = arith.index_cast %c2_i32 : i32 to index
    %c0_36 = arith.constant 0 : index
    %c0_37 = arith.constant 0 : index
    %117 = vector.load %arg12[%116, %c0_36, %c0_37] : memref<8x8x512xf32, #tpu.memory_space<vmem>>, vector<1x8x512xf32>
    %118 = vector.shape_cast %117 : vector<1x8x512xf32> to vector<8x512xf32>
    %119 = arith.truncf %87 : vector<8x128xf32> to vector<8x128xbf16>
    %cst_38 = arith.constant dense<0.000000e+00> : vector<8x512xf32>
    %120 = tpu.matmul %119, %9, %cst_38 {dimension_numbers = #tpu.dot_dimension_numbers<[1], [0], [0], [1], [0, 0, 1, 1], [], []>} : vector<8x128xbf16>, vector<128x512xbf16>, vector<8x512xf32> -> vector<8x512xf32>
    %121 = arith.addf %118, %120 : vector<8x512xf32>
    %122 = vector.extract_strided_slice %121 {offsets = [0, 0], sizes = [8, 384], strides = [1, 1]} : vector<8x512xf32> to vector<8x384xf32>
    %123 = arith.negf %122 : vector<8x384xf32>
    %124 = math.exp %123 : vector<8x384xf32>
    %cst_39 = arith.constant 1.000000e+00 : f32
    %125 = vector.broadcast %cst_39 : f32 to vector<8x384xf32>
    %126 = arith.addf %125, %124 : vector<8x384xf32>
    %127 = arith.divf %125, %126 : vector<8x384xf32>
    %128 = vector.extract_strided_slice %127 {offsets = [0, 0], sizes = [8, 128], strides = [1, 1]} : vector<8x384xf32> to vector<8x128xf32>
    %129 = vector.extract_strided_slice %127 {offsets = [0, 128], sizes = [8, 128], strides = [1, 1]} : vector<8x384xf32> to vector<8x128xf32>
    %130 = vector.extract_strided_slice %127 {offsets = [0, 256], sizes = [8, 128], strides = [1, 1]} : vector<8x384xf32> to vector<8x128xf32>
    %131 = vector.extract_strided_slice %121 {offsets = [0, 384], sizes = [8, 128], strides = [1, 1]} : vector<8x512xf32> to vector<8x128xf32>
    %132 = math.tanh %131 : vector<8x128xf32>
    %133 = arith.mulf %129, %85 : vector<8x128xf32>
    %134 = arith.mulf %128, %132 : vector<8x128xf32>
    %135 = arith.addf %133, %134 : vector<8x128xf32>
    %136 = math.tanh %135 : vector<8x128xf32>
    %137 = arith.mulf %130, %136 : vector<8x128xf32>
    %138 = arith.truncf %137 : vector<8x128xf32> to vector<8x128xbf16>
    %cst_40 = arith.constant dense<0.000000e+00> : vector<8x512xf32>
    %139 = tpu.matmul %138, %10, %cst_40 {dimension_numbers = #tpu.dot_dimension_numbers<[1], [0], [0], [1], [0, 0, 1, 1], [], []>} : vector<8x128xbf16>, vector<128x512xbf16>, vector<8x512xf32> -> vector<8x512xf32>
    %140 = arith.truncf %109 : vector<8x128xf32> to vector<8x128xbf16>
    %cst_41 = arith.constant dense<0.000000e+00> : vector<8x512xf32>
    %141 = tpu.matmul %140, %11, %cst_41 {dimension_numbers = #tpu.dot_dimension_numbers<[1], [0], [0], [1], [0, 0, 1, 1], [], []>} : vector<8x128xbf16>, vector<128x512xbf16>, vector<8x512xf32> -> vector<8x512xf32>
    %142 = arith.addf %139, %141 : vector<8x512xf32>
    %143 = arith.addf %142, %14 : vector<8x512xf32>
    %144 = vector.extract_strided_slice %143 {offsets = [0, 0], sizes = [8, 384], strides = [1, 1]} : vector<8x512xf32> to vector<8x384xf32>
    %145 = arith.negf %144 : vector<8x384xf32>
    %146 = math.exp %145 : vector<8x384xf32>
    %cst_42 = arith.constant 1.000000e+00 : f32
    %147 = vector.broadcast %cst_42 : f32 to vector<8x384xf32>
    %148 = arith.addf %147, %146 : vector<8x384xf32>
    %149 = arith.divf %147, %148 : vector<8x384xf32>
    %150 = vector.extract_strided_slice %149 {offsets = [0, 0], sizes = [8, 128], strides = [1, 1]} : vector<8x384xf32> to vector<8x128xf32>
    %151 = vector.extract_strided_slice %149 {offsets = [0, 128], sizes = [8, 128], strides = [1, 1]} : vector<8x384xf32> to vector<8x128xf32>
    %152 = vector.extract_strided_slice %149 {offsets = [0, 256], sizes = [8, 128], strides = [1, 1]} : vector<8x384xf32> to vector<8x128xf32>
    %153 = vector.extract_strided_slice %143 {offsets = [0, 384], sizes = [8, 128], strides = [1, 1]} : vector<8x512xf32> to vector<8x128xf32>
    %154 = math.tanh %153 : vector<8x128xf32>
    %155 = arith.mulf %151, %107 : vector<8x128xf32>
    %156 = arith.mulf %150, %154 : vector<8x128xf32>
    %157 = arith.addf %155, %156 : vector<8x128xf32>
    %158 = math.tanh %157 : vector<8x128xf32>
    %159 = arith.mulf %152, %158 : vector<8x128xf32>
    %160 = arith.index_cast %c2_i32 : i32 to index
    %c0_43 = arith.constant 0 : index
    %c0_44 = arith.constant 0 : index
    %161 = vector.load %arg1[%160, %c0_43, %c0_44] : memref<8x8x1xf32, #tpu.memory_space<vmem>>, vector<1x8x1xf32>
    %162 = vector.shape_cast %161 : vector<1x8x1xf32> to vector<8x1xf32>
    %163 = vector.broadcast %162 : vector<8x1xf32> to vector<8x128xf32>
    %164 = arith.mulf %159, %163 : vector<8x128xf32>
    %165 = arith.addf %115, %164 : vector<8x128xf32>
    %c3_i32 = arith.constant 3 : i32
    %166 = arith.index_cast %c3_i32 : i32 to index
    %c0_45 = arith.constant 0 : index
    %c0_46 = arith.constant 0 : index
    %167 = vector.load %arg12[%166, %c0_45, %c0_46] : memref<8x8x512xf32, #tpu.memory_space<vmem>>, vector<1x8x512xf32>
    %168 = vector.shape_cast %167 : vector<1x8x512xf32> to vector<8x512xf32>
    %169 = arith.truncf %137 : vector<8x128xf32> to vector<8x128xbf16>
    %cst_47 = arith.constant dense<0.000000e+00> : vector<8x512xf32>
    %170 = tpu.matmul %169, %9, %cst_47 {dimension_numbers = #tpu.dot_dimension_numbers<[1], [0], [0], [1], [0, 0, 1, 1], [], []>} : vector<8x128xbf16>, vector<128x512xbf16>, vector<8x512xf32> -> vector<8x512xf32>
    %171 = arith.addf %168, %170 : vector<8x512xf32>
    %172 = vector.extract_strided_slice %171 {offsets = [0, 0], sizes = [8, 384], strides = [1, 1]} : vector<8x512xf32> to vector<8x384xf32>
    %173 = arith.negf %172 : vector<8x384xf32>
    %174 = math.exp %173 : vector<8x384xf32>
    %cst_48 = arith.constant 1.000000e+00 : f32
    %175 = vector.broadcast %cst_48 : f32 to vector<8x384xf32>
    %176 = arith.addf %175, %174 : vector<8x384xf32>
    %177 = arith.divf %175, %176 : vector<8x384xf32>
    %178 = vector.extract_strided_slice %177 {offsets = [0, 0], sizes = [8, 128], strides = [1, 1]} : vector<8x384xf32> to vector<8x128xf32>
    %179 = vector.extract_strided_slice %177 {offsets = [0, 128], sizes = [8, 128], strides = [1, 1]} : vector<8x384xf32> to vector<8x128xf32>
    %180 = vector.extract_strided_slice %177 {offsets = [0, 256], sizes = [8, 128], strides = [1, 1]} : vector<8x384xf32> to vector<8x128xf32>
    %181 = vector.extract_strided_slice %171 {offsets = [0, 384], sizes = [8, 128], strides = [1, 1]} : vector<8x512xf32> to vector<8x128xf32>
    %182 = math.tanh %181 : vector<8x128xf32>
    %183 = arith.mulf %179, %135 : vector<8x128xf32>
    %184 = arith.mulf %178, %182 : vector<8x128xf32>
    %185 = arith.addf %183, %184 : vector<8x128xf32>
    %186 = math.tanh %185 : vector<8x128xf32>
    %187 = arith.mulf %180, %186 : vector<8x128xf32>
    %188 = arith.truncf %187 : vector<8x128xf32> to vector<8x128xbf16>
    %cst_49 = arith.constant dense<0.000000e+00> : vector<8x512xf32>
    %189 = tpu.matmul %188, %10, %cst_49 {dimension_numbers = #tpu.dot_dimension_numbers<[1], [0], [0], [1], [0, 0, 1, 1], [], []>} : vector<8x128xbf16>, vector<128x512xbf16>, vector<8x512xf32> -> vector<8x512xf32>
    %190 = arith.truncf %159 : vector<8x128xf32> to vector<8x128xbf16>
    %cst_50 = arith.constant dense<0.000000e+00> : vector<8x512xf32>
    %191 = tpu.matmul %190, %11, %cst_50 {dimension_numbers = #tpu.dot_dimension_numbers<[1], [0], [0], [1], [0, 0, 1, 1], [], []>} : vector<8x128xbf16>, vector<128x512xbf16>, vector<8x512xf32> -> vector<8x512xf32>
    %192 = arith.addf %189, %191 : vector<8x512xf32>
    %193 = arith.addf %192, %14 : vector<8x512xf32>
    %194 = vector.extract_strided_slice %193 {offsets = [0, 0], sizes = [8, 384], strides = [1, 1]} : vector<8x512xf32> to vector<8x384xf32>
    %195 = arith.negf %194 : vector<8x384xf32>
    %196 = math.exp %195 : vector<8x384xf32>
    %cst_51 = arith.constant 1.000000e+00 : f32
    %197 = vector.broadcast %cst_51 : f32 to vector<8x384xf32>
    %198 = arith.addf %197, %196 : vector<8x384xf32>
    %199 = arith.divf %197, %198 : vector<8x384xf32>
    %200 = vector.extract_strided_slice %199 {offsets = [0, 0], sizes = [8, 128], strides = [1, 1]} : vector<8x384xf32> to vector<8x128xf32>
    %201 = vector.extract_strided_slice %199 {offsets = [0, 128], sizes = [8, 128], strides = [1, 1]} : vector<8x384xf32> to vector<8x128xf32>
    %202 = vector.extract_strided_slice %199 {offsets = [0, 256], sizes = [8, 128], strides = [1, 1]} : vector<8x384xf32> to vector<8x128xf32>
    %203 = vector.extract_strided_slice %193 {offsets = [0, 384], sizes = [8, 128], strides = [1, 1]} : vector<8x512xf32> to vector<8x128xf32>
    %204 = math.tanh %203 : vector<8x128xf32>
    %205 = arith.mulf %201, %157 : vector<8x128xf32>
    %206 = arith.mulf %200, %204 : vector<8x128xf32>
    %207 = arith.addf %205, %206 : vector<8x128xf32>
    %208 = math.tanh %207 : vector<8x128xf32>
    %209 = arith.mulf %202, %208 : vector<8x128xf32>
    %210 = arith.index_cast %c3_i32 : i32 to index
    %c0_52 = arith.constant 0 : index
    %c0_53 = arith.constant 0 : index
    %211 = vector.load %arg1[%210, %c0_52, %c0_53] : memref<8x8x1xf32, #tpu.memory_space<vmem>>, vector<1x8x1xf32>
    %212 = vector.shape_cast %211 : vector<1x8x1xf32> to vector<8x1xf32>
    %213 = vector.broadcast %212 : vector<8x1xf32> to vector<8x128xf32>
    %214 = arith.mulf %209, %213 : vector<8x128xf32>
    %215 = arith.addf %165, %214 : vector<8x128xf32>
    %c4_i32 = arith.constant 4 : i32
    %216 = arith.index_cast %c4_i32 : i32 to index
    %c0_54 = arith.constant 0 : index
    %c0_55 = arith.constant 0 : index
    %217 = vector.load %arg12[%216, %c0_54, %c0_55] : memref<8x8x512xf32, #tpu.memory_space<vmem>>, vector<1x8x512xf32>
    %218 = vector.shape_cast %217 : vector<1x8x512xf32> to vector<8x512xf32>
    %219 = arith.truncf %187 : vector<8x128xf32> to vector<8x128xbf16>
    %cst_56 = arith.constant dense<0.000000e+00> : vector<8x512xf32>
    %220 = tpu.matmul %219, %9, %cst_56 {dimension_numbers = #tpu.dot_dimension_numbers<[1], [0], [0], [1], [0, 0, 1, 1], [], []>} : vector<8x128xbf16>, vector<128x512xbf16>, vector<8x512xf32> -> vector<8x512xf32>
    %221 = arith.addf %218, %220 : vector<8x512xf32>
    %222 = vector.extract_strided_slice %221 {offsets = [0, 0], sizes = [8, 384], strides = [1, 1]} : vector<8x512xf32> to vector<8x384xf32>
    %223 = arith.negf %222 : vector<8x384xf32>
    %224 = math.exp %223 : vector<8x384xf32>
    %cst_57 = arith.constant 1.000000e+00 : f32
    %225 = vector.broadcast %cst_57 : f32 to vector<8x384xf32>
    %226 = arith.addf %225, %224 : vector<8x384xf32>
    %227 = arith.divf %225, %226 : vector<8x384xf32>
    %228 = vector.extract_strided_slice %227 {offsets = [0, 0], sizes = [8, 128], strides = [1, 1]} : vector<8x384xf32> to vector<8x128xf32>
    %229 = vector.extract_strided_slice %227 {offsets = [0, 128], sizes = [8, 128], strides = [1, 1]} : vector<8x384xf32> to vector<8x128xf32>
    %230 = vector.extract_strided_slice %227 {offsets = [0, 256], sizes = [8, 128], strides = [1, 1]} : vector<8x384xf32> to vector<8x128xf32>
    %231 = vector.extract_strided_slice %221 {offsets = [0, 384], sizes = [8, 128], strides = [1, 1]} : vector<8x512xf32> to vector<8x128xf32>
    %232 = math.tanh %231 : vector<8x128xf32>
    %233 = arith.mulf %229, %185 : vector<8x128xf32>
    %234 = arith.mulf %228, %232 : vector<8x128xf32>
    %235 = arith.addf %233, %234 : vector<8x128xf32>
    %236 = math.tanh %235 : vector<8x128xf32>
    %237 = arith.mulf %230, %236 : vector<8x128xf32>
    %238 = arith.truncf %237 : vector<8x128xf32> to vector<8x128xbf16>
    %cst_58 = arith.constant dense<0.000000e+00> : vector<8x512xf32>
    %239 = tpu.matmul %238, %10, %cst_58 {dimension_numbers = #tpu.dot_dimension_numbers<[1], [0], [0], [1], [0, 0, 1, 1], [], []>} : vector<8x128xbf16>, vector<128x512xbf16>, vector<8x512xf32> -> vector<8x512xf32>
    %240 = arith.truncf %209 : vector<8x128xf32> to vector<8x128xbf16>
    %cst_59 = arith.constant dense<0.000000e+00> : vector<8x512xf32>
    %241 = tpu.matmul %240, %11, %cst_59 {dimension_numbers = #tpu.dot_dimension_numbers<[1], [0], [0], [1], [0, 0, 1, 1], [], []>} : vector<8x128xbf16>, vector<128x512xbf16>, vector<8x512xf32> -> vector<8x512xf32>
    %242 = arith.addf %239, %241 : vector<8x512xf32>
    %243 = arith.addf %242, %14 : vector<8x512xf32>
    %244 = vector.extract_strided_slice %243 {offsets = [0, 0], sizes = [8, 384], strides = [1, 1]} : vector<8x512xf32> to vector<8x384xf32>
    %245 = arith.negf %244 : vector<8x384xf32>
    %246 = math.exp %245 : vector<8x384xf32>
    %cst_60 = arith.constant 1.000000e+00 : f32
    %247 = vector.broadcast %cst_60 : f32 to vector<8x384xf32>
    %248 = arith.addf %247, %246 : vector<8x384xf32>
    %249 = arith.divf %247, %248 : vector<8x384xf32>
    %250 = vector.extract_strided_slice %249 {offsets = [0, 0], sizes = [8, 128], strides = [1, 1]} : vector<8x384xf32> to vector<8x128xf32>
    %251 = vector.extract_strided_slice %249 {offsets = [0, 128], sizes = [8, 128], strides = [1, 1]} : vector<8x384xf32> to vector<8x128xf32>
    %252 = vector.extract_strided_slice %249 {offsets = [0, 256], sizes = [8, 128], strides = [1, 1]} : vector<8x384xf32> to vector<8x128xf32>
    %253 = vector.extract_strided_slice %243 {offsets = [0, 384], sizes = [8, 128], strides = [1, 1]} : vector<8x512xf32> to vector<8x128xf32>
    %254 = math.tanh %253 : vector<8x128xf32>
    %255 = arith.mulf %251, %207 : vector<8x128xf32>
    %256 = arith.mulf %250, %254 : vector<8x128xf32>
    %257 = arith.addf %255, %256 : vector<8x128xf32>
    %258 = math.tanh %257 : vector<8x128xf32>
    %259 = arith.mulf %252, %258 : vector<8x128xf32>
    %260 = arith.index_cast %c4_i32 : i32 to index
    %c0_61 = arith.constant 0 : index
    %c0_62 = arith.constant 0 : index
    %261 = vector.load %arg1[%260, %c0_61, %c0_62] : memref<8x8x1xf32, #tpu.memory_space<vmem>>, vector<1x8x1xf32>
    %262 = vector.shape_cast %261 : vector<1x8x1xf32> to vector<8x1xf32>
    %263 = vector.broadcast %262 : vector<8x1xf32> to vector<8x128xf32>
    %264 = arith.mulf %259, %263 : vector<8x128xf32>
    %265 = arith.addf %215, %264 : vector<8x128xf32>
    %c5_i32 = arith.constant 5 : i32
    %266 = arith.index_cast %c5_i32 : i32 to index
    %c0_63 = arith.constant 0 : index
    %c0_64 = arith.constant 0 : index
    %267 = vector.load %arg12[%266, %c0_63, %c0_64] : memref<8x8x512xf32, #tpu.memory_space<vmem>>, vector<1x8x512xf32>
    %268 = vector.shape_cast %267 : vector<1x8x512xf32> to vector<8x512xf32>
    %269 = arith.truncf %237 : vector<8x128xf32> to vector<8x128xbf16>
    %cst_65 = arith.constant dense<0.000000e+00> : vector<8x512xf32>
    %270 = tpu.matmul %269, %9, %cst_65 {dimension_numbers = #tpu.dot_dimension_numbers<[1], [0], [0], [1], [0, 0, 1, 1], [], []>} : vector<8x128xbf16>, vector<128x512xbf16>, vector<8x512xf32> -> vector<8x512xf32>
    %271 = arith.addf %268, %270 : vector<8x512xf32>
    %272 = vector.extract_strided_slice %271 {offsets = [0, 0], sizes = [8, 384], strides = [1, 1]} : vector<8x512xf32> to vector<8x384xf32>
    %273 = arith.negf %272 : vector<8x384xf32>
    %274 = math.exp %273 : vector<8x384xf32>
    %cst_66 = arith.constant 1.000000e+00 : f32
    %275 = vector.broadcast %cst_66 : f32 to vector<8x384xf32>
    %276 = arith.addf %275, %274 : vector<8x384xf32>
    %277 = arith.divf %275, %276 : vector<8x384xf32>
    %278 = vector.extract_strided_slice %277 {offsets = [0, 0], sizes = [8, 128], strides = [1, 1]} : vector<8x384xf32> to vector<8x128xf32>
    %279 = vector.extract_strided_slice %277 {offsets = [0, 128], sizes = [8, 128], strides = [1, 1]} : vector<8x384xf32> to vector<8x128xf32>
    %280 = vector.extract_strided_slice %277 {offsets = [0, 256], sizes = [8, 128], strides = [1, 1]} : vector<8x384xf32> to vector<8x128xf32>
    %281 = vector.extract_strided_slice %271 {offsets = [0, 384], sizes = [8, 128], strides = [1, 1]} : vector<8x512xf32> to vector<8x128xf32>
    %282 = math.tanh %281 : vector<8x128xf32>
    %283 = arith.mulf %279, %235 : vector<8x128xf32>
    %284 = arith.mulf %278, %282 : vector<8x128xf32>
    %285 = arith.addf %283, %284 : vector<8x128xf32>
    %286 = math.tanh %285 : vector<8x128xf32>
    %287 = arith.mulf %280, %286 : vector<8x128xf32>
    %288 = arith.truncf %287 : vector<8x128xf32> to vector<8x128xbf16>
    %cst_67 = arith.constant dense<0.000000e+00> : vector<8x512xf32>
    %289 = tpu.matmul %288, %10, %cst_67 {dimension_numbers = #tpu.dot_dimension_numbers<[1], [0], [0], [1], [0, 0, 1, 1], [], []>} : vector<8x128xbf16>, vector<128x512xbf16>, vector<8x512xf32> -> vector<8x512xf32>
    %290 = arith.truncf %259 : vector<8x128xf32> to vector<8x128xbf16>
    %cst_68 = arith.constant dense<0.000000e+00> : vector<8x512xf32>
    %291 = tpu.matmul %290, %11, %cst_68 {dimension_numbers = #tpu.dot_dimension_numbers<[1], [0], [0], [1], [0, 0, 1, 1], [], []>} : vector<8x128xbf16>, vector<128x512xbf16>, vector<8x512xf32> -> vector<8x512xf32>
    %292 = arith.addf %289, %291 : vector<8x512xf32>
    %293 = arith.addf %292, %14 : vector<8x512xf32>
    %294 = vector.extract_strided_slice %293 {offsets = [0, 0], sizes = [8, 384], strides = [1, 1]} : vector<8x512xf32> to vector<8x384xf32>
    %295 = arith.negf %294 : vector<8x384xf32>
    %296 = math.exp %295 : vector<8x384xf32>
    %cst_69 = arith.constant 1.000000e+00 : f32
    %297 = vector.broadcast %cst_69 : f32 to vector<8x384xf32>
    %298 = arith.addf %297, %296 : vector<8x384xf32>
    %299 = arith.divf %297, %298 : vector<8x384xf32>
    %300 = vector.extract_strided_slice %299 {offsets = [0, 0], sizes = [8, 128], strides = [1, 1]} : vector<8x384xf32> to vector<8x128xf32>
    %301 = vector.extract_strided_slice %299 {offsets = [0, 128], sizes = [8, 128], strides = [1, 1]} : vector<8x384xf32> to vector<8x128xf32>
    %302 = vector.extract_strided_slice %299 {offsets = [0, 256], sizes = [8, 128], strides = [1, 1]} : vector<8x384xf32> to vector<8x128xf32>
    %303 = vector.extract_strided_slice %293 {offsets = [0, 384], sizes = [8, 128], strides = [1, 1]} : vector<8x512xf32> to vector<8x128xf32>
    %304 = math.tanh %303 : vector<8x128xf32>
    %305 = arith.mulf %301, %257 : vector<8x128xf32>
    %306 = arith.mulf %300, %304 : vector<8x128xf32>
    %307 = arith.addf %305, %306 : vector<8x128xf32>
    %308 = math.tanh %307 : vector<8x128xf32>
    %309 = arith.mulf %302, %308 : vector<8x128xf32>
    %310 = arith.index_cast %c5_i32 : i32 to index
    %c0_70 = arith.constant 0 : index
    %c0_71 = arith.constant 0 : index
    %311 = vector.load %arg1[%310, %c0_70, %c0_71] : memref<8x8x1xf32, #tpu.memory_space<vmem>>, vector<1x8x1xf32>
    %312 = vector.shape_cast %311 : vector<1x8x1xf32> to vector<8x1xf32>
    %313 = vector.broadcast %312 : vector<8x1xf32> to vector<8x128xf32>
    %314 = arith.mulf %309, %313 : vector<8x128xf32>
    %315 = arith.addf %265, %314 : vector<8x128xf32>
    %c6_i32 = arith.constant 6 : i32
    %316 = arith.index_cast %c6_i32 : i32 to index
    %c0_72 = arith.constant 0 : index
    %c0_73 = arith.constant 0 : index
    %317 = vector.load %arg12[%316, %c0_72, %c0_73] : memref<8x8x512xf32, #tpu.memory_space<vmem>>, vector<1x8x512xf32>
    %318 = vector.shape_cast %317 : vector<1x8x512xf32> to vector<8x512xf32>
    %319 = arith.truncf %287 : vector<8x128xf32> to vector<8x128xbf16>
    %cst_74 = arith.constant dense<0.000000e+00> : vector<8x512xf32>
    %320 = tpu.matmul %319, %9, %cst_74 {dimension_numbers = #tpu.dot_dimension_numbers<[1], [0], [0], [1], [0, 0, 1, 1], [], []>} : vector<8x128xbf16>, vector<128x512xbf16>, vector<8x512xf32> -> vector<8x512xf32>
    %321 = arith.addf %318, %320 : vector<8x512xf32>
    %322 = vector.extract_strided_slice %321 {offsets = [0, 0], sizes = [8, 384], strides = [1, 1]} : vector<8x512xf32> to vector<8x384xf32>
    %323 = arith.negf %322 : vector<8x384xf32>
    %324 = math.exp %323 : vector<8x384xf32>
    %cst_75 = arith.constant 1.000000e+00 : f32
    %325 = vector.broadcast %cst_75 : f32 to vector<8x384xf32>
    %326 = arith.addf %325, %324 : vector<8x384xf32>
    %327 = arith.divf %325, %326 : vector<8x384xf32>
    %328 = vector.extract_strided_slice %327 {offsets = [0, 0], sizes = [8, 128], strides = [1, 1]} : vector<8x384xf32> to vector<8x128xf32>
    %329 = vector.extract_strided_slice %327 {offsets = [0, 128], sizes = [8, 128], strides = [1, 1]} : vector<8x384xf32> to vector<8x128xf32>
    %330 = vector.extract_strided_slice %327 {offsets = [0, 256], sizes = [8, 128], strides = [1, 1]} : vector<8x384xf32> to vector<8x128xf32>
    %331 = vector.extract_strided_slice %321 {offsets = [0, 384], sizes = [8, 128], strides = [1, 1]} : vector<8x512xf32> to vector<8x128xf32>
    %332 = math.tanh %331 : vector<8x128xf32>
    %333 = arith.mulf %329, %285 : vector<8x128xf32>
    %334 = arith.mulf %328, %332 : vector<8x128xf32>
    %335 = arith.addf %333, %334 : vector<8x128xf32>
    %336 = math.tanh %335 : vector<8x128xf32>
    %337 = arith.mulf %330, %336 : vector<8x128xf32>
    %338 = arith.truncf %337 : vector<8x128xf32> to vector<8x128xbf16>
    %cst_76 = arith.constant dense<0.000000e+00> : vector<8x512xf32>
    %339 = tpu.matmul %338, %10, %cst_76 {dimension_numbers = #tpu.dot_dimension_numbers<[1], [0], [0], [1], [0, 0, 1, 1], [], []>} : vector<8x128xbf16>, vector<128x512xbf16>, vector<8x512xf32> -> vector<8x512xf32>
    %340 = arith.truncf %309 : vector<8x128xf32> to vector<8x128xbf16>
    %cst_77 = arith.constant dense<0.000000e+00> : vector<8x512xf32>
    %341 = tpu.matmul %340, %11, %cst_77 {dimension_numbers = #tpu.dot_dimension_numbers<[1], [0], [0], [1], [0, 0, 1, 1], [], []>} : vector<8x128xbf16>, vector<128x512xbf16>, vector<8x512xf32> -> vector<8x512xf32>
    %342 = arith.addf %339, %341 : vector<8x512xf32>
    %343 = arith.addf %342, %14 : vector<8x512xf32>
    %344 = vector.extract_strided_slice %343 {offsets = [0, 0], sizes = [8, 384], strides = [1, 1]} : vector<8x512xf32> to vector<8x384xf32>
    %345 = arith.negf %344 : vector<8x384xf32>
    %346 = math.exp %345 : vector<8x384xf32>
    %cst_78 = arith.constant 1.000000e+00 : f32
    %347 = vector.broadcast %cst_78 : f32 to vector<8x384xf32>
    %348 = arith.addf %347, %346 : vector<8x384xf32>
    %349 = arith.divf %347, %348 : vector<8x384xf32>
    %350 = vector.extract_strided_slice %349 {offsets = [0, 0], sizes = [8, 128], strides = [1, 1]} : vector<8x384xf32> to vector<8x128xf32>
    %351 = vector.extract_strided_slice %349 {offsets = [0, 128], sizes = [8, 128], strides = [1, 1]} : vector<8x384xf32> to vector<8x128xf32>
    %352 = vector.extract_strided_slice %349 {offsets = [0, 256], sizes = [8, 128], strides = [1, 1]} : vector<8x384xf32> to vector<8x128xf32>
    %353 = vector.extract_strided_slice %343 {offsets = [0, 384], sizes = [8, 128], strides = [1, 1]} : vector<8x512xf32> to vector<8x128xf32>
    %354 = math.tanh %353 : vector<8x128xf32>
    %355 = arith.mulf %351, %307 : vector<8x128xf32>
    %356 = arith.mulf %350, %354 : vector<8x128xf32>
    %357 = arith.addf %355, %356 : vector<8x128xf32>
    %358 = math.tanh %357 : vector<8x128xf32>
    %359 = arith.mulf %352, %358 : vector<8x128xf32>
    %360 = arith.index_cast %c6_i32 : i32 to index
    %c0_79 = arith.constant 0 : index
    %c0_80 = arith.constant 0 : index
    %361 = vector.load %arg1[%360, %c0_79, %c0_80] : memref<8x8x1xf32, #tpu.memory_space<vmem>>, vector<1x8x1xf32>
    %362 = vector.shape_cast %361 : vector<1x8x1xf32> to vector<8x1xf32>
    %363 = vector.broadcast %362 : vector<8x1xf32> to vector<8x128xf32>
    %364 = arith.mulf %359, %363 : vector<8x128xf32>
    %365 = arith.addf %315, %364 : vector<8x128xf32>
    %c7_i32 = arith.constant 7 : i32
    %366 = arith.index_cast %c7_i32 : i32 to index
    %c0_81 = arith.constant 0 : index
    %c0_82 = arith.constant 0 : index
    %367 = vector.load %arg12[%366, %c0_81, %c0_82] : memref<8x8x512xf32, #tpu.memory_space<vmem>>, vector<1x8x512xf32>
    %368 = vector.shape_cast %367 : vector<1x8x512xf32> to vector<8x512xf32>
    %369 = arith.truncf %337 : vector<8x128xf32> to vector<8x128xbf16>
    %cst_83 = arith.constant dense<0.000000e+00> : vector<8x512xf32>
    %370 = tpu.matmul %369, %9, %cst_83 {dimension_numbers = #tpu.dot_dimension_numbers<[1], [0], [0], [1], [0, 0, 1, 1], [], []>} : vector<8x128xbf16>, vector<128x512xbf16>, vector<8x512xf32> -> vector<8x512xf32>
    %371 = arith.addf %368, %370 : vector<8x512xf32>
    %372 = vector.extract_strided_slice %371 {offsets = [0, 0], sizes = [8, 384], strides = [1, 1]} : vector<8x512xf32> to vector<8x384xf32>
    %373 = arith.negf %372 : vector<8x384xf32>
    %374 = math.exp %373 : vector<8x384xf32>
    %cst_84 = arith.constant 1.000000e+00 : f32
    %375 = vector.broadcast %cst_84 : f32 to vector<8x384xf32>
    %376 = arith.addf %375, %374 : vector<8x384xf32>
    %377 = arith.divf %375, %376 : vector<8x384xf32>
    %378 = vector.extract_strided_slice %377 {offsets = [0, 0], sizes = [8, 128], strides = [1, 1]} : vector<8x384xf32> to vector<8x128xf32>
    %379 = vector.extract_strided_slice %377 {offsets = [0, 128], sizes = [8, 128], strides = [1, 1]} : vector<8x384xf32> to vector<8x128xf32>
    %380 = vector.extract_strided_slice %377 {offsets = [0, 256], sizes = [8, 128], strides = [1, 1]} : vector<8x384xf32> to vector<8x128xf32>
    %381 = vector.extract_strided_slice %371 {offsets = [0, 384], sizes = [8, 128], strides = [1, 1]} : vector<8x512xf32> to vector<8x128xf32>
    %382 = math.tanh %381 : vector<8x128xf32>
    %383 = arith.mulf %379, %335 : vector<8x128xf32>
    %384 = arith.mulf %378, %382 : vector<8x128xf32>
    %385 = arith.addf %383, %384 : vector<8x128xf32>
    %386 = math.tanh %385 : vector<8x128xf32>
    %387 = arith.mulf %380, %386 : vector<8x128xf32>
    %388 = arith.truncf %387 : vector<8x128xf32> to vector<8x128xbf16>
    %cst_85 = arith.constant dense<0.000000e+00> : vector<8x512xf32>
    %389 = tpu.matmul %388, %10, %cst_85 {dimension_numbers = #tpu.dot_dimension_numbers<[1], [0], [0], [1], [0, 0, 1, 1], [], []>} : vector<8x128xbf16>, vector<128x512xbf16>, vector<8x512xf32> -> vector<8x512xf32>
    %390 = arith.truncf %359 : vector<8x128xf32> to vector<8x128xbf16>
    %cst_86 = arith.constant dense<0.000000e+00> : vector<8x512xf32>
    %391 = tpu.matmul %390, %11, %cst_86 {dimension_numbers = #tpu.dot_dimension_numbers<[1], [0], [0], [1], [0, 0, 1, 1], [], []>} : vector<8x128xbf16>, vector<128x512xbf16>, vector<8x512xf32> -> vector<8x512xf32>
    %392 = arith.addf %389, %391 : vector<8x512xf32>
    %393 = arith.addf %392, %14 : vector<8x512xf32>
    %394 = vector.extract_strided_slice %393 {offsets = [0, 0], sizes = [8, 384], strides = [1, 1]} : vector<8x512xf32> to vector<8x384xf32>
    %395 = arith.negf %394 : vector<8x384xf32>
    %396 = math.exp %395 : vector<8x384xf32>
    %cst_87 = arith.constant 1.000000e+00 : f32
    %397 = vector.broadcast %cst_87 : f32 to vector<8x384xf32>
    %398 = arith.addf %397, %396 : vector<8x384xf32>
    %399 = arith.divf %397, %398 : vector<8x384xf32>
    %400 = vector.extract_strided_slice %399 {offsets = [0, 0], sizes = [8, 128], strides = [1, 1]} : vector<8x384xf32> to vector<8x128xf32>
    %401 = vector.extract_strided_slice %399 {offsets = [0, 128], sizes = [8, 128], strides = [1, 1]} : vector<8x384xf32> to vector<8x128xf32>
    %402 = vector.extract_strided_slice %399 {offsets = [0, 256], sizes = [8, 128], strides = [1, 1]} : vector<8x384xf32> to vector<8x128xf32>
    %403 = vector.extract_strided_slice %393 {offsets = [0, 384], sizes = [8, 128], strides = [1, 1]} : vector<8x512xf32> to vector<8x128xf32>
    %404 = math.tanh %403 : vector<8x128xf32>
    %405 = arith.mulf %401, %357 : vector<8x128xf32>
    %406 = arith.mulf %400, %404 : vector<8x128xf32>
    %407 = arith.addf %405, %406 : vector<8x128xf32>
    %408 = math.tanh %407 : vector<8x128xf32>
    %409 = arith.mulf %402, %408 : vector<8x128xf32>
    %410 = arith.index_cast %c7_i32 : i32 to index
    %c0_88 = arith.constant 0 : index
    %c0_89 = arith.constant 0 : index
    %411 = vector.load %arg1[%410, %c0_88, %c0_89] : memref<8x8x1xf32, #tpu.memory_space<vmem>>, vector<1x8x1xf32>
    %412 = vector.shape_cast %411 : vector<1x8x1xf32> to vector<8x1xf32>
    %413 = vector.broadcast %412 : vector<8x1xf32> to vector<8x128xf32>
    %414 = arith.mulf %409, %413 : vector<8x128xf32>
    %415 = arith.addf %365, %414 : vector<8x128xf32>
    %c8_i32 = arith.constant 8 : i32
    %c0_90 = arith.constant 0 : index
    %c0_91 = arith.constant 0 : index
    %416 = vector.load %arg2[%c0_90, %c0_91] : memref<8x1xf32, #tpu.memory_space<vmem>>, vector<8x1xf32>
    %417 = vector.broadcast %416 : vector<8x1xf32> to vector<8x128xf32>
    %418 = arith.mulf %415, %417 : vector<8x128xf32>
    %c0_92 = arith.constant 0 : index
    %c0_93 = arith.constant 0 : index
    %419 = vector.load %arg9[%c0_92, %c0_93] : memref<128x128xf32, #tpu.memory_space<vmem>>, vector<128x128xf32>
    %cst_94 = arith.constant dense<0.000000e+00> : vector<8x128xf32>
    %420 = tpu.matmul %418, %419, %cst_94 {dimension_numbers = #tpu.dot_dimension_numbers<[1], [0], [0], [1], [0, 0, 1, 1], [], []>} : vector<8x128xf32>, vector<128x128xf32>, vector<8x128xf32> -> vector<8x128xf32>
    %c0_95 = arith.constant 0 : index
    %c0_96 = arith.constant 0 : index
    %421 = vector.load %arg10[%c0_95, %c0_96] : memref<1x128xf32, #tpu.memory_space<vmem>>, vector<1x128xf32>
    %422 = vector.broadcast %421 : vector<1x128xf32> to vector<8x128xf32>
    %423 = arith.addf %420, %422 : vector<8x128xf32>
    %c0_97 = arith.constant 0 : index
    %c0_98 = arith.constant 0 : index
    %424 = vector.load %arg11[%c0_97, %c0_98] : memref<8x128xf32, #tpu.memory_space<vmem>>, vector<8x128xf32>
    tpu.vector_store %arg11[%c0_97, %c0_98], %423 {strides = array<i32>} : memref<8x128xf32, #tpu.memory_space<vmem>>, vector<8x128xf32>,
    return
  }
}

</mosaic_0001>

<bundles_post_ra>
// kernel: tpu_custom_call.1
= control target key start
LH: loop header
LB: loop body
LE: loop exit
PB: predicated region body
PF: predicated region fallthrough
CT: control target
= control target key end

     0   :  { %16 = vsyncpa [#allocation4], 0  ;;  %s6491_s0 = inlined_call_operand.vmem [shape: f32[8,8,4], index: 0, kind: input, shape index: {}]   ;;  %s6492_s1 = inlined_call_operand.vmem [shape: f32[8,8,1], index: 1, kind: input, shape index: {}]   ;;  %s6493_s2 = inlined_call_operand.vmem [shape: f32[8,1], index: 2, kind: input, shape index: {}]   ;;  %s6494_s3 = inlined_call_operand.vmem [shape: f32[4,512], index: 3, kind: input, shape index: {}]   ;;  %s6495_s4 = inlined_call_operand.vmem [shape: f32[1,512], index: 4, kind: input, shape index: {}]   ;;  %s6496_s5 = inlined_call_operand.hbm [shape: bf16[128,512], index: 5, kind: input, shape index: {}]   ;;  %s6497_s6 = inlined_call_operand.hbm [shape: bf16[128,512], index: 6, kind: input, shape index: {}]   ;;  %s6498_s7 = inlined_call_operand.hbm [shape: bf16[128,512], index: 7, kind: input, shape index: {}]   ;;  %s6499_s8 = inlined_call_operand.vmem [shape: f32[1,512], index: 8, kind: input, shape index: {}]   ;;  %s6500_s9 = inlined_call_operand.vmem [shape: f32[128,128], index: 9, kind: input, shape index: {}]   ;;  %s6501_s10 = inlined_call_operand.vmem [shape: f32[1,128], index: 10, kind: input, shape index: {}]   ;;  %s6502_s11 = inlined_call_operand.hbm [shape: f32[8,128], index: 11, kind: output, shape index: {}]  }
   0x1   :  { %17 = vsyncpa [#allocation7], 0 }
   0x2   :  { %18 = vsyncpa [#allocation5], 0  ;;  %s4580_s17 = smov [#allocation6]   ;;  %s4581_s19 = smov [#allocation3]  }
   0x3   :  { %s46_s18 = sshll.u32 %s4580_s17, 4  ;;  %s34_s20 = sshll.u32 %s4581_s19, 4  ;;  %s47_s18 = int_to_ptr.vmem [resolvable:$true] %s46_s18  ;;  %s35_s20 = int_to_ptr.vmem [resolvable:$true] %s34_s20 }
   0x4   :  { %s4502_s21 = scalar_lea.vmem %s47_s18, 4096  ;;  %p4507_p1 = scmp.lt.s32.totalorder %s47_s18, %s47_s18 }
   0x5   :  { %p4503_p0 = scmp.ne.s32.totalorder %s47_s18, %s4502_s21  ;;  %p4508_p2 = scmp.lt.s32.totalorder %s4502_s21, %s4502_s21 }
   0x7   :  { %p4509_p3 = por %p4508_p2, %p4507_p1 }
   0x9   :  { %p4510_p4 = pnand %p4509_p3, %p4503_p0 }
   0xb   :  { %4513 = shalt.err (!%p4510_p4)
}
   0xc   :  { %s4582_s22 = smov 256   ;;  %s4583_s23 = smov 16  }
   0xd   :  { %52 = dma.hbm_to_vmem [thread:$0]  %s6497_s6, 4096, %s47_s18, [#allocation7], %s4582_s22, %s4582_s22, %s4583_s23  }
   0xe   :  { %s4522_s26 = scalar_lea.vmem %s35_s20, 4096  ;;  %p4527_p6 = scmp.lt.s32.totalorder %s35_s20, %s35_s20 }
   0xf   :  { %p4523_p5 = scmp.ne.s32.totalorder %s35_s20, %s4522_s26  ;;  %p4528_p7 = scmp.lt.s32.totalorder %s4522_s26, %s4522_s26 }
  0x11   :  { %p4529_p8 = por %p4528_p7, %p4527_p6 }
  0x13   :  { %p4530_p9 = pnand %p4529_p8, %p4523_p5 }
  0x15   :  { %4533 = shalt.err (!%p4530_p9)
}
  0x16   :  { %40 = dma.hbm_to_vmem [thread:$0]  %s6496_s5, 4096, %s35_s20, [#allocation4], %s4582_s22, %s4582_s22, %s4583_s23  }
  0x17   :  { %s4584_s29 = smov [#allocation8]  }
  0x18   :  { %s58_s30 = sshll.u32 %s4584_s29, 4  ;;  %s59_s30 = int_to_ptr.vmem [resolvable:$true] %s58_s30 }
  0x19   :  { %s4542_s12 = scalar_lea.vmem %s59_s30, 4096  ;;  %p4547_p11 = scmp.lt.s32.totalorder %s59_s30, %s59_s30 }
  0x1a   :  { %p4543_p10 = scmp.ne.s32.totalorder %s59_s30, %s4542_s12  ;;  %p4548_p12 = scmp.lt.s32.totalorder %s4542_s12, %s4542_s12 }
  0x1c   :  { %p4549_p13 = por %p4548_p12, %p4547_p11 }
  0x1e   :  { %p4550_p0 = pnand %p4549_p13, %p4543_p10 }
  0x20   :  { %4553 = shalt.err (!%p4550_p0)
}
  0x21   :  { %64 = dma.hbm_to_vmem [thread:$0]  %s6498_s7, 4096, %s59_s30, [#allocation7], %s4582_s22, %s4582_s22, %s4583_s23  }
  0x22   :  { %4574 = dma.done.wait [#allocation4], 4096  }
  0x23   :  { %4575 = vsyncadd [#allocation4], 4294963200 }
  0x24   :  { %4576 = dma.done.wait [#allocation7], 8192  }
  0x25   :  { %4577 = vsyncadd [#allocation7], 4294959104  ;;  %v6503_v0 = vmov 0.0   ;;  %v6505_v1 = vmov 0   ;;  %v89_v2 = vld [vmem:[%s6494_s3] sm:$0xff]  ;;  %vm142_vm0 = vcmask 1043456  }
  0x26   :  { %215 = vmatprep.mubr.f32.mxu0 %v6503_v0  ;;  %328 = vmatprep.mubr.f32.mxu1 %v6503_v0  ;;  %v90_v3 = vld [vmem:[%s6494_s3 + $0x8] sm:$0xff]  ;;  %v81_v4 = vld [vmem:[%s6491_s0] sm:$0xff]  ;;  %v115_v5 = vcombine.high %v89_v2, %v89_v2  ;;  %vm117_vm1 = vcmask 31744   ;;  %v83_v16 = vld [vmem:[%s6491_s0 + $0x10] sm:$0xff]  ;;  %vm4587_vm2 = vmmov 0   ;;  %s4588_s30 = smov [#allocation9]  }
  0x27   :  { %3898 = vset.pattern.permute.xlu0 %v6505_v1  ;;  %3899 = vset.pattern.permute.xlu1 %v6505_v1  ;;  %v116_v6 = vcombine.high %v90_v3, %v90_v3  ;;  %v4671_v7 = vld [vmem:[#allocation3 + $0xe4] ss:$16 sps:$4 sm:$0xff]   ;;  %v4673_v8 = vld [vmem:[#allocation3 + $0xec] ss:$16 sps:$4 sm:$0xff]   ;;  %v4675_v9 = vld [vmem:[#allocation3 + $0xe0] ss:$16 sps:$4 sm:$0xff]  }
  0x28   :  { %3665 = vmatprep.subr.msk.mxu0 %vm142_vm0, %v115_v5  ;;  %v4677_v10 = vld [vmem:[#allocation3 + $0xe8] ss:$16 sps:$4 sm:$0xff]   ;;  %v4686_v12 = vld [vmem:[#allocation3 + $0xc4] ss:$16 sps:$4 sm:$0xff]   ;;  %v4688_v13 = vld [vmem:[#allocation3 + $0xcc] ss:$16 sps:$4 sm:$0xff]  }
  0x29   :  { %3675 = vmatprep.subr.msk.mxu1 %vm142_vm0, %v116_v6  ;;  %3666 = vmatpush1.msk.msra.mxu0 %vm142_vm0, %v89_v2  ;;  %v82_v11 = vld [vmem:[%s6491_s0 + $0x8] sm:$0xff]  ;;  %v4690_v14 = vld [vmem:[#allocation3 + $0xc0] ss:$16 sps:$4 sm:$0xff]   ;;  %v4703_v17 = vld [vmem:[#allocation3 + $0xa4] ss:$16 sps:$4 sm:$0xff]  }
  0x2a   :  { %3676 = vmatpush1.msk.msra.mxu1 %vm142_vm0, %v90_v3  ;;  %3667 = vmatmul.mubr.msk.f32.vlgmr.msra.gmra.mxu0 %vm117_vm1, %v81_v4  ;;  %v4694_v15 = vld [vmem:[#allocation3 + $0xc8] ss:$16 sps:$4 sm:$0xff]   ;;  %v4705_v18 = vld [vmem:[#allocation3 + $0xac] ss:$16 sps:$4 sm:$0xff]   ;;  %v4709_v19 = vld [vmem:[#allocation3 + $0xa0] ss:$16 sps:$4 sm:$0xff]  }
  0x2b   :  { %3677 = vmatmul.mubr.msk.f32.vlgmr.msra.gmra.mxu1 %vm117_vm1, %v81_v4  ;;  %691 = vmatprep.subr.bf16.mxu0 %v4671_v7  ;;  %v4713_v20 = vld [vmem:[#allocation3 + $0xa8] ss:$16 sps:$4 sm:$0xff]   ;;  %v4722_v22 = vld [vmem:[#allocation3 + $0x84] ss:$16 sps:$4 sm:$0xff]   ;;  %v4726_v23 = vld [vmem:[#allocation3 + $0x8c] ss:$16 sps:$4 sm:$0xff]  }
  0x2c   :  { %732 = vmatprep.subr.bf16.mxu1 %v4673_v8  ;;  %692 = vmatpush1.bf16.msra.mxu0 %v4675_v9  ;;  %v84_v21 = vld [vmem:[%s6491_s0 + $0x18] sm:$0xff]  ;;  %v4730_v24 = vld [vmem:[#allocation3 + $0x80] ss:$16 sps:$4 sm:$0xff]   ;;  %v4743_v27 = vld [vmem:[#allocation3 + $0x64] ss:$16 sps:$4 sm:$0xff]  }
  0x2d   :  { %733 = vmatpush1.bf16.msra.mxu1 %v4677_v10  ;;  %221 = vmatprep.mubr.f32.mxu0 %v6503_v0  ;;  %v4732_v25 = vld [vmem:[#allocation3 + $0x88] ss:$16 sps:$4 sm:$0xff]   ;;  %v85_v26 = vld [vmem:[%s6491_s0 + $0x20] sm:$0xff]  ;;  %v4745_v28 = vld [vmem:[#allocation3 + $0x6c] ss:$16 sps:$4 sm:$0xff]  }
  0x2e   :  { %334 = vmatprep.mubr.f32.mxu1 %v6503_v0  ;;  %3668 = vmatmul.mubr.msk.f32.gmra.mxu0 %vm117_vm1, %v82_v11  ;;  %v4747_v29 = vld [vmem:[#allocation3 + $0x60] ss:$16 sps:$4 sm:$0xff]   ;;  %v4751_v30 = vld [vmem:[#allocation3 + $0x68] ss:$16 sps:$4 sm:$0xff]   ;;  %v4760_v32 = vld [vmem:[#allocation3 + $0x44] ss:$16 sps:$4 sm:$0xff]  }
  0x2f   :  { %3678 = vmatmul.mubr.msk.f32.gmra.mxu1 %vm117_vm1, %v82_v11  ;;  %693 = vmatprep.subr.bf16.mxu0 %v4686_v12  ;;  %v86_v31 = vld [vmem:[%s6491_s0 + $0x28] sm:$0xff]  ;;  %v4766_v34 = vld [vmem:[#allocation3 + $0x40] ss:$16 sps:$4 sm:$0xff]   ;;  %v4777_v37 = vld [vmem:[#allocation3 + $0x24] ss:$16 sps:$4 sm:$0xff]  }
  0x30   :  { %734 = vmatprep.subr.bf16.mxu1 %v4688_v13  ;;  %694 = vmatpush1.bf16.msra.mxu0 %v4690_v14  ;;  %v4762_v33 = vld [vmem:[#allocation3 + $0x4c] ss:$16 sps:$4 sm:$0xff]   ;;  %v4770_v35 = vld [vmem:[#allocation3 + $0x48] ss:$16 sps:$4 sm:$0xff]   ;;  %v87_v36 = vld [vmem:[%s6491_s0 + $0x30] sm:$0xff] }
  0x31   :  { %735 = vmatpush1.bf16.msra.mxu1 %v4694_v15  ;;  %227 = vmatprep.mubr.f32.mxu0 %v6503_v0  ;;  %v4779_v38 = vld [vmem:[#allocation3 + $0x2c] ss:$16 sps:$4 sm:$0xff]   ;;  %v4783_v39 = vld [vmem:[#allocation3 + $0x20] ss:$16 sps:$4 sm:$0xff]   ;;  %v4785_v40 = vld [vmem:[#allocation3 + $0x28] ss:$16 sps:$4 sm:$0xff]  }
  0x32   :  { %340 = vmatprep.mubr.f32.mxu1 %v6503_v0  ;;  %3669 = vmatmul.mubr.msk.f32.gmra.mxu0 %vm117_vm1, %v83_v16  ;;  %v88_v41 = vld [vmem:[%s6491_s0 + $0x38] sm:$0xff]  ;;  %v4796_v42 = vld [vmem:[#allocation3 + $0x4] ss:$16 sps:$4 sm:$0xff]   ;;  %v4802_v44 = vld [vmem:[#allocation3] ss:$16 sps:$4 sm:$0xff]   ;;  %s3655_s0 = sshll.u32 %s4588_s30, 4  ;;  %s3656_s0 = int_to_ptr.vmem [resolvable:$true] %s3655_s0 }
  0x33   :  { %3679 = vmatmul.mubr.msk.f32.gmra.mxu1 %vm117_vm1, %v83_v16  ;;  %695 = vmatprep.subr.bf16.mxu0 %v4703_v17  ;;  %v4798_v43 = vld [vmem:[#allocation3 + $0xc] ss:$16 sps:$4 sm:$0xff]   ;;  %v4804_v45 = vld [vmem:[#allocation3 + $0x8] ss:$16 sps:$4 sm:$0xff]   ;;  %v4824_v46 = vld [vmem:[#allocation8 + $0xe4] ss:$16 sps:$4 sm:$0xff]   ;;  %p4559_p2 = scmp.lt.s32.totalorder %s3656_s0, %s3656_s0 }
  0x34   :  { %736 = vmatprep.subr.bf16.mxu1 %v4705_v18  ;;  %696 = vmatpush1.bf16.msra.mxu0 %v4709_v19  ;;  %v4826_v47 = vld [vmem:[#allocation8 + $0xe0] ss:$16 sps:$4 sm:$0xff]   ;;  %v4830_v48 = vld [vmem:[#allocation8 + $0xec] ss:$16 sps:$4 sm:$0xff]   ;;  %v4832_v49 = vld [vmem:[#allocation8 + $0xc4] ss:$16 sps:$4 sm:$0xff]  }
  0x35   :  { %737 = vmatpush1.bf16.msra.mxu1 %v4713_v20  ;;  %233 = vmatprep.mubr.f32.mxu0 %v6503_v0  ;;  %v4834_v50 = vld [vmem:[#allocation8 + $0xe8] ss:$16 sps:$4 sm:$0xff]   ;;  %v4836_v51 = vld [vmem:[#allocation8 + $0xc0] ss:$16 sps:$4 sm:$0xff]   ;;  %v4842_v52 = vld [vmem:[#allocation8 + $0xcc] ss:$16 sps:$4 sm:$0xff]  }
  0x36   :  { %346 = vmatprep.mubr.f32.mxu1 %v6503_v0  ;;  %3670 = vmatmul.mubr.msk.f32.gmra.mxu0 %vm117_vm1, %v84_v21  ;;  %v4844_v53 = vld [vmem:[#allocation8 + $0xa4] ss:$16 sps:$4 sm:$0xff]   ;;  %v4846_v54 = vld [vmem:[#allocation8 + $0xc8] ss:$16 sps:$4 sm:$0xff]   ;;  %v4850_v55 = vld [vmem:[#allocation8 + $0xa0] ss:$16 sps:$4 sm:$0xff]  }
  0x37   :  { %3680 = vmatmul.mubr.msk.f32.gmra.mxu1 %vm117_vm1, %v84_v21  ;;  %697 = vmatprep.subr.bf16.mxu0 %v4722_v22  ;;  %6772 = vst [vmem:[#allocation13_spill] sm:$0xff] %v4850_v55  ;;  %v4854_v56 = vld [vmem:[#allocation8 + $0xac] ss:$16 sps:$4 sm:$0xff]   ;;  %v4856_v57 = vld [vmem:[#allocation8 + $0x84] ss:$16 sps:$4 sm:$0xff]   ;;  %s4554_s12 = scalar_lea.vmem %s3656_s0, 128 }
  0x38   :  { %738 = vmatprep.subr.bf16.mxu1 %v4726_v23  ;;  %698 = vmatpush1.bf16.msra.mxu0 %v4730_v24  ;;  %6773 = vst [vmem:[#allocation14_spill] sm:$0xff] %v4854_v56  ;;  %6774 = vst [vmem:[#allocation15_spill] sm:$0xff] %v4856_v57  ;;  %v4858_v58 = vld [vmem:[#allocation8 + $0xa8] ss:$16 sps:$4 sm:$0xff]   ;;  %v4860_v59 = vld [vmem:[#allocation8 + $0x80] ss:$16 sps:$4 sm:$0xff]   ;;  %p4555_p1 = scmp.ne.s32.totalorder %s3656_s0, %s4554_s12  ;;  %p4560_p3 = scmp.lt.s32.totalorder %s4554_s12, %s4554_s12 }
  0x39   :  { %739 = vmatpush1.bf16.msra.mxu1 %v4732_v25  ;;  %239 = vmatprep.mubr.f32.mxu0 %v6503_v0  ;;  %6775 = vst [vmem:[#allocation16_spill] sm:$0xff] %v4858_v58  ;;  %6776 = vst [vmem:[#allocation17_spill] sm:$0xff] %v4860_v59  ;;  %v4866_v60 = vld [vmem:[#allocation8 + $0x8c] ss:$16 sps:$4 sm:$0xff]   ;;  %v4868_v61 = vld [vmem:[#allocation8 + $0x64] ss:$16 sps:$4 sm:$0xff]  }
  0x3a   :  { %352 = vmatprep.mubr.f32.mxu1 %v6503_v0  ;;  %3671 = vmatmul.mubr.msk.f32.gmra.mxu0 %vm117_vm1, %v85_v26  ;;  %6777 = vst [vmem:[#allocation18_spill] sm:$0xff] %v4866_v60  ;;  %6778 = vst [vmem:[#allocation19_spill] sm:$0xff] %v4868_v61  ;;  %v4870_v62 = vld [vmem:[#allocation8 + $0x88] ss:$16 sps:$4 sm:$0xff]   ;;  %v4872_v63 = vld [vmem:[#allocation8 + $0x60] ss:$16 sps:$4 sm:$0xff]   ;;  %p4561_p4 = por %p4560_p3, %p4559_p2 }
  0x3b   :  { %3681 = vmatmul.mubr.msk.f32.gmra.mxu1 %vm117_vm1, %v85_v26  ;;  %699 = vmatprep.subr.bf16.mxu0 %v4743_v27  ;;  %6779 = vst [vmem:[#allocation20_spill] sm:$0xff] %v4870_v62  ;;  %6780 = vst [vmem:[#allocation21_spill] sm:$0xff] %v4872_v63  ;;  %v4878_v2 = vld [vmem:[#allocation8 + $0x6c] ss:$16 sps:$4 sm:$0xff]   ;;  %v4880_v3 = vld [vmem:[#allocation8 + $0x44] ss:$16 sps:$4 sm:$0xff]  }
  0x3c   :  { %740 = vmatprep.subr.bf16.mxu1 %v4745_v28  ;;  %700 = vmatpush1.bf16.msra.mxu0 %v4747_v29  ;;  %6781 = vst [vmem:[#allocation22_spill] sm:$0xff] %v4878_v2  ;;  %6782 = vst [vmem:[#allocation23_spill] sm:$0xff] %v4880_v3  ;;  %v4882_v4 = vld [vmem:[#allocation8 + $0x68] ss:$16 sps:$4 sm:$0xff]   ;;  %v4884_v5 = vld [vmem:[#allocation8 + $0x40] ss:$16 sps:$4 sm:$0xff]   ;;  %p4562_p5 = pnand %p4561_p4, %p4555_p1 }
  0x3d   :  { %741 = vmatpush1.bf16.msra.mxu1 %v4751_v30  ;;  %245 = vmatprep.mubr.f32.mxu0 %v6503_v0  ;;  %6783 = vst [vmem:[#allocation24_spill] sm:$0xff] %v4882_v4  ;;  %6784 = vst [vmem:[#allocation25_spill] sm:$0xff] %v4884_v5  ;;  %v4890_v6 = vld [vmem:[#allocation8 + $0x4c] ss:$16 sps:$4 sm:$0xff]   ;;  %v4892_v11 = vld [vmem:[#allocation8 + $0x24] ss:$16 sps:$4 sm:$0xff]  }
  0x3e   :  { %358 = vmatprep.mubr.f32.mxu1 %v6503_v0  ;;  %3672 = vmatmul.mubr.msk.f32.gmra.mxu0 %vm117_vm1, %v86_v31  ;;  %6785 = vst [vmem:[#allocation26_spill] sm:$0xff] %v4890_v6  ;;  %6786 = vst [vmem:[#allocation27_spill] sm:$0xff] %v4892_v11  ;;  %v4894_v16 = vld [vmem:[#allocation8 + $0x48] ss:$16 sps:$4 sm:$0xff]   ;;  %v4896_v21 = vld [vmem:[#allocation8 + $0x20] ss:$16 sps:$4 sm:$0xff]  }
  0x3f   :  { %3682 = vmatmul.mubr.msk.f32.gmra.mxu1 %vm117_vm1, %v86_v31  ;;  %701 = vmatprep.subr.bf16.mxu0 %v4760_v32  ;;  %6787 = vst [vmem:[#allocation28_spill] sm:$0xff] %v4894_v16  ;;  %6788 = vst [vmem:[#allocation29_spill] sm:$0xff] %v4896_v21  ;;  %v4902_v26 = vld [vmem:[#allocation8 + $0x2c] ss:$16 sps:$4 sm:$0xff]   ;;  %v4904_v31 = vld [vmem:[#allocation8 + $0x4] ss:$16 sps:$4 sm:$0xff]  }
  0x40   :  { %742 = vmatprep.subr.bf16.mxu1 %v4762_v33  ;;  %702 = vmatpush1.bf16.msra.mxu0 %v4766_v34  ;;  %6789 = vst [vmem:[#allocation30_spill] sm:$0xff] %v4902_v26  ;;  %6790 = vst [vmem:[#allocation31_spill] sm:$0xff] %v4904_v31 }
  0x41   :  { %743 = vmatpush1.bf16.msra.mxu1 %v4770_v35  ;;  %251 = vmatprep.mubr.f32.mxu0 %v6503_v0 }
  0x42   :  { %364 = vmatprep.mubr.f32.mxu1 %v6503_v0  ;;  %3673 = vmatmul.mubr.msk.f32.gmra.mxu0 %vm117_vm1, %v87_v36 }
  0x43   :  { %3683 = vmatmul.mubr.msk.f32.gmra.mxu1 %vm117_vm1, %v87_v36  ;;  %703 = vmatprep.subr.bf16.mxu0 %v4777_v37  ;;  %v4906_v36 = vld [vmem:[#allocation8 + $0x28] ss:$16 sps:$4 sm:$0xff]  }
  0x44   :  { %744 = vmatprep.subr.bf16.mxu1 %v4779_v38  ;;  %704 = vmatpush1.bf16.msra.mxu0 %v4783_v39  ;;  %6791 = vst [vmem:[#allocation32_spill] sm:$0xff] %v4906_v36 }
  0x45   :  { %745 = vmatpush1.bf16.msra.mxu1 %v4785_v40  ;;  %257 = vmatprep.mubr.f32.mxu0 %v6503_v0 }
  0x46   :  { %370 = vmatprep.mubr.f32.mxu1 %v6503_v0  ;;  %3674 = vmatmul.mubr.msk.f32.gmra.mxu0 %vm117_vm1, %v88_v41  ;;  %v4914_v0 = vld [vmem:[#allocation8 + $0xc] ss:$16 sps:$4 sm:$0xff]  }
  0x47   :  { %3684 = vmatmul.mubr.msk.f32.gmra.mxu1 %vm117_vm1, %v88_v41  ;;  %705 = vmatprep.subr.bf16.mxu0 %v4796_v42  ;;  %v4908_v41 = vld [vmem:[#allocation8] ss:$16 sps:$4 sm:$0xff]   ;;  %6793 = vst [vmem:[#allocation34_spill] sm:$0xff] %v4914_v0 }
  0x48   :  { %746 = vmatprep.subr.bf16.mxu1 %v4798_v43  ;;  %706 = vmatpush1.bf16.msra.mxu0 %v4802_v44  ;;  %6792 = vst [vmem:[#allocation33_spill] sm:$0xff] %v4908_v41 }
  0x49   :  { %747 = vmatpush1.bf16.msra.mxu1 %v4804_v45  ;;  %723 = vmatprep.mubr.bf16.mxu0 %v6505_v1 }
  0x4a   :  { %764 = vmatprep.mubr.bf16.mxu1 %v6505_v1  ;;  %962 = vmatprep.subr.bf16.mxu0 %v4824_v46 }
  0x4b   :  { %724 = vmatmul.mubr.bf16.vlgmr.msra.gmra.mxu0 %v6505_v1  ;;  %1003 = vmatprep.subr.bf16.mxu1 %v4830_v48 }
  0x4c   :  { %765 = vmatmul.mubr.bf16.vlgmr.msra.gmra.mxu1 %v6505_v1  ;;  %994 = vmatprep.mubr.bf16.mxu0 %v6505_v1 }
  0x4d   :  { %1035 = vmatprep.mubr.bf16.mxu1 %v6505_v1  ;;  %963 = vmatpush1.bf16.msra.mxu0 %v4826_v47  ;;  %v4916_v1 = vld [vmem:[#allocation8 + $0x8] ss:$16 sps:$4 sm:$0xff]  }
  0x4e   :  { %964 = vmatprep.subr.bf16.mxu0 %v4832_v49  ;;  %1004 = vmatpush1.bf16.msra.mxu1 %v4834_v50  ;;  %6794 = vst [vmem:[#allocation35_spill] sm:$0xff] %v4916_v1 }
  0x4f   :  { %1005 = vmatprep.subr.bf16.mxu1 %v4842_v52 }
  0x51   :  { %965 = vmatpush1.bf16.msra.mxu0 %v4836_v51 }
  0x52   :  { %966 = vmatprep.subr.bf16.mxu0 %v4844_v53  ;;  %1006 = vmatpush1.bf16.msra.mxu1 %v4846_v54 }
  0x53   :  { %1007 = vmatprep.subr.bf16.mxu1 %v4854_v56 }
  0x55   :  { %967 = vmatpush1.bf16.msra.mxu0 %v4850_v55 }
  0x56   :  { %968 = vmatprep.subr.bf16.mxu0 %v4856_v57  ;;  %1008 = vmatpush1.bf16.msra.mxu1 %v4858_v58 }
  0x57   :  { %1009 = vmatprep.subr.bf16.mxu1 %v4866_v60 }
  0x59   :  { %969 = vmatpush1.bf16.msra.mxu0 %v4860_v59 }
  0x5a   :  { %970 = vmatprep.subr.bf16.mxu0 %v4868_v61  ;;  %1010 = vmatpush1.bf16.msra.mxu1 %v4870_v62 }
  0x5b   :  { %1011 = vmatprep.subr.bf16.mxu1 %v4878_v2 }
  0x5d   :  { %971 = vmatpush1.bf16.msra.mxu0 %v4872_v63 }
  0x5e   :  { %972 = vmatprep.subr.bf16.mxu0 %v4880_v3  ;;  %1012 = vmatpush1.bf16.msra.mxu1 %v4882_v4 }
  0x5f   :  { %1013 = vmatprep.subr.bf16.mxu1 %v4890_v6 }
  0x61   :  { %973 = vmatpush1.bf16.msra.mxu0 %v4884_v5  ;;  %v4970_v5 = vld [vmem:[#allocation6 + $0x64] ss:$16 sps:$4 sm:$0xff]  }
  0x62   :  { %974 = vmatprep.subr.bf16.mxu0 %v4892_v11  ;;  %1014 = vmatpush1.bf16.msra.mxu1 %v4894_v16  ;;  %v4922_v11 = vld [vmem:[#allocation6 + $0xe4] ss:$16 sps:$4 sm:$0xff]   ;;  %v4942_v16 = vld [vmem:[#allocation6 + $0xc8] ss:$16 sps:$4 sm:$0xff]   ;;  %6812 = vst [vmem:[#allocation52_spill] sm:$0xff] %v4970_v5 }
  0x63   :  { %1015 = vmatprep.subr.bf16.mxu1 %v4902_v26  ;;  %6796 = vst [vmem:[#allocation36_spill] sm:$0xff] %v4922_v11  ;;  %v4924_v26 = vld [vmem:[#allocation6 + $0xec] ss:$16 sps:$4 sm:$0xff]   ;;  %6803 = vst [vmem:[#allocation43_spill] sm:$0xff] %v4942_v16 }
  0x64   :  { %6797 = vst [vmem:[#allocation37_spill] sm:$0xff] %v4924_v26 }
  0x65   :  { %975 = vmatpush1.bf16.msra.mxu0 %v4896_v21  ;;  %v6795_v21 = vmov 0  }
  0x66   :  { %976 = vmatprep.subr.bf16.mxu0 %v4904_v31  ;;  %1016 = vmatpush1.bf16.msra.mxu1 %v4906_v36  ;;  %v4926_v31 = vld [vmem:[#allocation6 + $0xe0] ss:$16 sps:$4 sm:$0xff]   ;;  %v4928_v36 = vld [vmem:[#allocation6 + $0xe8] ss:$16 sps:$4 sm:$0xff]  }
  0x67   :  { %1017 = vmatprep.subr.bf16.mxu1 %v4914_v0  ;;  %6798 = vst [vmem:[#allocation38_spill] sm:$0xff] %v4926_v31  ;;  %6799 = vst [vmem:[#allocation39_spill] sm:$0xff] %v4928_v36  ;;  %v4940_v0 = vld [vmem:[#allocation6 + $0xc0] ss:$16 sps:$4 sm:$0xff]  }
  0x68   :  { %6802 = vst [vmem:[#allocation42_spill] sm:$0xff] %v4940_v0 }
  0x69   :  { %977 = vmatpush1.bf16.msra.mxu0 %v4908_v41  ;;  %v4937_v41 = vld [vmem:[#allocation6 + $0xcc] ss:$16 sps:$4 sm:$0xff]  }
  0x6a   :  { %1018 = vmatpush1.bf16.msra.mxu1 %v4916_v1  ;;  %1204 = vmatprep.subr.bf16.mxu0 %v4922_v11  ;;  %v4935_v1 = vld [vmem:[#allocation6 + $0xc4] ss:$16 sps:$4 sm:$0xff]   ;;  %6801 = vst [vmem:[#allocation41_spill] sm:$0xff] %v4937_v41  ;;  %v4954_v11 = vld [vmem:[#allocation6 + $0xa8] ss:$16 sps:$4 sm:$0xff]  }
  0x6b   :  { %1245 = vmatprep.subr.bf16.mxu1 %v4924_v26  ;;  %6800 = vst [vmem:[#allocation40_spill] sm:$0xff] %v4935_v1  ;;  %v4952_v26 = vld [vmem:[#allocation6 + $0xa0] ss:$16 sps:$4 sm:$0xff]   ;;  %6807 = vst [vmem:[#allocation47_spill] sm:$0xff] %v4954_v11 }
  0x6c   :  { %995 = vmatmul.mubr.bf16.vlgmr.msra.gmra.mxu0 %v6795_v21  ;;  %6806 = vst [vmem:[#allocation46_spill] sm:$0xff] %v4952_v26 }
  0x6d   :  { %1236 = vmatprep.mubr.bf16.mxu0 %v6795_v21  ;;  %1036 = vmatmul.mubr.bf16.vlgmr.msra.gmra.mxu1 %v6795_v21 }
  0x6e   :  { %1205 = vmatpush1.bf16.msra.mxu0 %v4926_v31  ;;  %1246 = vmatpush1.bf16.msra.mxu1 %v4928_v36  ;;  %v4948_v31 = vld [vmem:[#allocation6 + $0xa4] ss:$16 sps:$4 sm:$0xff]   ;;  %v4950_v36 = vld [vmem:[#allocation6 + $0xac] ss:$16 sps:$4 sm:$0xff]  }
  0x6f   :  { %1277 = vmatprep.mubr.bf16.mxu1 %v6795_v21  ;;  %1206 = vmatprep.subr.bf16.mxu0 %v4935_v1  ;;  %6804 = vst [vmem:[#allocation44_spill] sm:$0xff] %v4948_v31  ;;  %6805 = vst [vmem:[#allocation45_spill] sm:$0xff] %v4950_v36  ;;  %v4966_v1 = vld [vmem:[#allocation6 + $0x88] ss:$16 sps:$4 sm:$0xff]  }
  0x70   :  { %1247 = vmatprep.subr.bf16.mxu1 %v4937_v41  ;;  %v4960_v41 = vld [vmem:[#allocation6 + $0x84] ss:$16 sps:$4 sm:$0xff]   ;;  %6811 = vst [vmem:[#allocation51_spill] sm:$0xff] %v4966_v1 }
  0x71   :  { %6808 = vst [vmem:[#allocation48_spill] sm:$0xff] %v4960_v41 }
  0x72   :  { %1207 = vmatpush1.bf16.msra.mxu0 %v4940_v0  ;;  %1248 = vmatpush1.bf16.msra.mxu1 %v4942_v16  ;;  %v4962_v0 = vld [vmem:[#allocation6 + $0x8c] ss:$16 sps:$4 sm:$0xff]   ;;  %v4964_v16 = vld [vmem:[#allocation6 + $0x80] ss:$16 sps:$4 sm:$0xff]  }
  0x73   :  { %1208 = vmatprep.subr.bf16.mxu0 %v4948_v31  ;;  %1249 = vmatprep.subr.bf16.mxu1 %v4950_v36  ;;  %6809 = vst [vmem:[#allocation49_spill] sm:$0xff] %v4962_v0  ;;  %6810 = vst [vmem:[#allocation50_spill] sm:$0xff] %v4964_v16  ;;  %v4972_v31 = vld [vmem:[#allocation6 + $0x6c] ss:$16 sps:$4 sm:$0xff]   ;;  %v4981_v36 = vld [vmem:[#allocation6 + $0x44] ss:$16 sps:$4 sm:$0xff]  }
  0x74   :  { %6813 = vst [vmem:[#allocation53_spill] sm:$0xff] %v4972_v31  ;;  %6816 = vst [vmem:[#allocation56_spill] sm:$0xff] %v4981_v36 }
  0x76   :  { %1209 = vmatpush1.bf16.msra.mxu0 %v4952_v26  ;;  %1250 = vmatpush1.bf16.msra.mxu1 %v4954_v11  ;;  %v4975_v26 = vld [vmem:[#allocation6 + $0x60] ss:$16 sps:$4 sm:$0xff]   ;;  %v4979_v11 = vld [vmem:[#allocation6 + $0x68] ss:$16 sps:$4 sm:$0xff]  }
  0x77   :  { %1210 = vmatprep.subr.bf16.mxu0 %v4960_v41  ;;  %1251 = vmatprep.subr.bf16.mxu1 %v4962_v0  ;;  %6814 = vst [vmem:[#allocation54_spill] sm:$0xff] %v4975_v26  ;;  %6815 = vst [vmem:[#allocation55_spill] sm:$0xff] %v4979_v11  ;;  %v4984_v41 = vld [vmem:[#allocation6 + $0x4c] ss:$16 sps:$4 sm:$0xff]   ;;  %v4987_v0 = vld [vmem:[#allocation6 + $0x40] ss:$16 sps:$4 sm:$0xff]  }
  0x78   :  { %6817 = vst [vmem:[#allocation57_spill] sm:$0xff] %v4984_v41  ;;  %6818 = vst [vmem:[#allocation58_spill] sm:$0xff] %v4987_v0 }
  0x7a   :  { %1211 = vmatpush1.bf16.msra.mxu0 %v4964_v16  ;;  %1252 = vmatpush1.bf16.msra.mxu1 %v4966_v1  ;;  %v4991_v16 = vld [vmem:[#allocation6 + $0x48] ss:$16 sps:$4 sm:$0xff]   ;;  %v4993_v1 = vld [vmem:[#allocation6 + $0x24] ss:$16 sps:$4 sm:$0xff]  }
  0x7b   :  { %1212 = vmatprep.subr.bf16.mxu0 %v4970_v5  ;;  %1253 = vmatprep.subr.bf16.mxu1 %v4972_v31  ;;  %6819 = vst [vmem:[#allocation59_spill] sm:$0xff] %v4991_v16  ;;  %6820 = vst [vmem:[#allocation60_spill] sm:$0xff] %v4993_v1  ;;  %v4996_v5 = vld [vmem:[#allocation6 + $0x2c] ss:$16 sps:$4 sm:$0xff]   ;;  %v4999_v31 = vld [vmem:[#allocation6 + $0x20] ss:$16 sps:$4 sm:$0xff]  }
  0x7c   :  { %6821 = vst [vmem:[#allocation61_spill] sm:$0xff] %v4996_v5  ;;  %6822 = vst [vmem:[#allocation62_spill] sm:$0xff] %v4999_v31 }
  0x7e   :  { %1213 = vmatpush1.bf16.msra.mxu0 %v4975_v26  ;;  %1254 = vmatpush1.bf16.msra.mxu1 %v4979_v11  ;;  %v5003_v26 = vld [vmem:[#allocation6 + $0x28] ss:$16 sps:$4 sm:$0xff]   ;;  %v5005_v11 = vld [vmem:[#allocation6 + $0x4] ss:$16 sps:$4 sm:$0xff]  }
  0x7f   :  { %1214 = vmatprep.subr.bf16.mxu0 %v4981_v36  ;;  %1255 = vmatprep.subr.bf16.mxu1 %v4984_v41  ;;  %6823 = vst [vmem:[#allocation63_spill] sm:$0xff] %v5003_v26  ;;  %6824 = vst [vmem:[#allocation64_spill] sm:$0xff] %v5005_v11  ;;  %v5008_v36 = vld [vmem:[#allocation6 + $0xc] ss:$16 sps:$4 sm:$0xff]   ;;  %v5011_v41 = vld [vmem:[#allocation6] ss:$16 sps:$4 sm:$0xff]  }
  0x80   :  { %6825 = vst [vmem:[#allocation65_spill] sm:$0xff] %v5008_v36  ;;  %6826 = vst [vmem:[#allocation66_spill] sm:$0xff] %v5011_v41 }
  0x82   :  { %1215 = vmatpush1.bf16.msra.mxu0 %v4987_v0  ;;  %1256 = vmatpush1.bf16.msra.mxu1 %v4991_v16  ;;  %v5015_v0 = vld [vmem:[#allocation6 + $0x8] ss:$16 sps:$4 sm:$0xff]  }
  0x83   :  { %1216 = vmatprep.subr.bf16.mxu0 %v4993_v1  ;;  %1257 = vmatprep.subr.bf16.mxu1 %v4996_v5  ;;  %6827 = vst [vmem:[#allocation67_spill] sm:$0xff] %v5015_v0  ;;  %v93_v5 = vlaneseq }
  0x86   :  { %1217 = vmatpush1.bf16.msra.mxu0 %v4999_v31  ;;  %1258 = vmatpush1.bf16.msra.mxu1 %v5003_v26  ;;  %v5022_v31 = vshrl.u32 %v93_v5, 7  ;;  %v1314_v26 = vld [vmem:[%s6492_s1] sm:$0xff] }
  0x87   :  { %1218 = vmatprep.subr.bf16.mxu0 %v5005_v11  ;;  %1259 = vmatprep.subr.bf16.mxu1 %v5008_v36 }
  0x88   :  { %6828 = vst [vmem:[#allocation68_spill] sm:$0xff] %v5022_v31  ;;  %1317 = vperm.xlu0 %3898, %v1314_v26   ;;  %v6577_v11 = vsub.s32 0, %v5022_v31  ;;  %v6580_v36 = vsub.s32 2, %v5022_v31  ;;  %v6588_v5 = vsub.s32 3, %v5022_v31 }
  0x8a   :  { %1219 = vmatpush1.bf16.msra.mxu0 %v5011_v41  ;;  %1260 = vmatpush1.bf16.msra.mxu1 %v5015_v0  ;;  %v91_v0 = vld [vmem:[%s6495_s4] sm:$0xf] }
  0x8b   :  { %1327 = vmatprep.subr.bf16.mxu0 %v4671_v7  ;;  %1368 = vmatprep.subr.bf16.mxu1 %v4673_v8  ;;  %v6587_v8 = vsub.s32 1, %v5022_v31  ;;  %v96_v26 = vrot.slane %v91_v0, %v6577_v11  ;;  %v5046_v6 = vrot.slane %v91_v0, %v6580_v36  ;;  %v5052_v2 = vrot.slane %v91_v0, %v6588_v5 }
  0x8d   :  { %v100_v63 = vrot.slane %v91_v0, %v6587_v8 }
  0xea   :  { %v5032_v41 = vpop.f32.mrf.mxu0 }
  0xeb   :  { %v5034_v7 = vpop.f32.mrf.mxu1 }
  0xec   :  { %v5038_v1 = vpop.f32.mrf.mxu0 }
  0xed   :  { %v5040_v16 = vpop.f32.mrf.mxu1 }
  0xee   :  { %v223_v3 = vpop.f32.mrf.mxu0 }
  0xef   :  { %v336_v4 = vpop.f32.mrf.mxu1  ;;  %v5054_v61 = vadd.f32 %v223_v3, %v96_v26 }
  0xf0   :  { %v5057_v62 = vadd.f32 %v336_v4, %v5046_v6  ;;  %v225_v59 = vpop.f32.mrf.mxu0 }
  0xf1   :  { %6829 = vst [vmem:[#allocation69_spill] sm:$0xff] %v5054_v61  ;;  %v338_v11 = vpop.f32.mrf.mxu1  ;;  %v5059_v60 = vadd.f32 %v225_v59, %v100_v63 }
  0xf2   :  { %6830 = vst [vmem:[#allocation70_spill] sm:$0xff] %v5057_v62  ;;  %v5062_v36 = vadd.f32 %v338_v11, %v5052_v2  ;;  %v229_v57 = vpop.f32.mrf.mxu0 }
  0xf3   :  { %6831 = vst [vmem:[#allocation71_spill] sm:$0xff] %v5059_v60  ;;  %v342_v58 = vpop.f32.mrf.mxu1  ;;  %v5064_v55 = vadd.f32 %v229_v57, %v96_v26 }
  0xf4   :  { %6832 = vst [vmem:[#allocation72_spill] sm:$0xff] %v5062_v36  ;;  %v5067_v8 = vadd.f32 %v342_v58, %v5046_v6  ;;  %v231_v0 = vpop.f32.mrf.mxu0 }
  0xf5   :  { %6833 = vst [vmem:[#allocation73_spill] sm:$0xff] %v5064_v55  ;;  %v344_v3 = vpop.f32.mrf.mxu1  ;;  %v5069_v5 = vadd.f32 %v231_v0, %v100_v63 }
  0xf6   :  { %6834 = vst [vmem:[#allocation74_spill] sm:$0xff] %v5067_v8  ;;  %v5072_v4 = vadd.f32 %v344_v3, %v5052_v2  ;;  %v235_v62 = vpop.f32.mrf.mxu0 }
  0xf7   :  { %6835 = vst [vmem:[#allocation75_spill] sm:$0xff] %v5069_v5  ;;  %v348_v59 = vpop.f32.mrf.mxu1  ;;  %v5074_v60 = vadd.f32 %v235_v62, %v96_v26 }
  0xf8   :  { %6836 = vst [vmem:[#allocation76_spill] sm:$0xff] %v5072_v4  ;;  %v5077_v11 = vadd.f32 %v348_v59, %v5046_v6  ;;  %v237_v36 = vpop.f32.mrf.mxu0 }
  0xf9   :  { %6837 = vst [vmem:[#allocation77_spill] sm:$0xff] %v5074_v60  ;;  %v350_v57 = vpop.f32.mrf.mxu1  ;;  %v5079_v55 = vadd.f32 %v237_v36, %v100_v63 }
  0xfa   :  { %6838 = vst [vmem:[#allocation78_spill] sm:$0xff] %v5077_v11  ;;  %v5082_v58 = vadd.f32 %v350_v57, %v5052_v2  ;;  %v241_v8 = vpop.f32.mrf.mxu0 }
  0xfb   :  { %6839 = vst [vmem:[#allocation79_spill] sm:$0xff] %v5079_v55  ;;  %v354_v0 = vpop.f32.mrf.mxu1  ;;  %v5084_v5 = vadd.f32 %v241_v8, %v96_v26 }
  0xfc   :  { %6840 = vst [vmem:[#allocation80_spill] sm:$0xff] %v5082_v58  ;;  %v5087_v3 = vadd.f32 %v354_v0, %v5046_v6  ;;  %v243_v4 = vpop.f32.mrf.mxu0 }
  0xfd   :  { %6841 = vst [vmem:[#allocation81_spill] sm:$0xff] %v5084_v5  ;;  %v356_v62 = vpop.f32.mrf.mxu1  ;;  %v5089_v60 = vadd.f32 %v243_v4, %v100_v63 }
  0xfe   :  { %6842 = vst [vmem:[#allocation82_spill] sm:$0xff] %v5087_v3  ;;  %v5092_v59 = vadd.f32 %v356_v62, %v5052_v2  ;;  %v247_v11 = vpop.f32.mrf.mxu0 }
  0xff   :  { %6843 = vst [vmem:[#allocation83_spill] sm:$0xff] %v5089_v60  ;;  %v360_v36 = vpop.f32.mrf.mxu1  ;;  %v5094_v55 = vadd.f32 %v247_v11, %v96_v26 }
 0x100   :  { %6844 = vst [vmem:[#allocation84_spill] sm:$0xff] %v5092_v59  ;;  %v5097_v57 = vadd.f32 %v360_v36, %v5046_v6  ;;  %v249_v58 = vpop.f32.mrf.mxu0 }
 0x101   :  { %6845 = vst [vmem:[#allocation85_spill] sm:$0xff] %v5094_v55  ;;  %v362_v8 = vpop.f32.mrf.mxu1  ;;  %v5099_v5 = vadd.f32 %v249_v58, %v100_v63 }
 0x102   :  { %6846 = vst [vmem:[#allocation86_spill] sm:$0xff] %v5097_v57  ;;  %v5102_v0 = vadd.f32 %v362_v8, %v5052_v2  ;;  %v253_v3 = vpop.f32.mrf.mxu0 }
 0x103   :  { %6847 = vst [vmem:[#allocation87_spill] sm:$0xff] %v5099_v5  ;;  %v366_v4 = vpop.f32.mrf.mxu1  ;;  %v5104_v60 = vadd.f32 %v253_v3, %v96_v26 }
 0x104   :  { %6848 = vst [vmem:[#allocation88_spill] sm:$0xff] %v5102_v0  ;;  %v5107_v62 = vadd.f32 %v366_v4, %v5046_v6  ;;  %v255_v59 = vpop.f32.mrf.mxu0 }
 0x105   :  { %6849 = vst [vmem:[#allocation89_spill] sm:$0xff] %v5104_v60  ;;  %v368_v11 = vpop.f32.mrf.mxu1  ;;  %v5109_v55 = vadd.f32 %v255_v59, %v100_v63  ;;  %v218_v59 = vadd.f32 %v5032_v41, %v96_v26 }
 0x106   :  { %6850 = vst [vmem:[#allocation90_spill] sm:$0xff] %v5107_v62  ;;  %v5112_v36 = vadd.f32 %v368_v11, %v5052_v2  ;;  %v259_v57 = vpop.f32.mrf.mxu0  ;;  %v220_v11 = vadd.f32 %v5038_v1, %v100_v63 }
 0x107   :  { %6851 = vst [vmem:[#allocation91_spill] sm:$0xff] %v5109_v55  ;;  %v372_v58 = vpop.f32.mrf.mxu1  ;;  %v5114_v5 = vadd.f32 %v259_v57, %v96_v26  ;;  %v333_v26 = vadd.f32 %v5040_v16, %v5052_v2 }
 0x108   :  { %6852 = vst [vmem:[#allocation92_spill] sm:$0xff] %v5112_v36  ;;  %v5117_v8 = vadd.f32 %v372_v58, %v5046_v6  ;;  %v261_v0 = vpop.f32.mrf.mxu0 }
 0x109   :  { %6853 = vst [vmem:[#allocation93_spill] sm:$0xff] %v5114_v5  ;;  %v374_v3 = vpop.f32.mrf.mxu1  ;;  %v5119_v60 = vadd.f32 %v261_v0, %v100_v63 }
 0x10a   :  { %6854 = vst [vmem:[#allocation94_spill] sm:$0xff] %v5117_v8  ;;  %v5122_v4 = vadd.f32 %v374_v3, %v5052_v2  ;;  %v331_v3 = vadd.f32 %v5034_v7, %v5046_v6 }
 0x10b   :  { %6855 = vst [vmem:[#allocation95_spill] sm:$0xff] %v5119_v60  ;;  %v725_v62 = vpop.f32.mrf.mxu0 }
 0x10c   :  { %6856 = vst [vmem:[#allocation96_spill] sm:$0xff] %v5122_v4  ;;  %v766_v55 = vpop.f32.mrf.mxu1  ;;  %v773_v36 = vadd.f32 %v725_v62, %v218_v59  ;;  %v5340_v4 = vld [vmem:[#allocation3 + $0x44] ss:$16 sps:$4 sm:$0xff]  }
 0x10d   :  { %v727_v61 = vpop.f32.mrf.mxu0  ;;  %v775_v41 = vadd.f32 %v766_v55, %v331_v3  ;;  %v6881_v3 = vld [vmem:[#allocation37_spill] sm:$0xff] }
 0x10e   :  { %v768_v57 = vpop.f32.mrf.mxu1  ;;  %v3717_v5 = vmul.f32 -1.442695, %v773_v36  ;;  %v774_v31 = vadd.f32 %v727_v61, %v220_v11 }
 0x10f   :  { %v729_v58 = vpop.f32.mrf.mxu0  ;;  %v3719_v1 = vmul.f32 -1.442695, %v775_v41  ;;  %v776_v62 = vadd.f32 %v768_v57, %v333_v26  ;;  %v505_v41 = vld [vmem:[%s6499_s8] sm:$0xf]  ;;  %v3793_v26 = vld [vmem:[%s6492_s1 + $0x8] sm:$0xff] }
 0x110   :  { %v770_v8 = vpop.f32.mrf.mxu1  ;;  %4046 = vpow2.f32 %v3717_v5  ;;  %v3718_v56 = vmul.f32 -1.442695, %v774_v31  ;;  %v6879_v58 = vld [vmem:[#allocation35_spill] sm:$0xff]  ;;  %1635 = vperm.xlu0 %3898, %v3793_v26  }
 0x111   :  { %v730_v0 = vpop.f32.mrf.mxu0 }
 0x112   :  { %v771_v60 = vpop.f32.mrf.mxu1  ;;  %4048 = vpow2.f32 %v3718_v56  ;;  %v6880_v0 = vld [vmem:[#allocation36_spill] sm:$0xff] }
 0x113   :  { %4050 = vpow2.f32 %v3719_v1  ;;  %v6882_v1 = vld [vmem:[#allocation68_spill] sm:$0xff] }
 0x11d   :  { %v4047_v63 = vpop.eup %4046 }
 0x11e   :  { %v786_v59 = vadd.f32 1.0, %v4047_v63  ;;  %v6883_v63 = vsub.s32 0, %v6882_v1 }
 0x11f   :  { %v4049_v36 = vpop.eup %4048 }
 0x120   :  { %4052 = vrcp.f32 %v786_v59  ;;  %v787_v61 = vadd.f32 1.0, %v4049_v36  ;;  %v4051_v31 = vpop.eup %4050 }
 0x121   :  { %4054 = vtanh.f32 %v776_v62  ;;  %v788_v8 = vadd.f32 1.0, %v4051_v31  ;;  %v5209_v62 = vrot.slane %v505_v41, %v6883_v63  ;;  %v6884_v31 = vsub.s32 1, %v6882_v1 }
 0x122   :  { %4056 = vrcp.f32 %v787_v61  ;;  %v6886_v63 = vsub.s32 3, %v6882_v1 }
 0x123   :  { %4058 = vrcp.f32 %v788_v8 }
 0x12d   :  { %v4053_v60 = vpop.eup %4052 }
 0x12e   :  { %v4055_v56 = vpop.eup %4054 }
 0x12f   :  { %v4057_v5 = vpop.eup %4056  ;;  %v797_v55 = vmul.f32 %v4055_v56, %v4053_v60  ;;  %v5213_v60 = vrot.slane %v505_v41, %v6884_v31 }
 0x130   :  { %v796_v6 = vmul.f32 0.0, %v4057_v5  ;;  %v4059_v2 = vpop.eup %4058 }
 0x132   :  { %v5130_v7 = vadd.f32 %v797_v55, %v796_v6 }
 0x134   :  { %4060 = vtanh.f32 %v5130_v7 }
 0x141   :  { %v4061_v16 = vpop.eup %4060 }
 0x142   :  { %v800_v11 = vmul.f32 %v4061_v16, %v4059_v2 }
 0x144   :  { %v801_v57 = vpack.c.bf16 %v800_v11, %v800_v11 }
 0x146   :  { %1237 = vmatmul.mubr.bf16.vlgmr.msra.gmra.mxu0 %v801_v57  ;;  %1278 = vmatmul.mubr.bf16.vlgmr.msra.gmra.mxu1 %v801_v57 }
 0x147   :  { %1328 = vmatpush1.bf16.msra.mxu0 %v4675_v9  ;;  %1369 = vmatpush1.bf16.msra.mxu1 %v4677_v10  ;;  %v996_v9 = vpop.f32.mrf.mxu0 }
 0x148   :  { %1329 = vmatprep.subr.bf16.mxu0 %v4686_v12  ;;  %1370 = vmatprep.subr.bf16.mxu1 %v4688_v13  ;;  %v1037_v13 = vpop.f32.mrf.mxu1 }
 0x149   :  { %1359 = vmatprep.mubr.bf16.mxu0 %v6795_v21  ;;  %1400 = vmatprep.mubr.bf16.mxu1 %v6795_v21  ;;  %v998_v10 = vpop.f32.mrf.mxu0 }
 0x14b   :  { %1330 = vmatpush1.bf16.msra.mxu0 %v4690_v14  ;;  %1371 = vmatpush1.bf16.msra.mxu1 %v4694_v15  ;;  %v1000_v12 = vpop.f32.mrf.mxu0  ;;  %v1039_v15 = vpop.f32.mrf.mxu1 }
 0x14c   :  { %1331 = vmatprep.subr.bf16.mxu0 %v4703_v17  ;;  %1372 = vmatprep.subr.bf16.mxu1 %v4705_v18  ;;  %v6857_v17 = vld [vmem:[#allocation14_spill] sm:$0xff] }
 0x14d   :  { %v1001_v14 = vpop.f32.mrf.mxu0  ;;  %v1041_v18 = vpop.f32.mrf.mxu1 }
 0x14f   :  { %1332 = vmatpush1.bf16.msra.mxu0 %v4709_v19  ;;  %1373 = vmatpush1.bf16.msra.mxu1 %v4713_v20  ;;  %v1042_v19 = vpop.f32.mrf.mxu1  ;;  %v6858_v20 = vld [vmem:[#allocation13_spill] sm:$0xff] }
 0x150   :  { %1333 = vmatprep.subr.bf16.mxu0 %v4722_v22  ;;  %1374 = vmatprep.subr.bf16.mxu1 %v4726_v23  ;;  %v6859_v22 = vld [vmem:[#allocation16_spill] sm:$0xff]  ;;  %v6860_v23 = vld [vmem:[#allocation15_spill] sm:$0xff] }
 0x153   :  { %1334 = vmatpush1.bf16.msra.mxu0 %v4730_v24  ;;  %1375 = vmatpush1.bf16.msra.mxu1 %v4732_v25  ;;  %v6861_v24 = vld [vmem:[#allocation18_spill] sm:$0xff]  ;;  %v6862_v25 = vld [vmem:[#allocation17_spill] sm:$0xff] }
 0x154   :  { %1335 = vmatprep.subr.bf16.mxu0 %v4743_v27  ;;  %1376 = vmatprep.subr.bf16.mxu1 %v4745_v28  ;;  %v6863_v27 = vld [vmem:[#allocation20_spill] sm:$0xff]  ;;  %v6864_v28 = vld [vmem:[#allocation19_spill] sm:$0xff] }
 0x157   :  { %1336 = vmatpush1.bf16.msra.mxu0 %v4747_v29  ;;  %1377 = vmatpush1.bf16.msra.mxu1 %v4751_v30  ;;  %v6865_v29 = vld [vmem:[#allocation22_spill] sm:$0xff]  ;;  %v6866_v30 = vld [vmem:[#allocation21_spill] sm:$0xff] }
 0x158   :  { %1337 = vmatprep.subr.bf16.mxu0 %v4760_v32  ;;  %1378 = vmatprep.subr.bf16.mxu1 %v4762_v33  ;;  %v6867_v32 = vld [vmem:[#allocation24_spill] sm:$0xff]  ;;  %v6868_v33 = vld [vmem:[#allocation23_spill] sm:$0xff] }
 0x15b   :  { %1338 = vmatpush1.bf16.msra.mxu0 %v4766_v34  ;;  %1379 = vmatpush1.bf16.msra.mxu1 %v4770_v35  ;;  %v6869_v34 = vld [vmem:[#allocation26_spill] sm:$0xff]  ;;  %v6870_v35 = vld [vmem:[#allocation25_spill] sm:$0xff] }
 0x15c   :  { %1339 = vmatprep.subr.bf16.mxu0 %v4777_v37  ;;  %1380 = vmatprep.subr.bf16.mxu1 %v4779_v38  ;;  %v6871_v37 = vld [vmem:[#allocation28_spill] sm:$0xff]  ;;  %v6872_v38 = vld [vmem:[#allocation27_spill] sm:$0xff] }
 0x15f   :  { %1340 = vmatpush1.bf16.msra.mxu0 %v4783_v39  ;;  %1381 = vmatpush1.bf16.msra.mxu1 %v4785_v40  ;;  %v6873_v39 = vld [vmem:[#allocation30_spill] sm:$0xff]  ;;  %v6874_v40 = vld [vmem:[#allocation29_spill] sm:$0xff] }
 0x160   :  { %1341 = vmatprep.subr.bf16.mxu0 %v4796_v42  ;;  %1382 = vmatprep.subr.bf16.mxu1 %v4798_v43  ;;  %v6875_v42 = vld [vmem:[#allocation32_spill] sm:$0xff]  ;;  %v6876_v43 = vld [vmem:[#allocation31_spill] sm:$0xff]  ;;  %6937 = vst [vmem:[#allocation30_spill] sm:$0xff] %v5340_v4 }
 0x163   :  { %1342 = vmatpush1.bf16.msra.mxu0 %v4802_v44  ;;  %1383 = vmatpush1.bf16.msra.mxu1 %v4804_v45  ;;  %v6877_v44 = vld [vmem:[#allocation34_spill] sm:$0xff]  ;;  %v6878_v45 = vld [vmem:[#allocation33_spill] sm:$0xff] }
 0x164   :  { %1439 = vmatprep.subr.bf16.mxu0 %v4824_v46  ;;  %1480 = vmatprep.subr.bf16.mxu1 %v4830_v48 }
 0x166   :  { %1360 = vmatmul.mubr.bf16.vlgmr.msra.gmra.mxu0 %v801_v57  ;;  %1401 = vmatmul.mubr.bf16.vlgmr.msra.gmra.mxu1 %v801_v57 }
 0x167   :  { %1440 = vmatpush1.bf16.msra.mxu0 %v4826_v47  ;;  %1481 = vmatpush1.bf16.msra.mxu1 %v4834_v50 }
 0x168   :  { %1441 = vmatprep.subr.bf16.mxu0 %v4832_v49  ;;  %1482 = vmatprep.subr.bf16.mxu1 %v4842_v52 }
 0x169   :  { %1471 = vmatprep.mubr.bf16.mxu0 %v6795_v21  ;;  %1512 = vmatprep.mubr.bf16.mxu1 %v6795_v21 }
 0x16b   :  { %1442 = vmatpush1.bf16.msra.mxu0 %v4836_v51  ;;  %1483 = vmatpush1.bf16.msra.mxu1 %v4846_v54 }
 0x16c   :  { %1443 = vmatprep.subr.bf16.mxu0 %v4844_v53  ;;  %1484 = vmatprep.subr.bf16.mxu1 %v6857_v17 }
 0x16f   :  { %1444 = vmatpush1.bf16.msra.mxu0 %v6858_v20  ;;  %1485 = vmatpush1.bf16.msra.mxu1 %v6859_v22 }
 0x170   :  { %1445 = vmatprep.subr.bf16.mxu0 %v6860_v23  ;;  %1486 = vmatprep.subr.bf16.mxu1 %v6861_v24 }
 0x173   :  { %1446 = vmatpush1.bf16.msra.mxu0 %v6862_v25  ;;  %1487 = vmatpush1.bf16.msra.mxu1 %v6863_v27 }
 0x174   :  { %1447 = vmatprep.subr.bf16.mxu0 %v6864_v28  ;;  %1488 = vmatprep.subr.bf16.mxu1 %v6865_v29 }
 0x177   :  { %1448 = vmatpush1.bf16.msra.mxu0 %v6866_v30  ;;  %1489 = vmatpush1.bf16.msra.mxu1 %v6867_v32 }
 0x178   :  { %1449 = vmatprep.subr.bf16.mxu0 %v6868_v33  ;;  %1490 = vmatprep.subr.bf16.mxu1 %v6869_v34 }
 0x17b   :  { %1450 = vmatpush1.bf16.msra.mxu0 %v6870_v35  ;;  %1491 = vmatpush1.bf16.msra.mxu1 %v6871_v37 }
 0x17c   :  { %1451 = vmatprep.subr.bf16.mxu0 %v6872_v38  ;;  %1492 = vmatprep.subr.bf16.mxu1 %v6873_v39 }
 0x17f   :  { %1452 = vmatpush1.bf16.msra.mxu0 %v6874_v40  ;;  %1493 = vmatpush1.bf16.msra.mxu1 %v6875_v42 }
 0x180   :  { %1453 = vmatprep.subr.bf16.mxu0 %v6876_v43  ;;  %1494 = vmatprep.subr.bf16.mxu1 %v6877_v44 }
 0x183   :  { %1454 = vmatpush1.bf16.msra.mxu0 %v6878_v45  ;;  %1495 = vmatpush1.bf16.msra.mxu1 %v6879_v58 }
 0x184   :  { %1521 = vmatprep.subr.bf16.mxu0 %v6880_v0  ;;  %1562 = vmatprep.subr.bf16.mxu1 %v6881_v3 }
 0x206   :  { %v1238_v59 = vpop.f32.mrf.mxu0  ;;  %v1279_v36 = vpop.f32.mrf.mxu1 }
 0x207   :  { %v1239_v61 = vadd.f32 %v1238_v59, %v996_v9  ;;  %v6885_v9 = vsub.s32 2, %v6882_v1  ;;  %v1280_v19 = vadd.f32 %v1279_v36, %v1037_v13  ;;  %v6887_v36 = vld [vmem:[#allocation69_spill] sm:$0xff] }
 0x208   :  { %v1240_v56 = vpop.f32.mrf.mxu0  ;;  %v1281_v5 = vpop.f32.mrf.mxu1 }
 0x209   :  { %v1286_v8 = vadd.f32 %v1239_v61, %v5209_v62  ;;  %v1241_v6 = vadd.f32 %v1240_v56, %v998_v10  ;;  %v5219_v18 = vrot.slane %v505_v41, %v6885_v9  ;;  %v5224_v10 = vrot.slane %v505_v41, %v6886_v63 }
 0x20a   :  { %v1242_v55 = vpop.f32.mrf.mxu0  ;;  %v1283_v2 = vpop.f32.mrf.mxu1  ;;  %v1282_v59 = vadd.f32 %v1281_v5, %v1039_v15  ;;  %v6888_v15 = vld [vmem:[#allocation71_spill] sm:$0xff] }
 0x20b   :  { %v3784_v16 = vmul.f32 -1.442695, %v1286_v8  ;;  %v1287_v11 = vadd.f32 %v1241_v6, %v5213_v60  ;;  %v1288_v26 = vadd.f32 %v1280_v19, %v5219_v18 }
 0x20c   :  { %v1243_v57 = vpop.f32.mrf.mxu0  ;;  %v1284_v12 = vpop.f32.mrf.mxu1  ;;  %v1289_v56 = vadd.f32 %v1282_v59, %v5224_v10 }
 0x20d   :  { %4062 = vpow2.f32 %v3784_v16  ;;  %v3785_v14 = vmul.f32 -1.442695, %v1287_v11  ;;  %v3786_v61 = vmul.f32 -1.442695, %v1288_v26 }
 0x20f   :  { %4064 = vpow2.f32 %v3785_v14 }
 0x210   :  { %4066 = vpow2.f32 %v3786_v61 }
 0x21a   :  { %v4063_v31 = vpop.eup %4062 }
 0x21b   :  { %v1299_v8 = vadd.f32 1.0, %v4063_v31 }
 0x21c   :  { %v4065_v6 = vpop.eup %4064 }
 0x21d   :  { %4068 = vrcp.f32 %v1299_v8  ;;  %v1300_v55 = vadd.f32 1.0, %v4065_v6  ;;  %v4067_v41 = vpop.eup %4066 }
 0x21e   :  { %4070 = vtanh.f32 %v1289_v56  ;;  %v1301_v59 = vadd.f32 1.0, %v4067_v41 }
 0x21f   :  { %4072 = vrcp.f32 %v1300_v55  ;;  %v6889_v55 = vld [vmem:[#allocation70_spill] sm:$0xff] }
 0x226   :  { %v1361_v2 = vpop.f32.mrf.mxu0  ;;  %v1402_v13 = vpop.f32.mrf.mxu1 }
 0x227   :  { %v1409_v16 = vadd.f32 %v1361_v2, %v6887_v36  ;;  %v1411_v2 = vadd.f32 %v1402_v13, %v6889_v55 }
 0x228   :  { %v1363_v11 = vpop.f32.mrf.mxu0  ;;  %v1404_v1 = vpop.f32.mrf.mxu1 }
 0x229   :  { %v3787_v57 = vmul.f32 -1.442695, %v1409_v16  ;;  %v1410_v5 = vadd.f32 %v1363_v11, %v6888_v15  ;;  %v3789_v36 = vmul.f32 -1.442695, %v1411_v2  ;;  %v6890_v16 = vld [vmem:[#allocation72_spill] sm:$0xff] }
 0x22a   :  { %v4069_v12 = vpop.eup %4068  ;;  %v1365_v14 = vpop.f32.mrf.mxu0  ;;  %v1412_v11 = vadd.f32 %v1404_v1, %v6890_v16  ;;  %v6892_v1 = vld [vmem:[#allocation39_spill] sm:$0xff]  ;;  %v6897_v2 = vld [vmem:[#allocation44_spill] sm:$0xff] }
 0x22b   :  { %v1406_v9 = vpop.f32.mrf.mxu1  ;;  %v4071_v19 = vpop.eup %4070  ;;  %4074 = vpow2.f32 %v3787_v57  ;;  %v3788_v26 = vmul.f32 -1.442695, %v1410_v5 }
 0x22c   :  { %v4073_v63 = vpop.eup %4072  ;;  %v1366_v61 = vpop.f32.mrf.mxu0  ;;  %v1310_v8 = vmul.f32 %v4071_v19, %v4069_v12  ;;  %v6891_v19 = vld [vmem:[#allocation38_spill] sm:$0xff] }
 0x22d   :  { %v1407_v31 = vpop.f32.mrf.mxu1  ;;  %v1309_v56 = vmul.f32 0.0, %v4073_v63  ;;  %4076 = vpow2.f32 %v3788_v26  ;;  %v6893_v26 = vld [vmem:[#allocation40_spill] sm:$0xff]  ;;  %v6894_v63 = vld [vmem:[#allocation41_spill] sm:$0xff] }
 0x22e   :  { %4078 = vrcp.f32 %v1301_v59 }
 0x22f   :  { %v5229_v6 = vadd.f32 %v1310_v8, %v1309_v56  ;;  %v6895_v56 = vld [vmem:[#allocation42_spill] sm:$0xff]  ;;  %v6896_v8 = vld [vmem:[#allocation43_spill] sm:$0xff] }
 0x231   :  { %4080 = vtanh.f32 %v5229_v6 }
 0x232   :  { %4082 = vpow2.f32 %v3789_v36  ;;  %v6898_v36 = vld [vmem:[#allocation45_spill] sm:$0xff] }
 0x233   :  { %4084 = vtanh.f32 %v1412_v11 }
 0x238   :  { %v4075_v15 = vpop.eup %4074 }
 0x239   :  { %v1422_v57 = vadd.f32 1.0, %v4075_v15 }
 0x23a   :  { %v4077_v5 = vpop.eup %4076 }
 0x23b   :  { %4086 = vrcp.f32 %v1422_v57  ;;  %v1423_v41 = vadd.f32 1.0, %v4077_v5  ;;  %v4079_v14 = vpop.eup %4078  ;;  %v6899_v57 = vld [vmem:[#allocation46_spill] sm:$0xff]  ;;  %v6900_v5 = vld [vmem:[#allocation47_spill] sm:$0xff] }
 0x23d   :  { %4088 = vrcp.f32 %v1423_v41 }
 0x23e   :  { %v4081_v12 = vpop.eup %4080 }
 0x23f   :  { %v5234_v9 = vmul.f32 %v4081_v12, %v4079_v14  ;;  %v4083_v59 = vpop.eup %4082  ;;  %v6901_v14 = vld [vmem:[#allocation48_spill] sm:$0xff]  ;;  %v6902_v12 = vld [vmem:[#allocation49_spill] sm:$0xff] }
 0x240   :  { %v4085_v61 = vpop.eup %4084  ;;  %v1424_v11 = vadd.f32 1.0, %v4083_v59  ;;  %v6909_v59 = vld [vmem:[#allocation56_spill] sm:$0xff] }
 0x241   :  { %v1438_v13 = vpack.c.bf16 %v5234_v9, %v5234_v9 }
 0x242   :  { %4090 = vrcp.f32 %v1424_v11  ;;  %v6916_v11 = vld [vmem:[#allocation63_spill] sm:$0xff] }
 0x243   :  { %1472 = vmatmul.mubr.bf16.vlgmr.msra.gmra.mxu0 %v1438_v13  ;;  %1513 = vmatmul.mubr.bf16.vlgmr.msra.gmra.mxu1 %v1438_v13  ;;  %v6903_v13 = vld [vmem:[#allocation50_spill] sm:$0xff] }
 0x244   :  { %1522 = vmatpush1.bf16.msra.mxu0 %v6891_v19  ;;  %1563 = vmatpush1.bf16.msra.mxu1 %v6892_v1  ;;  %v6904_v19 = vld [vmem:[#allocation51_spill] sm:$0xff]  ;;  %v6905_v1 = vld [vmem:[#allocation52_spill] sm:$0xff] }
 0x245   :  { %1523 = vmatprep.subr.bf16.mxu0 %v6893_v26  ;;  %1564 = vmatprep.subr.bf16.mxu1 %v6894_v63  ;;  %v6907_v26 = vld [vmem:[#allocation54_spill] sm:$0xff]  ;;  %v6908_v63 = vld [vmem:[#allocation55_spill] sm:$0xff] }
 0x246   :  { %1553 = vmatprep.mubr.bf16.mxu0 %v6795_v21  ;;  %1594 = vmatprep.mubr.bf16.mxu1 %v6795_v21 }
 0x248   :  { %v4087_v31 = vpop.eup %4086  ;;  %1524 = vmatpush1.bf16.msra.mxu0 %v6895_v56  ;;  %1565 = vmatpush1.bf16.msra.mxu1 %v6896_v8  ;;  %v6912_v56 = vld [vmem:[#allocation59_spill] sm:$0xff]  ;;  %v6913_v8 = vld [vmem:[#allocation60_spill] sm:$0xff] }
 0x249   :  { %v1433_v55 = vmul.f32 %v4087_v31, %v4085_v61  ;;  %1525 = vmatprep.subr.bf16.mxu0 %v6897_v2  ;;  %1566 = vmatprep.subr.bf16.mxu1 %v6898_v36  ;;  %v6910_v61 = vld [vmem:[#allocation57_spill] sm:$0xff]  ;;  %v6911_v31 = vld [vmem:[#allocation58_spill] sm:$0xff] }
 0x24a   :  { %v4089_v16 = vpop.eup %4088 }
 0x24b   :  { %v1432_v15 = vmul.f32 %v4089_v16, %v5130_v7  ;;  %v6906_v7 = vld [vmem:[#allocation53_spill] sm:$0xff]  ;;  %v6915_v16 = vld [vmem:[#allocation62_spill] sm:$0xff] }
 0x24c   :  { %1526 = vmatpush1.bf16.msra.mxu0 %v6899_v57  ;;  %1567 = vmatpush1.bf16.msra.mxu1 %v6900_v5  ;;  %v6918_v57 = vld [vmem:[#allocation65_spill] sm:$0xff] }
 0x24d   :  { %v5251_v41 = vadd.f32 %v1433_v55, %v1432_v15  ;;  %1527 = vmatprep.subr.bf16.mxu0 %v6901_v14  ;;  %1568 = vmatprep.subr.bf16.mxu1 %v6902_v12  ;;  %v6914_v55 = vld [vmem:[#allocation61_spill] sm:$0xff]  ;;  %v6917_v15 = vld [vmem:[#allocation64_spill] sm:$0xff]  ;;  %v6919_v14 = vld [vmem:[#allocation66_spill] sm:$0xff] }
 0x24e   :  { %v6920_v12 = vld [vmem:[#allocation67_spill] sm:$0xff] }
 0x24f   :  { %4092 = vtanh.f32 %v5251_v41  ;;  %v4091_v2 = vpop.eup %4090 }
 0x250   :  { %1528 = vmatpush1.bf16.msra.mxu0 %v6903_v13  ;;  %1569 = vmatpush1.bf16.msra.mxu1 %v6904_v19  ;;  %v5276_v19 = vld [vmem:[#allocation3 + $0xe4] ss:$16 sps:$4 sm:$0xff]  }
 0x251   :  { %1529 = vmatprep.subr.bf16.mxu0 %v6905_v1  ;;  %1570 = vmatprep.subr.bf16.mxu1 %v6906_v7  ;;  %v5279_v1 = vld [vmem:[#allocation3 + $0xec] ss:$16 sps:$4 sm:$0xff]   ;;  %v5284_v7 = vld [vmem:[#allocation3 + $0xe0] ss:$16 sps:$4 sm:$0xff]  }
 0x254   :  { %1530 = vmatpush1.bf16.msra.mxu0 %v6907_v26  ;;  %1571 = vmatpush1.bf16.msra.mxu1 %v6908_v63  ;;  %v5287_v26 = vld [vmem:[#allocation3 + $0xe8] ss:$16 sps:$4 sm:$0xff]   ;;  %v5290_v63 = vld [vmem:[#allocation3 + $0xc4] ss:$16 sps:$4 sm:$0xff]  }
 0x255   :  { %1531 = vmatprep.subr.bf16.mxu0 %v6909_v59  ;;  %1572 = vmatprep.subr.bf16.mxu1 %v6910_v61  ;;  %6921 = vst [vmem:[#allocation14_spill] sm:$0xff] %v5290_v63  ;;  %v5293_v59 = vld [vmem:[#allocation3 + $0xcc] ss:$16 sps:$4 sm:$0xff]   ;;  %v5298_v61 = vld [vmem:[#allocation3 + $0xc0] ss:$16 sps:$4 sm:$0xff]  }
 0x256   :  { %6922 = vst [vmem:[#allocation13_spill] sm:$0xff] %v5293_v59  ;;  %6923 = vst [vmem:[#allocation16_spill] sm:$0xff] %v5298_v61 }
 0x258   :  { %1532 = vmatpush1.bf16.msra.mxu0 %v6911_v31  ;;  %1573 = vmatpush1.bf16.msra.mxu1 %v6912_v56  ;;  %v5301_v31 = vld [vmem:[#allocation3 + $0xc8] ss:$16 sps:$4 sm:$0xff]   ;;  %v5304_v56 = vld [vmem:[#allocation3 + $0xa4] ss:$16 sps:$4 sm:$0xff]  }
 0x259   :  { %1533 = vmatprep.subr.bf16.mxu0 %v6913_v8  ;;  %1574 = vmatprep.subr.bf16.mxu1 %v6914_v55  ;;  %6924 = vst [vmem:[#allocation15_spill] sm:$0xff] %v5301_v31  ;;  %6925 = vst [vmem:[#allocation18_spill] sm:$0xff] %v5304_v56  ;;  %v5307_v8 = vld [vmem:[#allocation3 + $0xac] ss:$16 sps:$4 sm:$0xff]   ;;  %v5310_v55 = vld [vmem:[#allocation3 + $0xa0] ss:$16 sps:$4 sm:$0xff]  }
 0x25a   :  { %6926 = vst [vmem:[#allocation17_spill] sm:$0xff] %v5307_v8  ;;  %6927 = vst [vmem:[#allocation20_spill] sm:$0xff] %v5310_v55 }
 0x25c   :  { %v4093_v36 = vpop.eup %4092  ;;  %1534 = vmatpush1.bf16.msra.mxu0 %v6915_v16  ;;  %1575 = vmatpush1.bf16.msra.mxu1 %v6916_v11  ;;  %v5319_v16 = vld [vmem:[#allocation3 + $0x8c] ss:$16 sps:$4 sm:$0xff]   ;;  %v5322_v11 = vld [vmem:[#allocation3 + $0x80] ss:$16 sps:$4 sm:$0xff]  }
 0x25d   :  { %1535 = vmatprep.subr.bf16.mxu0 %v6917_v15  ;;  %1576 = vmatprep.subr.bf16.mxu1 %v6918_v57  ;;  %v1436_v5 = vmul.f32 %v4093_v36, %v4091_v2  ;;  %v5313_v2 = vld [vmem:[#allocation3 + $0xa8] ss:$16 sps:$4 sm:$0xff]   ;;  %v5316_v36 = vld [vmem:[#allocation3 + $0x84] ss:$16 sps:$4 sm:$0xff]   ;;  %6930 = vst [vmem:[#allocation21_spill] sm:$0xff] %v5319_v16  ;;  %6931 = vst [vmem:[#allocation24_spill] sm:$0xff] %v5322_v11 }
 0x25e   :  { %6928 = vst [vmem:[#allocation19_spill] sm:$0xff] %v5313_v2  ;;  %6929 = vst [vmem:[#allocation22_spill] sm:$0xff] %v5316_v36  ;;  %v5325_v15 = vld [vmem:[#allocation3 + $0x88] ss:$16 sps:$4 sm:$0xff]   ;;  %v5328_v57 = vld [vmem:[#allocation3 + $0x64] ss:$16 sps:$4 sm:$0xff]  }
 0x25f   :  { %v5274_v13 = vpack.c.bf16 %v1436_v5, %v1436_v5  ;;  %6932 = vst [vmem:[#allocation23_spill] sm:$0xff] %v5325_v15  ;;  %6933 = vst [vmem:[#allocation26_spill] sm:$0xff] %v5328_v57  ;;  %v5331_v5 = vld [vmem:[#allocation3 + $0x6c] ss:$16 sps:$4 sm:$0xff]  }
 0x260   :  { %1536 = vmatpush1.bf16.msra.mxu0 %v6919_v14  ;;  %1577 = vmatpush1.bf16.msra.mxu1 %v6920_v12  ;;  %6934 = vst [vmem:[#allocation25_spill] sm:$0xff] %v5331_v5  ;;  %v5334_v14 = vld [vmem:[#allocation3 + $0x60] ss:$16 sps:$4 sm:$0xff]   ;;  %v5337_v12 = vld [vmem:[#allocation3 + $0x68] ss:$16 sps:$4 sm:$0xff]  }
 0x261   :  { %1645 = vmatprep.subr.bf16.mxu0 %v5276_v19  ;;  %1686 = vmatprep.subr.bf16.mxu1 %v5279_v1  ;;  %6935 = vst [vmem:[#allocation28_spill] sm:$0xff] %v5334_v14  ;;  %6936 = vst [vmem:[#allocation27_spill] sm:$0xff] %v5337_v12 }
 0x263   :  { %1554 = vmatmul.mubr.bf16.vlgmr.msra.gmra.mxu0 %v5274_v13  ;;  %1595 = vmatmul.mubr.bf16.vlgmr.msra.gmra.mxu1 %v5274_v13 }
 0x264   :  { %1646 = vmatpush1.bf16.msra.mxu0 %v5284_v7  ;;  %1687 = vmatpush1.bf16.msra.mxu1 %v5287_v26 }
 0x265   :  { %1647 = vmatprep.subr.bf16.mxu0 %v5290_v63  ;;  %1688 = vmatprep.subr.bf16.mxu1 %v5293_v59 }
 0x266   :  { %1677 = vmatprep.mubr.bf16.mxu0 %v6795_v21  ;;  %1718 = vmatprep.mubr.bf16.mxu1 %v6795_v21 }
 0x268   :  { %1648 = vmatpush1.bf16.msra.mxu0 %v5298_v61  ;;  %1689 = vmatpush1.bf16.msra.mxu1 %v5301_v31 }
 0x269   :  { %1649 = vmatprep.subr.bf16.mxu0 %v5304_v56  ;;  %1690 = vmatprep.subr.bf16.mxu1 %v5307_v8 }
 0x26c   :  { %1650 = vmatpush1.bf16.msra.mxu0 %v5310_v55  ;;  %1691 = vmatpush1.bf16.msra.mxu1 %v5313_v2 }
 0x26d   :  { %1651 = vmatprep.subr.bf16.mxu0 %v5316_v36  ;;  %1692 = vmatprep.subr.bf16.mxu1 %v5319_v16 }
 0x270   :  { %1652 = vmatpush1.bf16.msra.mxu0 %v5322_v11  ;;  %1693 = vmatpush1.bf16.msra.mxu1 %v5325_v15  ;;  %v5343_v15 = vld [vmem:[#allocation3 + $0x4c] ss:$16 sps:$4 sm:$0xff]  }
 0x271   :  { %1653 = vmatprep.subr.bf16.mxu0 %v5328_v57  ;;  %1694 = vmatprep.subr.bf16.mxu1 %v5331_v5  ;;  %6938 = vst [vmem:[#allocation29_spill] sm:$0xff] %v5343_v15  ;;  %v5346_v57 = vld [vmem:[#allocation3 + $0x40] ss:$16 sps:$4 sm:$0xff]   ;;  %v5349_v5 = vld [vmem:[#allocation3 + $0x48] ss:$16 sps:$4 sm:$0xff]  }
 0x272   :  { %6939 = vst [vmem:[#allocation32_spill] sm:$0xff] %v5346_v57  ;;  %6940 = vst [vmem:[#allocation31_spill] sm:$0xff] %v5349_v5 }
 0x274   :  { %1654 = vmatpush1.bf16.msra.mxu0 %v5334_v14  ;;  %1695 = vmatpush1.bf16.msra.mxu1 %v5337_v12  ;;  %v5352_v14 = vld [vmem:[#allocation3 + $0x24] ss:$16 sps:$4 sm:$0xff]   ;;  %v5355_v12 = vld [vmem:[#allocation3 + $0x2c] ss:$16 sps:$4 sm:$0xff]  }
 0x275   :  { %1655 = vmatprep.subr.bf16.mxu0 %v5340_v4  ;;  %1696 = vmatprep.subr.bf16.mxu1 %v5343_v15  ;;  %6941 = vst [vmem:[#allocation34_spill] sm:$0xff] %v5352_v14  ;;  %6942 = vst [vmem:[#allocation33_spill] sm:$0xff] %v5355_v12  ;;  %v5358_v4 = vld [vmem:[#allocation3 + $0x20] ss:$16 sps:$4 sm:$0xff]   ;;  %v5361_v15 = vld [vmem:[#allocation3 + $0x28] ss:$16 sps:$4 sm:$0xff]  }
 0x276   :  { %6943 = vst [vmem:[#allocation35_spill] sm:$0xff] %v5358_v4  ;;  %6944 = vst [vmem:[#allocation36_spill] sm:$0xff] %v5361_v15 }
 0x278   :  { %1656 = vmatpush1.bf16.msra.mxu0 %v5346_v57  ;;  %1697 = vmatpush1.bf16.msra.mxu1 %v5349_v5  ;;  %v5364_v57 = vld [vmem:[#allocation3 + $0x4] ss:$16 sps:$4 sm:$0xff]   ;;  %v5367_v5 = vld [vmem:[#allocation3 + $0xc] ss:$16 sps:$4 sm:$0xff]  }
 0x279   :  { %1657 = vmatprep.subr.bf16.mxu0 %v5352_v14  ;;  %1698 = vmatprep.subr.bf16.mxu1 %v5355_v12  ;;  %6945 = vst [vmem:[#allocation37_spill] sm:$0xff] %v5364_v57  ;;  %6946 = vst [vmem:[#allocation68_spill] sm:$0xff] %v5367_v5  ;;  %v5370_v14 = vld [vmem:[#allocation3] ss:$16 sps:$4 sm:$0xff]   ;;  %v5373_v12 = vld [vmem:[#allocation3 + $0x8] ss:$16 sps:$4 sm:$0xff]  }
 0x27a   :  { %6947 = vst [vmem:[#allocation69_spill] sm:$0xff] %v5370_v14  ;;  %6948 = vst [vmem:[#allocation71_spill] sm:$0xff] %v5373_v12 }
 0x27c   :  { %1658 = vmatpush1.bf16.msra.mxu0 %v5358_v4  ;;  %1699 = vmatpush1.bf16.msra.mxu1 %v5361_v15 }
 0x27d   :  { %1659 = vmatprep.subr.bf16.mxu0 %v5364_v57  ;;  %1700 = vmatprep.subr.bf16.mxu1 %v5367_v5 }
 0x280   :  { %1660 = vmatpush1.bf16.msra.mxu0 %v5370_v14  ;;  %1701 = vmatpush1.bf16.msra.mxu1 %v5373_v12 }
 0x281   :  { %1757 = vmatprep.subr.bf16.mxu0 %v4824_v46  ;;  %1798 = vmatprep.subr.bf16.mxu1 %v4830_v48 }
 0x283   :  { %1678 = vmatmul.mubr.bf16.vlgmr.msra.gmra.mxu0 %v5274_v13  ;;  %1719 = vmatmul.mubr.bf16.vlgmr.msra.gmra.mxu1 %v5274_v13  ;;  %v6949_v13 = vld [vmem:[#allocation73_spill] sm:$0xff] }
 0x284   :  { %1758 = vmatpush1.bf16.msra.mxu0 %v4826_v47  ;;  %1799 = vmatpush1.bf16.msra.mxu1 %v4834_v50 }
 0x285   :  { %1759 = vmatprep.subr.bf16.mxu0 %v4832_v49  ;;  %1800 = vmatprep.subr.bf16.mxu1 %v4842_v52 }
 0x286   :  { %1789 = vmatprep.mubr.bf16.mxu0 %v6795_v21  ;;  %1830 = vmatprep.mubr.bf16.mxu1 %v6795_v21 }
 0x288   :  { %1760 = vmatpush1.bf16.msra.mxu0 %v4836_v51  ;;  %1801 = vmatpush1.bf16.msra.mxu1 %v4846_v54  ;;  %v3800_v54 = vld [vmem:[%s6492_s1 + $0x10] sm:$0xff] }
 0x289   :  { %1761 = vmatprep.subr.bf16.mxu0 %v4844_v53  ;;  %1802 = vmatprep.subr.bf16.mxu1 %v6857_v17 }
 0x28a   :  { %1953 = vperm.xlu1 %3899, %v3800_v54  }
 0x28c   :  { %1762 = vmatpush1.bf16.msra.mxu0 %v6858_v20  ;;  %1803 = vmatpush1.bf16.msra.mxu1 %v6859_v22 }
 0x28d   :  { %1763 = vmatprep.subr.bf16.mxu0 %v6860_v23  ;;  %1804 = vmatprep.subr.bf16.mxu1 %v6861_v24 }
 0x290   :  { %1764 = vmatpush1.bf16.msra.mxu0 %v6862_v25  ;;  %1805 = vmatpush1.bf16.msra.mxu1 %v6863_v27 }
 0x291   :  { %1765 = vmatprep.subr.bf16.mxu0 %v6864_v28  ;;  %1806 = vmatprep.subr.bf16.mxu1 %v6865_v29 }
 0x294   :  { %1766 = vmatpush1.bf16.msra.mxu0 %v6866_v30  ;;  %1807 = vmatpush1.bf16.msra.mxu1 %v6867_v32 }
 0x295   :  { %1767 = vmatprep.subr.bf16.mxu0 %v6868_v33  ;;  %1808 = vmatprep.subr.bf16.mxu1 %v6869_v34 }
 0x298   :  { %1768 = vmatpush1.bf16.msra.mxu0 %v6870_v35  ;;  %1809 = vmatpush1.bf16.msra.mxu1 %v6871_v37 }
 0x299   :  { %1769 = vmatprep.subr.bf16.mxu0 %v6872_v38  ;;  %1810 = vmatprep.subr.bf16.mxu1 %v6873_v39 }
 0x29c   :  { %1770 = vmatpush1.bf16.msra.mxu0 %v6874_v40  ;;  %1811 = vmatpush1.bf16.msra.mxu1 %v6875_v42 }
 0x29d   :  { %1771 = vmatprep.subr.bf16.mxu0 %v6876_v43  ;;  %1812 = vmatprep.subr.bf16.mxu1 %v6877_v44 }
 0x2a0   :  { %1772 = vmatpush1.bf16.msra.mxu0 %v6878_v45  ;;  %1813 = vmatpush1.bf16.msra.mxu1 %v6879_v58 }
 0x2a1   :  { %1839 = vmatprep.subr.bf16.mxu0 %v6880_v0  ;;  %1880 = vmatprep.subr.bf16.mxu1 %v6881_v3 }
 0x303   :  { %v1473_v46 = vpop.f32.mrf.mxu0  ;;  %v1514_v47 = vpop.f32.mrf.mxu1 }
 0x305   :  { %v1475_v48 = vpop.f32.mrf.mxu0  ;;  %v1516_v49 = vpop.f32.mrf.mxu1 }
 0x307   :  { %v1477_v50 = vpop.f32.mrf.mxu0  ;;  %v1518_v51 = vpop.f32.mrf.mxu1 }
 0x309   :  { %v1478_v52 = vpop.f32.mrf.mxu0  ;;  %v1519_v53 = vpop.f32.mrf.mxu1 }
 0x323   :  { %v1555_v17 = vpop.f32.mrf.mxu0  ;;  %v1596_v20 = vpop.f32.mrf.mxu1 }
 0x324   :  { %v1556_v22 = vadd.f32 %v1555_v17, %v1473_v46  ;;  %v1597_v37 = vadd.f32 %v1596_v20, %v1514_v47 }
 0x325   :  { %v1557_v23 = vpop.f32.mrf.mxu0  ;;  %v1598_v24 = vpop.f32.mrf.mxu1 }
 0x326   :  { %v1603_v25 = vadd.f32 %v1556_v22, %v5209_v62  ;;  %v1558_v27 = vadd.f32 %v1557_v23, %v1475_v48  ;;  %v1605_v38 = vadd.f32 %v1597_v37, %v5219_v18  ;;  %v1599_v39 = vadd.f32 %v1598_v24, %v1516_v49  ;;  %v6950_v49 = vld [vmem:[#allocation75_spill] sm:$0xff] }
 0x327   :  { %v1559_v28 = vpop.f32.mrf.mxu0  ;;  %v1600_v29 = vpop.f32.mrf.mxu1 }
 0x328   :  { %v3790_v30 = vmul.f32 -1.442695, %v1603_v25  ;;  %v1604_v32 = vadd.f32 %v1558_v27, %v5213_v60  ;;  %v3792_v40 = vmul.f32 -1.442695, %v1605_v38  ;;  %v1606_v43 = vadd.f32 %v1599_v39, %v5224_v10 }
 0x329   :  { %v1560_v33 = vpop.f32.mrf.mxu0  ;;  %v1601_v34 = vpop.f32.mrf.mxu1 }
 0x32a   :  { %4094 = vpow2.f32 %v3790_v30  ;;  %v3791_v35 = vmul.f32 -1.442695, %v1604_v32  ;;  %v6951_v32 = vld [vmem:[#allocation74_spill] sm:$0xff] }
 0x32c   :  { %4096 = vpow2.f32 %v3791_v35  ;;  %v6952_v35 = vld [vmem:[#allocation76_spill] sm:$0xff] }
 0x32d   :  { %4098 = vpow2.f32 %v3792_v40 }
 0x337   :  { %v4095_v42 = vpop.eup %4094 }
 0x338   :  { %v1616_v44 = vadd.f32 1.0, %v4095_v42  ;;  %v1318_v42 = vpop.permute.xlu0 %1317 }
 0x339   :  { %v4097_v45 = vpop.eup %4096 }
 0x33a   :  { %4100 = vrcp.f32 %v1616_v44  ;;  %v1617_v58 = vadd.f32 1.0, %v4097_v45  ;;  %v4099_v50 = vpop.eup %4098 }
 0x33b   :  { %4102 = vtanh.f32 %v1606_v43  ;;  %v1618_v24 = vadd.f32 1.0, %v4099_v50  ;;  %v5438_v50 = vld [vmem:[#allocation6 + $0xc4] ss:$16 sps:$4 sm:$0xff]  }
 0x33c   :  { %4104 = vrcp.f32 %v1617_v58  ;;  %v1636_v45 = vpop.permute.xlu0 %1635 }
 0x343   :  { %v1679_v0 = vpop.f32.mrf.mxu0  ;;  %v1720_v3 = vpop.f32.mrf.mxu1 }
 0x344   :  { %v1727_v46 = vadd.f32 %v1679_v0, %v6949_v13  ;;  %v1729_v33 = vadd.f32 %v1720_v3, %v6951_v32  ;;  %v1320_v0 = vmul.f32 %v1318_v42, %v5234_v9  ;;  %v5467_v32 = vld [vmem:[#allocation6 + $0x84] ss:$16 sps:$4 sm:$0xff]   ;;  %v5495_v42 = vld [vmem:[#allocation6 + $0x4c] ss:$16 sps:$4 sm:$0xff]  }
 0x345   :  { %v1681_v48 = vpop.f32.mrf.mxu0  ;;  %v1722_v47 = vpop.f32.mrf.mxu1 }
 0x346   :  { %v3794_v51 = vmul.f32 -1.442695, %v1727_v46  ;;  %v1728_v52 = vadd.f32 %v1681_v48, %v6950_v49  ;;  %v3796_v34 = vmul.f32 -1.442695, %v1729_v33  ;;  %v1730_v37 = vadd.f32 %v1722_v47, %v6952_v35  ;;  %v5432_v48 = vld [vmem:[#allocation6 + $0xe0] ss:$16 sps:$4 sm:$0xff]  }
 0x347   :  { %v4101_v53 = vpop.eup %4100  ;;  %v1683_v54 = vpop.f32.mrf.mxu0  ;;  %v5435_v47 = vld [vmem:[#allocation6 + $0xe8] ss:$16 sps:$4 sm:$0xff]   ;;  %v5470_v33 = vld [vmem:[#allocation6 + $0x8c] ss:$16 sps:$4 sm:$0xff]   ;;  %v5480_v35 = vld [vmem:[#allocation6 + $0x64] ss:$16 sps:$4 sm:$0xff]  }
 0x348   :  { %v1724_v17 = vpop.f32.mrf.mxu1  ;;  %v4103_v20 = vpop.eup %4102  ;;  %4106 = vpow2.f32 %v3794_v51  ;;  %v3795_v22 = vmul.f32 -1.442695, %v1728_v52  ;;  %v5441_v51 = vld [vmem:[#allocation6 + $0xcc] ss:$16 sps:$4 sm:$0xff]   ;;  %v5449_v54 = vld [vmem:[#allocation6 + $0xc8] ss:$16 sps:$4 sm:$0xff]  }
 0x349   :  { %v4105_v23 = vpop.eup %4104  ;;  %v1684_v25 = vpop.f32.mrf.mxu0  ;;  %v1627_v28 = vmul.f32 %v4103_v20, %v4101_v53  ;;  %v5446_v53 = vld [vmem:[#allocation6 + $0xc0] ss:$16 sps:$4 sm:$0xff]   ;;  %v5452_v20 = vld [vmem:[#allocation6 + $0xa4] ss:$16 sps:$4 sm:$0xff]  }
 0x34a   :  { %v1725_v27 = vpop.f32.mrf.mxu1  ;;  %4108 = vpow2.f32 %v3795_v22  ;;  %v1626_v29 = vmul.f32 %v4105_v23, %v5229_v6  ;;  %v5455_v22 = vld [vmem:[#allocation6 + $0xac] ss:$16 sps:$4 sm:$0xff]  }
 0x34b   :  { %4110 = vrcp.f32 %v1618_v24  ;;  %v5459_v27 = vld [vmem:[#allocation6 + $0xa0] ss:$16 sps:$4 sm:$0xff]  }
 0x34c   :  { %v5424_v30 = vadd.f32 %v1627_v28, %v1626_v29  ;;  %v5462_v28 = vld [vmem:[#allocation6 + $0xa8] ss:$16 sps:$4 sm:$0xff]  }
 0x34e   :  { %4112 = vtanh.f32 %v5424_v30 }
 0x34f   :  { %4114 = vpow2.f32 %v3796_v34  ;;  %v5477_v34 = vld [vmem:[#allocation6 + $0x88] ss:$16 sps:$4 sm:$0xff]  }
 0x350   :  { %4116 = vtanh.f32 %v1730_v37  ;;  %v5483_v37 = vld [vmem:[#allocation6 + $0x6c] ss:$16 sps:$4 sm:$0xff]  }
 0x355   :  { %v4107_v38 = vpop.eup %4106 }
 0x356   :  { %v1740_v39 = vadd.f32 1.0, %v4107_v38  ;;  %v5486_v38 = vld [vmem:[#allocation6 + $0x60] ss:$16 sps:$4 sm:$0xff]  }
 0x357   :  { %v4109_v40 = vpop.eup %4108 }
 0x358   :  { %4118 = vrcp.f32 %v1740_v39  ;;  %v1741_v43 = vadd.f32 1.0, %v4109_v40  ;;  %v4111_v44 = vpop.eup %4110  ;;  %v5489_v39 = vld [vmem:[#allocation6 + $0x68] ss:$16 sps:$4 sm:$0xff]   ;;  %v5492_v40 = vld [vmem:[#allocation6 + $0x44] ss:$16 sps:$4 sm:$0xff]  }
 0x35a   :  { %4120 = vrcp.f32 %v1741_v43  ;;  %v5498_v43 = vld [vmem:[#allocation6 + $0x40] ss:$16 sps:$4 sm:$0xff]  }
 0x35b   :  { %v4113_v6 = vpop.eup %4112 }
 0x35c   :  { %v1630_v58 = vmul.f32 %v4113_v6, %v4111_v44  ;;  %v4115_v9 = vpop.eup %4114  ;;  %v5501_v44 = vld [vmem:[#allocation6 + $0x48] ss:$16 sps:$4 sm:$0xff]   ;;  %v5504_v6 = vld [vmem:[#allocation6 + $0x24] ss:$16 sps:$4 sm:$0xff]  }
 0x35d   :  { %v4117_v49 = vpop.eup %4116  ;;  %v1742_v24 = vadd.f32 1.0, %v4115_v9  ;;  %v5516_v9 = vld [vmem:[#allocation6 + $0x4] ss:$16 sps:$4 sm:$0xff]  }
 0x35e   :  { %v1638_v3 = vmul.f32 %v1636_v45, %v1630_v58  ;;  %v1756_v13 = vpack.c.bf16 %v1630_v58, %v1630_v58  ;;  %v5507_v45 = vld [vmem:[#allocation6 + $0x2c] ss:$16 sps:$4 sm:$0xff]  }
 0x35f   :  { %4122 = vrcp.f32 %v1742_v24  ;;  %v5525_v24 = vld [vmem:[#allocation6 + $0x8] ss:$16 sps:$4 sm:$0xff]  }
 0x360   :  { %v5430_v46 = vadd.f32 %v1638_v3, %v1320_v0  ;;  %1790 = vmatmul.mubr.bf16.vlgmr.msra.gmra.mxu0 %v1756_v13  ;;  %1831 = vmatmul.mubr.bf16.vlgmr.msra.gmra.mxu1 %v1756_v13  ;;  %v5510_v3 = vld [vmem:[#allocation6 + $0x20] ss:$16 sps:$4 sm:$0xff]   ;;  %v5513_v13 = vld [vmem:[#allocation6 + $0x28] ss:$16 sps:$4 sm:$0xff]  }
 0x361   :  { %1840 = vmatpush1.bf16.msra.mxu0 %v5432_v48  ;;  %1881 = vmatpush1.bf16.msra.mxu1 %v5435_v47 }
 0x362   :  { %1841 = vmatprep.subr.bf16.mxu0 %v5438_v50  ;;  %1882 = vmatprep.subr.bf16.mxu1 %v5441_v51 }
 0x363   :  { %1871 = vmatprep.mubr.bf16.mxu0 %v6795_v21  ;;  %1912 = vmatprep.mubr.bf16.mxu1 %v6795_v21 }
 0x365   :  { %v4119_v52 = vpop.eup %4118  ;;  %1842 = vmatpush1.bf16.msra.mxu0 %v5446_v53  ;;  %1883 = vmatpush1.bf16.msra.mxu1 %v5449_v54 }
 0x366   :  { %v1751_v17 = vmul.f32 %v4119_v52, %v4117_v49  ;;  %1843 = vmatprep.subr.bf16.mxu0 %v5452_v20  ;;  %1884 = vmatprep.subr.bf16.mxu1 %v5455_v22  ;;  %v5519_v49 = vld [vmem:[#allocation6 + $0xc] ss:$16 sps:$4 sm:$0xff]  }
 0x367   :  { %v4121_v23 = vpop.eup %4120 }
 0x368   :  { %v1750_v25 = vmul.f32 %v4121_v23, %v5251_v41  ;;  %v5474_v41 = vld [vmem:[#allocation6 + $0x80] ss:$16 sps:$4 sm:$0xff]  }
 0x369   :  { %1844 = vmatpush1.bf16.msra.mxu0 %v5459_v27  ;;  %1885 = vmatpush1.bf16.msra.mxu1 %v5462_v28  ;;  %v5522_v23 = vld [vmem:[#allocation6] ss:$16 sps:$4 sm:$0xff]  }
 0x36a   :  { %v5465_v29 = vadd.f32 %v1751_v17, %v1750_v25  ;;  %1845 = vmatprep.subr.bf16.mxu0 %v5467_v32  ;;  %1886 = vmatprep.subr.bf16.mxu1 %v5470_v33  ;;  %v6953_v25 = vld [vmem:[#allocation23_spill] sm:$0xff] }
 0x36c   :  { %4124 = vtanh.f32 %v5465_v29  ;;  %v4123_v58 = vpop.eup %4122 }
 0x36d   :  { %1846 = vmatpush1.bf16.msra.mxu0 %v5474_v41  ;;  %1887 = vmatpush1.bf16.msra.mxu1 %v5477_v34 }
 0x36e   :  { %1847 = vmatprep.subr.bf16.mxu0 %v5480_v35  ;;  %1888 = vmatprep.subr.bf16.mxu1 %v5483_v37 }
 0x371   :  { %1848 = vmatpush1.bf16.msra.mxu0 %v5486_v38  ;;  %1889 = vmatpush1.bf16.msra.mxu1 %v5489_v39 }
 0x372   :  { %1849 = vmatprep.subr.bf16.mxu0 %v5492_v40  ;;  %1890 = vmatprep.subr.bf16.mxu1 %v5495_v42 }
 0x375   :  { %1850 = vmatpush1.bf16.msra.mxu0 %v5498_v43  ;;  %1891 = vmatpush1.bf16.msra.mxu1 %v5501_v44 }
 0x376   :  { %1851 = vmatprep.subr.bf16.mxu0 %v5504_v6  ;;  %1892 = vmatprep.subr.bf16.mxu1 %v5507_v45 }
 0x379   :  { %v4125_v0 = vpop.eup %4124  ;;  %1852 = vmatpush1.bf16.msra.mxu0 %v5510_v3  ;;  %1893 = vmatpush1.bf16.msra.mxu1 %v5513_v13 }
 0x37a   :  { %1853 = vmatprep.subr.bf16.mxu0 %v5516_v9  ;;  %1894 = vmatprep.subr.bf16.mxu1 %v5519_v49  ;;  %v1754_v52 = vmul.f32 %v4125_v0, %v4123_v58  ;;  %v6954_v58 = vld [vmem:[#allocation26_spill] sm:$0xff]  ;;  %v6955_v0 = vld [vmem:[#allocation25_spill] sm:$0xff] }
 0x37c   :  { %v1755_v17 = vpack.c.bf16 %v1754_v52, %v1754_v52  ;;  %v6956_v52 = vld [vmem:[#allocation28_spill] sm:$0xff] }
 0x37d   :  { %1854 = vmatpush1.bf16.msra.mxu0 %v5522_v23  ;;  %1895 = vmatpush1.bf16.msra.mxu1 %v5525_v24 }
 0x37e   :  { %1963 = vmatprep.subr.bf16.mxu0 %v5276_v19  ;;  %2004 = vmatprep.subr.bf16.mxu1 %v5279_v1 }
 0x380   :  { %1872 = vmatmul.mubr.bf16.vlgmr.msra.gmra.mxu0 %v1755_v17  ;;  %1913 = vmatmul.mubr.bf16.vlgmr.msra.gmra.mxu1 %v1755_v17 }
 0x381   :  { %1964 = vmatpush1.bf16.msra.mxu0 %v5284_v7  ;;  %2005 = vmatpush1.bf16.msra.mxu1 %v5287_v26 }
 0x382   :  { %1965 = vmatprep.subr.bf16.mxu0 %v5290_v63  ;;  %2006 = vmatprep.subr.bf16.mxu1 %v5293_v59 }
 0x383   :  { %1995 = vmatprep.mubr.bf16.mxu0 %v6795_v21  ;;  %2036 = vmatprep.mubr.bf16.mxu1 %v6795_v21 }
 0x385   :  { %1966 = vmatpush1.bf16.msra.mxu0 %v5298_v61  ;;  %2007 = vmatpush1.bf16.msra.mxu1 %v5301_v31 }
 0x386   :  { %1967 = vmatprep.subr.bf16.mxu0 %v5304_v56  ;;  %2008 = vmatprep.subr.bf16.mxu1 %v5307_v8  ;;  %v6957_v56 = vld [vmem:[#allocation27_spill] sm:$0xff]  ;;  %v6958_v8 = vld [vmem:[#allocation30_spill] sm:$0xff] }
 0x389   :  { %1968 = vmatpush1.bf16.msra.mxu0 %v5310_v55  ;;  %2009 = vmatpush1.bf16.msra.mxu1 %v5313_v2  ;;  %v6959_v55 = vld [vmem:[#allocation29_spill] sm:$0xff]  ;;  %v6960_v2 = vld [vmem:[#allocation32_spill] sm:$0xff] }
 0x38a   :  { %1969 = vmatprep.subr.bf16.mxu0 %v5316_v36  ;;  %2010 = vmatprep.subr.bf16.mxu1 %v5319_v16  ;;  %v6961_v36 = vld [vmem:[#allocation31_spill] sm:$0xff]  ;;  %v6962_v16 = vld [vmem:[#allocation34_spill] sm:$0xff] }
 0x38d   :  { %1970 = vmatpush1.bf16.msra.mxu0 %v5322_v11  ;;  %2011 = vmatpush1.bf16.msra.mxu1 %v6953_v25  ;;  %v6963_v11 = vld [vmem:[#allocation33_spill] sm:$0xff] }
 0x38e   :  { %1971 = vmatprep.subr.bf16.mxu0 %v6954_v58  ;;  %2012 = vmatprep.subr.bf16.mxu1 %v6955_v0 }
 0x391   :  { %1972 = vmatpush1.bf16.msra.mxu0 %v6956_v52  ;;  %2013 = vmatpush1.bf16.msra.mxu1 %v6957_v56 }
 0x392   :  { %1973 = vmatprep.subr.bf16.mxu0 %v6958_v8  ;;  %2014 = vmatprep.subr.bf16.mxu1 %v6959_v55  ;;  %v5562_v55 = vld [vmem:[#allocation8 + $0xe4] ss:$16 sps:$4 sm:$0xff]  }
 0x393   :  { %6964 = vst [vmem:[#allocation70_spill] sm:$0xff] %v5562_v55 }
 0x395   :  { %1974 = vmatpush1.bf16.msra.mxu0 %v6960_v2  ;;  %2015 = vmatpush1.bf16.msra.mxu1 %v6961_v36  ;;  %v5565_v36 = vld [vmem:[#allocation8 + $0xec] ss:$16 sps:$4 sm:$0xff]  }
 0x396   :  { %1975 = vmatprep.subr.bf16.mxu0 %v6962_v16  ;;  %2016 = vmatprep.subr.bf16.mxu1 %v6963_v11  ;;  %6965 = vst [vmem:[#allocation72_spill] sm:$0xff] %v5565_v36 }
 0x399   :  { %1976 = vmatpush1.bf16.msra.mxu0 %v5358_v4  ;;  %2017 = vmatpush1.bf16.msra.mxu1 %v5361_v15  ;;  %v5568_v4 = vld [vmem:[#allocation8 + $0xe0] ss:$16 sps:$4 sm:$0xff]  }
 0x39a   :  { %1977 = vmatprep.subr.bf16.mxu0 %v5364_v57  ;;  %2018 = vmatprep.subr.bf16.mxu1 %v5367_v5  ;;  %6966 = vst [vmem:[#allocation38_spill] sm:$0xff] %v5568_v4  ;;  %v5571_v57 = vld [vmem:[#allocation8 + $0xe8] ss:$16 sps:$4 sm:$0xff]  }
 0x39b   :  { %6967 = vst [vmem:[#allocation39_spill] sm:$0xff] %v5571_v57 }
 0x39d   :  { %1978 = vmatpush1.bf16.msra.mxu0 %v5370_v14  ;;  %2019 = vmatpush1.bf16.msra.mxu1 %v5373_v12  ;;  %v5574_v14 = vld [vmem:[#allocation8 + $0xc4] ss:$16 sps:$4 sm:$0xff]   ;;  %v5577_v12 = vld [vmem:[#allocation8 + $0xcc] ss:$16 sps:$4 sm:$0xff]  }
 0x39e   :  { %2075 = vmatprep.subr.bf16.mxu0 %v5562_v55  ;;  %2116 = vmatprep.subr.bf16.mxu1 %v5565_v36  ;;  %6968 = vst [vmem:[#allocation40_spill] sm:$0xff] %v5574_v14  ;;  %6969 = vst [vmem:[#allocation41_spill] sm:$0xff] %v5577_v12  ;;  %v5597_v36 = vld [vmem:[#allocation8 + $0xa8] ss:$16 sps:$4 sm:$0xff]  }
 0x39f   :  { %6975 = vst [vmem:[#allocation47_spill] sm:$0xff] %v5597_v36 }
 0x3a0   :  { %1996 = vmatmul.mubr.bf16.vlgmr.msra.gmra.mxu0 %v1755_v17  ;;  %2037 = vmatmul.mubr.bf16.vlgmr.msra.gmra.mxu1 %v1755_v17  ;;  %v5582_v17 = vld [vmem:[#allocation8 + $0xc0] ss:$16 sps:$4 sm:$0xff]  }
 0x3a1   :  { %2076 = vmatpush1.bf16.msra.mxu0 %v5568_v4  ;;  %2117 = vmatpush1.bf16.msra.mxu1 %v5571_v57  ;;  %6970 = vst [vmem:[#allocation42_spill] sm:$0xff] %v5582_v17  ;;  %v5585_v4 = vld [vmem:[#allocation8 + $0xc8] ss:$16 sps:$4 sm:$0xff]   ;;  %v5588_v57 = vld [vmem:[#allocation8 + $0xa4] ss:$16 sps:$4 sm:$0xff]  }
 0x3a2   :  { %2077 = vmatprep.subr.bf16.mxu0 %v5574_v14  ;;  %2118 = vmatprep.subr.bf16.mxu1 %v5577_v12  ;;  %6971 = vst [vmem:[#allocation43_spill] sm:$0xff] %v5585_v4  ;;  %6972 = vst [vmem:[#allocation44_spill] sm:$0xff] %v5588_v57  ;;  %v5591_v14 = vld [vmem:[#allocation8 + $0xac] ss:$16 sps:$4 sm:$0xff]   ;;  %v5594_v12 = vld [vmem:[#allocation8 + $0xa0] ss:$16 sps:$4 sm:$0xff]  }
 0x3a3   :  { %2107 = vmatprep.mubr.bf16.mxu0 %v6795_v21  ;;  %2148 = vmatprep.mubr.bf16.mxu1 %v6795_v21  ;;  %6973 = vst [vmem:[#allocation45_spill] sm:$0xff] %v5591_v14  ;;  %6974 = vst [vmem:[#allocation46_spill] sm:$0xff] %v5594_v12 }
 0x3a5   :  { %2078 = vmatpush1.bf16.msra.mxu0 %v5582_v17  ;;  %2119 = vmatpush1.bf16.msra.mxu1 %v5585_v4  ;;  %v5600_v17 = vld [vmem:[#allocation8 + $0x84] ss:$16 sps:$4 sm:$0xff]   ;;  %v5603_v4 = vld [vmem:[#allocation8 + $0x8c] ss:$16 sps:$4 sm:$0xff]  }
 0x3a6   :  { %2079 = vmatprep.subr.bf16.mxu0 %v5588_v57  ;;  %2120 = vmatprep.subr.bf16.mxu1 %v5591_v14  ;;  %6976 = vst [vmem:[#allocation48_spill] sm:$0xff] %v5600_v17  ;;  %6977 = vst [vmem:[#allocation49_spill] sm:$0xff] %v5603_v4  ;;  %v5606_v57 = vld [vmem:[#allocation8 + $0x80] ss:$16 sps:$4 sm:$0xff]   ;;  %v5609_v14 = vld [vmem:[#allocation8 + $0x88] ss:$16 sps:$4 sm:$0xff]  }
 0x3a7   :  { %6978 = vst [vmem:[#allocation50_spill] sm:$0xff] %v5606_v57  ;;  %6979 = vst [vmem:[#allocation51_spill] sm:$0xff] %v5609_v14 }
 0x3a9   :  { %2080 = vmatpush1.bf16.msra.mxu0 %v5594_v12  ;;  %2121 = vmatpush1.bf16.msra.mxu1 %v5597_v36  ;;  %v5612_v12 = vld [vmem:[#allocation8 + $0x64] ss:$16 sps:$4 sm:$0xff]   ;;  %v5615_v36 = vld [vmem:[#allocation8 + $0x6c] ss:$16 sps:$4 sm:$0xff]  }
 0x3aa   :  { %2081 = vmatprep.subr.bf16.mxu0 %v5600_v17  ;;  %2122 = vmatprep.subr.bf16.mxu1 %v5603_v4  ;;  %6980 = vst [vmem:[#allocation52_spill] sm:$0xff] %v5612_v12  ;;  %6981 = vst [vmem:[#allocation53_spill] sm:$0xff] %v5615_v36  ;;  %v5618_v17 = vld [vmem:[#allocation8 + $0x60] ss:$16 sps:$4 sm:$0xff]   ;;  %v5621_v4 = vld [vmem:[#allocation8 + $0x68] ss:$16 sps:$4 sm:$0xff]  }
 0x3ab   :  { %6982 = vst [vmem:[#allocation54_spill] sm:$0xff] %v5618_v17  ;;  %6983 = vst [vmem:[#allocation55_spill] sm:$0xff] %v5621_v4 }
 0x3ad   :  { %2082 = vmatpush1.bf16.msra.mxu0 %v5606_v57  ;;  %2123 = vmatpush1.bf16.msra.mxu1 %v5609_v14  ;;  %v5624_v57 = vld [vmem:[#allocation8 + $0x44] ss:$16 sps:$4 sm:$0xff]   ;;  %v5627_v14 = vld [vmem:[#allocation8 + $0x4c] ss:$16 sps:$4 sm:$0xff]  }
 0x3ae   :  { %2083 = vmatprep.subr.bf16.mxu0 %v5612_v12  ;;  %2124 = vmatprep.subr.bf16.mxu1 %v5615_v36  ;;  %6984 = vst [vmem:[#allocation56_spill] sm:$0xff] %v5624_v57  ;;  %6985 = vst [vmem:[#allocation57_spill] sm:$0xff] %v5627_v14  ;;  %v5630_v12 = vld [vmem:[#allocation8 + $0x40] ss:$16 sps:$4 sm:$0xff]   ;;  %v5633_v36 = vld [vmem:[#allocation8 + $0x48] ss:$16 sps:$4 sm:$0xff]  }
 0x3af   :  { %6986 = vst [vmem:[#allocation58_spill] sm:$0xff] %v5630_v12  ;;  %6987 = vst [vmem:[#allocation59_spill] sm:$0xff] %v5633_v36 }
 0x3b1   :  { %2084 = vmatpush1.bf16.msra.mxu0 %v5618_v17  ;;  %2125 = vmatpush1.bf16.msra.mxu1 %v5621_v4  ;;  %v5636_v17 = vld [vmem:[#allocation8 + $0x24] ss:$16 sps:$4 sm:$0xff]   ;;  %v5639_v4 = vld [vmem:[#allocation8 + $0x2c] ss:$16 sps:$4 sm:$0xff]  }
 0x3b2   :  { %2085 = vmatprep.subr.bf16.mxu0 %v5624_v57  ;;  %2126 = vmatprep.subr.bf16.mxu1 %v5627_v14  ;;  %6988 = vst [vmem:[#allocation60_spill] sm:$0xff] %v5636_v17  ;;  %6989 = vst [vmem:[#allocation61_spill] sm:$0xff] %v5639_v4  ;;  %v5642_v57 = vld [vmem:[#allocation8 + $0x20] ss:$16 sps:$4 sm:$0xff]   ;;  %v5645_v14 = vld [vmem:[#allocation8 + $0x28] ss:$16 sps:$4 sm:$0xff]  }
 0x3b3   :  { %6990 = vst [vmem:[#allocation62_spill] sm:$0xff] %v5642_v57  ;;  %6991 = vst [vmem:[#allocation63_spill] sm:$0xff] %v5645_v14 }
 0x3b5   :  { %2086 = vmatpush1.bf16.msra.mxu0 %v5630_v12  ;;  %2127 = vmatpush1.bf16.msra.mxu1 %v5633_v36  ;;  %v5648_v12 = vld [vmem:[#allocation8 + $0x4] ss:$16 sps:$4 sm:$0xff]   ;;  %v5651_v36 = vld [vmem:[#allocation8 + $0xc] ss:$16 sps:$4 sm:$0xff]  }
 0x3b6   :  { %2087 = vmatprep.subr.bf16.mxu0 %v5636_v17  ;;  %2128 = vmatprep.subr.bf16.mxu1 %v5639_v4  ;;  %6992 = vst [vmem:[#allocation64_spill] sm:$0xff] %v5648_v12  ;;  %6993 = vst [vmem:[#allocation65_spill] sm:$0xff] %v5651_v36  ;;  %v5654_v17 = vld [vmem:[#allocation8] ss:$16 sps:$4 sm:$0xff]   ;;  %v5657_v4 = vld [vmem:[#allocation8 + $0x8] ss:$16 sps:$4 sm:$0xff]  }
 0x3b7   :  { %6994 = vst [vmem:[#allocation66_spill] sm:$0xff] %v5654_v17  ;;  %6995 = vst [vmem:[#allocation67_spill] sm:$0xff] %v5657_v4 }
 0x3b9   :  { %2088 = vmatpush1.bf16.msra.mxu0 %v5642_v57  ;;  %2129 = vmatpush1.bf16.msra.mxu1 %v5645_v14  ;;  %v5660_v57 = vld [vmem:[#allocation6 + $0xe4] ss:$16 sps:$4 sm:$0xff]   ;;  %v5663_v14 = vld [vmem:[#allocation6 + $0xec] ss:$16 sps:$4 sm:$0xff]  }
 0x3ba   :  { %2089 = vmatprep.subr.bf16.mxu0 %v5648_v12  ;;  %2130 = vmatprep.subr.bf16.mxu1 %v5651_v36  ;;  %6996 = vst [vmem:[#allocation73_spill] sm:$0xff] %v5660_v57  ;;  %6997 = vst [vmem:[#allocation75_spill] sm:$0xff] %v5663_v14 }
 0x3bd   :  { %2090 = vmatpush1.bf16.msra.mxu0 %v5654_v17  ;;  %2131 = vmatpush1.bf16.msra.mxu1 %v5657_v4  ;;  %v3807_v4 = vld [vmem:[%s6492_s1 + $0x18] sm:$0xff] }
 0x3be   :  { %2157 = vmatprep.subr.bf16.mxu0 %v5660_v57  ;;  %2198 = vmatprep.subr.bf16.mxu1 %v5663_v14 }
 0x3bf   :  { %2271 = vperm.xlu1 %3899, %v3807_v4  }
 0x420   :  { %v1791_v12 = vpop.f32.mrf.mxu0  ;;  %v1832_v55 = vpop.f32.mrf.mxu1 }
 0x422   :  { %v1793_v5 = vpop.f32.mrf.mxu0  ;;  %v1834_v36 = vpop.f32.mrf.mxu1 }
 0x424   :  { %v1795_v15 = vpop.f32.mrf.mxu0  ;;  %v1836_v11 = vpop.f32.mrf.mxu1 }
 0x426   :  { %v1796_v16 = vpop.f32.mrf.mxu0  ;;  %v1837_v17 = vpop.f32.mrf.mxu1 }
 0x440   :  { %v1873_v2 = vpop.f32.mrf.mxu0  ;;  %v1914_v8 = vpop.f32.mrf.mxu1 }
 0x441   :  { %v1874_v57 = vadd.f32 %v1873_v2, %v1791_v12  ;;  %v1915_v61 = vadd.f32 %v1914_v8, %v1832_v55 }
 0x442   :  { %v1875_v56 = vpop.f32.mrf.mxu0  ;;  %v1916_v52 = vpop.f32.mrf.mxu1 }
 0x443   :  { %v1921_v14 = vadd.f32 %v1874_v57, %v5209_v62  ;;  %v1876_v0 = vadd.f32 %v1875_v56, %v1793_v5  ;;  %v1923_v4 = vadd.f32 %v1915_v61, %v5219_v18  ;;  %v1917_v59 = vadd.f32 %v1916_v52, %v1834_v36  ;;  %v6999_v36 = vld [vmem:[#allocation79_spill] sm:$0xff] }
 0x444   :  { %v1877_v58 = vpop.f32.mrf.mxu0  ;;  %v1918_v25 = vpop.f32.mrf.mxu1 }
 0x445   :  { %v3797_v31 = vmul.f32 -1.442695, %v1921_v14  ;;  %v1922_v11 = vadd.f32 %v1876_v0, %v5213_v60  ;;  %v3799_v2 = vmul.f32 -1.442695, %v1923_v4  ;;  %v1924_v63 = vadd.f32 %v1917_v59, %v5224_v10 }
 0x446   :  { %v1878_v16 = vpop.f32.mrf.mxu0  ;;  %v1919_v15 = vpop.f32.mrf.mxu1 }
 0x447   :  { %4126 = vpow2.f32 %v3797_v31  ;;  %v3798_v17 = vmul.f32 -1.442695, %v1922_v11  ;;  %v6998_v31 = vld [vmem:[#allocation77_spill] sm:$0xff] }
 0x449   :  { %4128 = vpow2.f32 %v3798_v17 }
 0x44a   :  { %4130 = vpow2.f32 %v3799_v2 }
 0x454   :  { %v4127_v12 = vpop.eup %4126 }
 0x455   :  { %v1934_v57 = vadd.f32 1.0, %v4127_v12 }
 0x456   :  { %v4129_v56 = vpop.eup %4128 }
 0x457   :  { %4132 = vrcp.f32 %v1934_v57  ;;  %v1935_v5 = vadd.f32 1.0, %v4129_v56  ;;  %v4131_v55 = vpop.eup %4130 }
 0x458   :  { %4134 = vtanh.f32 %v1924_v63  ;;  %v1936_v2 = vadd.f32 1.0, %v4131_v55 }
 0x459   :  { %4136 = vrcp.f32 %v1935_v5 }
 0x460   :  { %v1997_v14 = vpop.f32.mrf.mxu0  ;;  %v2038_v25 = vpop.f32.mrf.mxu1 }
 0x461   :  { %v2045_v58 = vadd.f32 %v1997_v14, %v6998_v31  ;;  %v7000_v14 = vld [vmem:[#allocation78_spill] sm:$0xff] }
 0x462   :  { %v1999_v0 = vpop.f32.mrf.mxu0  ;;  %v2040_v8 = vpop.f32.mrf.mxu1  ;;  %v2047_v31 = vadd.f32 %v2038_v25, %v7000_v14 }
 0x463   :  { %v3801_v61 = vmul.f32 -1.442695, %v2045_v58  ;;  %v2046_v52 = vadd.f32 %v1999_v0, %v6999_v36  ;;  %v7001_v0 = vld [vmem:[#allocation80_spill] sm:$0xff] }
 0x464   :  { %v4133_v11 = vpop.eup %4132  ;;  %v2001_v16 = vpop.f32.mrf.mxu0  ;;  %v3803_v58 = vmul.f32 -1.442695, %v2047_v31  ;;  %v2048_v36 = vadd.f32 %v2040_v8, %v7001_v0 }
 0x465   :  { %v2042_v59 = vpop.f32.mrf.mxu1  ;;  %v4135_v15 = vpop.eup %4134  ;;  %4138 = vpow2.f32 %v3801_v61  ;;  %v3802_v17 = vmul.f32 -1.442695, %v2046_v52 }
 0x466   :  { %v4137_v4 = vpop.eup %4136  ;;  %v2002_v63 = vpop.f32.mrf.mxu0  ;;  %v1945_v57 = vmul.f32 %v4135_v15, %v4133_v11 }
 0x467   :  { %v2043_v12 = vpop.f32.mrf.mxu1  ;;  %4140 = vpow2.f32 %v3802_v17  ;;  %v1944_v56 = vmul.f32 %v4137_v4, %v5424_v30  ;;  %v1954_v59 = vpop.permute.xlu1 %1953 }
 0x468   :  { %4142 = vrcp.f32 %v1936_v2 }
 0x469   :  { %v5676_v5 = vadd.f32 %v1945_v57, %v1944_v56 }
 0x46b   :  { %4144 = vtanh.f32 %v5676_v5 }
 0x46c   :  { %4146 = vpow2.f32 %v3803_v58 }
 0x46d   :  { %4148 = vtanh.f32 %v2048_v36  ;;  %v7002_v36 = vld [vmem:[#allocation14_spill] sm:$0xff] }
 0x472   :  { %v4139_v61 = vpop.eup %4138 }
 0x473   :  { %v2058_v52 = vadd.f32 1.0, %v4139_v61  ;;  %v7003_v61 = vld [vmem:[#allocation13_spill] sm:$0xff] }
 0x474   :  { %v4141_v55 = vpop.eup %4140 }
 0x475   :  { %4150 = vrcp.f32 %v2058_v52  ;;  %v2059_v11 = vadd.f32 1.0, %v4141_v55  ;;  %v4143_v16 = vpop.eup %4142  ;;  %v7004_v52 = vld [vmem:[#allocation16_spill] sm:$0xff]  ;;  %v7005_v55 = vld [vmem:[#allocation15_spill] sm:$0xff] }
 0x477   :  { %4152 = vrcp.f32 %v2059_v11  ;;  %v7008_v11 = vld [vmem:[#allocation20_spill] sm:$0xff] }
 0x478   :  { %v4145_v30 = vpop.eup %4144 }
 0x479   :  { %v1948_v15 = vmul.f32 %v4145_v30, %v4143_v16  ;;  %v4147_v8 = vpop.eup %4146  ;;  %v7011_v16 = vld [vmem:[#allocation21_spill] sm:$0xff]  ;;  %v7012_v30 = vld [vmem:[#allocation24_spill] sm:$0xff] }
 0x47a   :  { %v4149_v2 = vpop.eup %4148  ;;  %v2060_v57 = vadd.f32 1.0, %v4147_v8  ;;  %v7017_v8 = vld [vmem:[#allocation27_spill] sm:$0xff] }
 0x47b   :  { %v1956_v17 = vmul.f32 %v1954_v59, %v1948_v15  ;;  %v2074_v4 = vpack.c.bf16 %v1948_v15, %v1948_v15  ;;  %v7013_v59 = vld [vmem:[#allocation23_spill] sm:$0xff]  ;;  %v7014_v15 = vld [vmem:[#allocation26_spill] sm:$0xff] }
 0x47c   :  { %4154 = vrcp.f32 %v2060_v57  ;;  %v7022_v57 = vld [vmem:[#allocation34_spill] sm:$0xff] }
 0x47d   :  { %v5682_v25 = vadd.f32 %v1956_v17, %v5430_v46  ;;  %2108 = vmatmul.mubr.bf16.vlgmr.msra.gmra.mxu0 %v2074_v4  ;;  %2149 = vmatmul.mubr.bf16.vlgmr.msra.gmra.mxu1 %v2074_v4  ;;  %v7015_v17 = vld [vmem:[#allocation25_spill] sm:$0xff]  ;;  %v7016_v4 = vld [vmem:[#allocation28_spill] sm:$0xff] }
 0x47e   :  { %2158 = vmatpush1.bf16.msra.mxu0 %v5432_v48  ;;  %2199 = vmatpush1.bf16.msra.mxu1 %v5435_v47 }
 0x47f   :  { %2159 = vmatprep.subr.bf16.mxu0 %v5438_v50  ;;  %2200 = vmatprep.subr.bf16.mxu1 %v5441_v51 }
 0x480   :  { %2189 = vmatprep.mubr.bf16.mxu0 %v6795_v21  ;;  %2230 = vmatprep.mubr.bf16.mxu1 %v6795_v21 }
 0x482   :  { %v4151_v63 = vpop.eup %4150  ;;  %2160 = vmatpush1.bf16.msra.mxu0 %v5446_v53  ;;  %2201 = vmatpush1.bf16.msra.mxu1 %v5449_v54 }
 0x483   :  { %v2069_v46 = vmul.f32 %v4151_v63, %v4149_v2  ;;  %2161 = vmatprep.subr.bf16.mxu0 %v5452_v20  ;;  %2202 = vmatprep.subr.bf16.mxu1 %v5455_v22  ;;  %v7018_v2 = vld [vmem:[#allocation30_spill] sm:$0xff]  ;;  %v7019_v63 = vld [vmem:[#allocation29_spill] sm:$0xff] }
 0x484   :  { %v4153_v12 = vpop.eup %4152 }
 0x485   :  { %v2068_v56 = vmul.f32 %v4153_v12, %v5465_v29  ;;  %v7021_v12 = vld [vmem:[#allocation31_spill] sm:$0xff] }
 0x486   :  { %2162 = vmatpush1.bf16.msra.mxu0 %v5459_v27  ;;  %2203 = vmatpush1.bf16.msra.mxu1 %v5462_v28 }
 0x487   :  { %v5697_v14 = vadd.f32 %v2069_v46, %v2068_v56  ;;  %2163 = vmatprep.subr.bf16.mxu0 %v5467_v32  ;;  %2204 = vmatprep.subr.bf16.mxu1 %v5470_v33  ;;  %v7020_v46 = vld [vmem:[#allocation32_spill] sm:$0xff]  ;;  %v7023_v56 = vld [vmem:[#allocation33_spill] sm:$0xff] }
 0x489   :  { %4156 = vtanh.f32 %v5697_v14  ;;  %v4155_v29 = vpop.eup %4154 }
 0x48a   :  { %2164 = vmatpush1.bf16.msra.mxu0 %v5474_v41  ;;  %2205 = vmatpush1.bf16.msra.mxu1 %v5477_v34 }
 0x48b   :  { %2165 = vmatprep.subr.bf16.mxu0 %v5480_v35  ;;  %2206 = vmatprep.subr.bf16.mxu1 %v5483_v37 }
 0x48e   :  { %2166 = vmatpush1.bf16.msra.mxu0 %v5486_v38  ;;  %2207 = vmatpush1.bf16.msra.mxu1 %v5489_v39 }
 0x48f   :  { %2167 = vmatprep.subr.bf16.mxu0 %v5492_v40  ;;  %2208 = vmatprep.subr.bf16.mxu1 %v5495_v42 }
 0x492   :  { %2168 = vmatpush1.bf16.msra.mxu0 %v5498_v43  ;;  %2209 = vmatpush1.bf16.msra.mxu1 %v5501_v44 }
 0x493   :  { %2169 = vmatprep.subr.bf16.mxu0 %v5504_v6  ;;  %2210 = vmatprep.subr.bf16.mxu1 %v5507_v45 }
 0x496   :  { %v4157_v31 = vpop.eup %4156  ;;  %2170 = vmatpush1.bf16.msra.mxu0 %v5510_v3  ;;  %2211 = vmatpush1.bf16.msra.mxu1 %v5513_v13 }
 0x497   :  { %2171 = vmatprep.subr.bf16.mxu0 %v5516_v9  ;;  %2212 = vmatprep.subr.bf16.mxu1 %v5519_v49  ;;  %v2072_v58 = vmul.f32 %v4157_v31, %v4155_v29  ;;  %v7024_v29 = vld [vmem:[#allocation35_spill] sm:$0xff]  ;;  %v7025_v31 = vld [vmem:[#allocation36_spill] sm:$0xff] }
 0x499   :  { %v2073_v0 = vpack.c.bf16 %v2072_v58, %v2072_v58  ;;  %v7026_v58 = vld [vmem:[#allocation37_spill] sm:$0xff] }
 0x49a   :  { %2172 = vmatpush1.bf16.msra.mxu0 %v5522_v23  ;;  %2213 = vmatpush1.bf16.msra.mxu1 %v5525_v24 }
 0x49b   :  { %2281 = vmatprep.subr.bf16.mxu0 %v5276_v19  ;;  %2322 = vmatprep.subr.bf16.mxu1 %v5279_v1  ;;  %v7006_v19 = vld [vmem:[#allocation18_spill] sm:$0xff]  ;;  %v7007_v1 = vld [vmem:[#allocation17_spill] sm:$0xff] }
 0x49d   :  { %2190 = vmatmul.mubr.bf16.vlgmr.msra.gmra.mxu0 %v2073_v0  ;;  %2231 = vmatmul.mubr.bf16.vlgmr.msra.gmra.mxu1 %v2073_v0 }
 0x49e   :  { %2282 = vmatpush1.bf16.msra.mxu0 %v5284_v7  ;;  %2323 = vmatpush1.bf16.msra.mxu1 %v5287_v26  ;;  %v7009_v7 = vld [vmem:[#allocation19_spill] sm:$0xff]  ;;  %v7010_v26 = vld [vmem:[#allocation22_spill] sm:$0xff] }
 0x49f   :  { %2283 = vmatprep.subr.bf16.mxu0 %v7002_v36  ;;  %2324 = vmatprep.subr.bf16.mxu1 %v7003_v61  ;;  %v7027_v36 = vld [vmem:[#allocation68_spill] sm:$0xff]  ;;  %v7028_v61 = vld [vmem:[#allocation69_spill] sm:$0xff] }
 0x4a0   :  { %2313 = vmatprep.mubr.bf16.mxu0 %v6795_v21  ;;  %2354 = vmatprep.mubr.bf16.mxu1 %v6795_v21 }
 0x4a2   :  { %2284 = vmatpush1.bf16.msra.mxu0 %v7004_v52  ;;  %2325 = vmatpush1.bf16.msra.mxu1 %v7005_v55  ;;  %v7029_v52 = vld [vmem:[#allocation71_spill] sm:$0xff]  ;;  %v7030_v55 = vld [vmem:[#allocation70_spill] sm:$0xff] }
 0x4a3   :  { %2285 = vmatprep.subr.bf16.mxu0 %v7006_v19  ;;  %2326 = vmatprep.subr.bf16.mxu1 %v7007_v1  ;;  %v7031_v19 = vld [vmem:[#allocation72_spill] sm:$0xff]  ;;  %v7032_v1 = vld [vmem:[#allocation38_spill] sm:$0xff] }
 0x4a6   :  { %2286 = vmatpush1.bf16.msra.mxu0 %v7008_v11  ;;  %2327 = vmatpush1.bf16.msra.mxu1 %v7009_v7  ;;  %v7033_v11 = vld [vmem:[#allocation39_spill] sm:$0xff]  ;;  %v7034_v7 = vld [vmem:[#allocation40_spill] sm:$0xff] }
 0x4a7   :  { %2287 = vmatprep.subr.bf16.mxu0 %v7010_v26  ;;  %2328 = vmatprep.subr.bf16.mxu1 %v7011_v16  ;;  %v7035_v26 = vld [vmem:[#allocation41_spill] sm:$0xff]  ;;  %v7036_v16 = vld [vmem:[#allocation42_spill] sm:$0xff] }
 0x4aa   :  { %2288 = vmatpush1.bf16.msra.mxu0 %v7012_v30  ;;  %2329 = vmatpush1.bf16.msra.mxu1 %v7013_v59  ;;  %v7037_v30 = vld [vmem:[#allocation43_spill] sm:$0xff]  ;;  %v7038_v59 = vld [vmem:[#allocation44_spill] sm:$0xff] }
 0x4ab   :  { %2289 = vmatprep.subr.bf16.mxu0 %v7014_v15  ;;  %2330 = vmatprep.subr.bf16.mxu1 %v7015_v17  ;;  %v7039_v15 = vld [vmem:[#allocation45_spill] sm:$0xff]  ;;  %v7041_v17 = vld [vmem:[#allocation47_spill] sm:$0xff] }
 0x4ae   :  { %2290 = vmatpush1.bf16.msra.mxu0 %v7016_v4  ;;  %2331 = vmatpush1.bf16.msra.mxu1 %v7017_v8  ;;  %v7042_v4 = vld [vmem:[#allocation48_spill] sm:$0xff]  ;;  %v7043_v8 = vld [vmem:[#allocation49_spill] sm:$0xff] }
 0x4af   :  { %2291 = vmatprep.subr.bf16.mxu0 %v7018_v2  ;;  %2332 = vmatprep.subr.bf16.mxu1 %v7019_v63  ;;  %v7044_v2 = vld [vmem:[#allocation50_spill] sm:$0xff]  ;;  %v7045_v63 = vld [vmem:[#allocation51_spill] sm:$0xff] }
 0x4b2   :  { %2292 = vmatpush1.bf16.msra.mxu0 %v7020_v46  ;;  %2333 = vmatpush1.bf16.msra.mxu1 %v7021_v12  ;;  %v7046_v46 = vld [vmem:[#allocation52_spill] sm:$0xff]  ;;  %v7047_v12 = vld [vmem:[#allocation53_spill] sm:$0xff] }
 0x4b3   :  { %2293 = vmatprep.subr.bf16.mxu0 %v7022_v57  ;;  %2334 = vmatprep.subr.bf16.mxu1 %v7023_v56  ;;  %v7048_v57 = vld [vmem:[#allocation54_spill] sm:$0xff]  ;;  %v7049_v56 = vld [vmem:[#allocation55_spill] sm:$0xff] }
 0x4b6   :  { %2294 = vmatpush1.bf16.msra.mxu0 %v7024_v29  ;;  %2335 = vmatpush1.bf16.msra.mxu1 %v7025_v31  ;;  %v7050_v29 = vld [vmem:[#allocation56_spill] sm:$0xff]  ;;  %v7051_v31 = vld [vmem:[#allocation57_spill] sm:$0xff] }
 0x4b7   :  { %2295 = vmatprep.subr.bf16.mxu0 %v7026_v58  ;;  %2336 = vmatprep.subr.bf16.mxu1 %v7027_v36  ;;  %v7052_v58 = vld [vmem:[#allocation58_spill] sm:$0xff]  ;;  %v7053_v36 = vld [vmem:[#allocation59_spill] sm:$0xff] }
 0x4ba   :  { %2296 = vmatpush1.bf16.msra.mxu0 %v7028_v61  ;;  %2337 = vmatpush1.bf16.msra.mxu1 %v7029_v52  ;;  %v7054_v61 = vld [vmem:[#allocation60_spill] sm:$0xff]  ;;  %v7055_v52 = vld [vmem:[#allocation61_spill] sm:$0xff] }
 0x4bb   :  { %2393 = vmatprep.subr.bf16.mxu0 %v7030_v55  ;;  %2434 = vmatprep.subr.bf16.mxu1 %v7031_v19 }
 0x4bd   :  { %2314 = vmatmul.mubr.bf16.vlgmr.msra.gmra.mxu0 %v2073_v0  ;;  %2355 = vmatmul.mubr.bf16.vlgmr.msra.gmra.mxu1 %v2073_v0  ;;  %v7040_v0 = vld [vmem:[#allocation46_spill] sm:$0xff] }
 0x4be   :  { %2394 = vmatpush1.bf16.msra.mxu0 %v7032_v1  ;;  %2435 = vmatpush1.bf16.msra.mxu1 %v7033_v11 }
 0x4bf   :  { %2395 = vmatprep.subr.bf16.mxu0 %v7034_v7  ;;  %2436 = vmatprep.subr.bf16.mxu1 %v7035_v26 }
 0x4c0   :  { %2425 = vmatprep.mubr.bf16.mxu0 %v6795_v21  ;;  %2466 = vmatprep.mubr.bf16.mxu1 %v6795_v21 }
 0x4c2   :  { %2396 = vmatpush1.bf16.msra.mxu0 %v7036_v16  ;;  %2437 = vmatpush1.bf16.msra.mxu1 %v7037_v30 }
 0x4c3   :  { %2397 = vmatprep.subr.bf16.mxu0 %v7038_v59  ;;  %2438 = vmatprep.subr.bf16.mxu1 %v7039_v15 }
 0x4c6   :  { %2398 = vmatpush1.bf16.msra.mxu0 %v7040_v0  ;;  %2439 = vmatpush1.bf16.msra.mxu1 %v7041_v17 }
 0x4c7   :  { %2399 = vmatprep.subr.bf16.mxu0 %v7042_v4  ;;  %2440 = vmatprep.subr.bf16.mxu1 %v7043_v8 }
 0x4ca   :  { %2400 = vmatpush1.bf16.msra.mxu0 %v7044_v2  ;;  %2441 = vmatpush1.bf16.msra.mxu1 %v7045_v63  ;;  %v7056_v63 = vld [vmem:[#allocation62_spill] sm:$0xff] }
 0x4cb   :  { %2401 = vmatprep.subr.bf16.mxu0 %v7046_v46  ;;  %2442 = vmatprep.subr.bf16.mxu1 %v7047_v12  ;;  %v7057_v46 = vld [vmem:[#allocation63_spill] sm:$0xff]  ;;  %v7058_v12 = vld [vmem:[#allocation64_spill] sm:$0xff] }
 0x4ce   :  { %2402 = vmatpush1.bf16.msra.mxu0 %v7048_v57  ;;  %2443 = vmatpush1.bf16.msra.mxu1 %v7049_v56  ;;  %v7059_v57 = vld [vmem:[#allocation65_spill] sm:$0xff]  ;;  %v7060_v56 = vld [vmem:[#allocation66_spill] sm:$0xff] }
 0x4cf   :  { %2403 = vmatprep.subr.bf16.mxu0 %v7050_v29  ;;  %2444 = vmatprep.subr.bf16.mxu1 %v7051_v31  ;;  %v7061_v29 = vld [vmem:[#allocation67_spill] sm:$0xff]  ;;  %v7062_v31 = vld [vmem:[#allocation73_spill] sm:$0xff] }
 0x4d2   :  { %2404 = vmatpush1.bf16.msra.mxu0 %v7052_v58  ;;  %2445 = vmatpush1.bf16.msra.mxu1 %v7053_v36  ;;  %v7063_v58 = vld [vmem:[#allocation75_spill] sm:$0xff] }
 0x4d3   :  { %2405 = vmatprep.subr.bf16.mxu0 %v7054_v61  ;;  %2446 = vmatprep.subr.bf16.mxu1 %v7055_v52 }
 0x4d6   :  { %2406 = vmatpush1.bf16.msra.mxu0 %v7056_v63  ;;  %2447 = vmatpush1.bf16.msra.mxu1 %v7057_v46 }
 0x4d7   :  { %2407 = vmatprep.subr.bf16.mxu0 %v7058_v12  ;;  %2448 = vmatprep.subr.bf16.mxu1 %v7059_v57  ;;  %v3814_v57 = vld [vmem:[%s6492_s1 + $0x20] sm:$0xff] }
 0x4d8   :  { %2589 = vperm.xlu0 %3898, %v3814_v57  }
 0x4da   :  { %2408 = vmatpush1.bf16.msra.mxu0 %v7060_v56  ;;  %2449 = vmatpush1.bf16.msra.mxu1 %v7061_v29 }
 0x4db   :  { %2475 = vmatprep.subr.bf16.mxu0 %v7062_v31  ;;  %2516 = vmatprep.subr.bf16.mxu1 %v7063_v58 }
 0x53d   :  { %v2109_v36 = vpop.f32.mrf.mxu0  ;;  %v2150_v61 = vpop.f32.mrf.mxu1 }
 0x53f   :  { %v2111_v2 = vpop.f32.mrf.mxu0  ;;  %v2152_v52 = vpop.f32.mrf.mxu1 }
 0x541   :  { %v2113_v8 = vpop.f32.mrf.mxu0  ;;  %v2154_v63 = vpop.f32.mrf.mxu1 }
 0x543   :  { %v2114_v4 = vpop.f32.mrf.mxu0  ;;  %v2155_v46 = vpop.f32.mrf.mxu1 }
 0x55d   :  { %v2191_v56 = vpop.f32.mrf.mxu0  ;;  %v2232_v12 = vpop.f32.mrf.mxu1 }
 0x55e   :  { %v2192_v29 = vadd.f32 %v2191_v56, %v2109_v36  ;;  %v2233_v16 = vadd.f32 %v2232_v12, %v2150_v61 }
 0x55f   :  { %v2193_v17 = vpop.f32.mrf.mxu0  ;;  %v2234_v31 = vpop.f32.mrf.mxu1 }
 0x560   :  { %v2239_v58 = vadd.f32 %v2192_v29, %v5209_v62  ;;  %v2194_v0 = vadd.f32 %v2193_v17, %v2111_v2  ;;  %v2241_v57 = vadd.f32 %v2233_v16, %v5219_v18  ;;  %v2235_v26 = vadd.f32 %v2234_v31, %v2152_v52  ;;  %v7065_v31 = vld [vmem:[#allocation83_spill] sm:$0xff] }
 0x561   :  { %v2195_v15 = vpop.f32.mrf.mxu0  ;;  %v2236_v59 = vpop.f32.mrf.mxu1 }
 0x562   :  { %v3804_v30 = vmul.f32 -1.442695, %v2239_v58  ;;  %v2240_v8 = vadd.f32 %v2194_v0, %v5213_v60  ;;  %v3806_v56 = vmul.f32 -1.442695, %v2241_v57  ;;  %v2242_v7 = vadd.f32 %v2235_v26, %v5224_v10 }
 0x563   :  { %v2196_v4 = vpop.f32.mrf.mxu0  ;;  %v2237_v63 = vpop.f32.mrf.mxu1 }
 0x564   :  { %4158 = vpow2.f32 %v3804_v30  ;;  %v3805_v46 = vmul.f32 -1.442695, %v2240_v8  ;;  %v7064_v30 = vld [vmem:[#allocation81_spill] sm:$0xff] }
 0x566   :  { %4160 = vpow2.f32 %v3805_v46 }
 0x567   :  { %4162 = vpow2.f32 %v3806_v56 }
 0x571   :  { %v4159_v36 = vpop.eup %4158 }
 0x572   :  { %v2252_v29 = vadd.f32 1.0, %v4159_v36 }
 0x573   :  { %v4161_v17 = vpop.eup %4160 }
 0x574   :  { %4164 = vrcp.f32 %v2252_v29  ;;  %v2253_v59 = vadd.f32 1.0, %v4161_v17  ;;  %v4163_v61 = vpop.eup %4162 }
 0x575   :  { %4166 = vtanh.f32 %v2242_v7  ;;  %v2254_v56 = vadd.f32 1.0, %v4163_v61 }
 0x576   :  { %4168 = vrcp.f32 %v2253_v59 }
 0x57d   :  { %v2315_v15 = vpop.f32.mrf.mxu0  ;;  %v2356_v0 = vpop.f32.mrf.mxu1 }
 0x57e   :  { %v2363_v2 = vadd.f32 %v2315_v15, %v7064_v30  ;;  %v7066_v15 = vld [vmem:[#allocation82_spill] sm:$0xff] }
 0x57f   :  { %v2317_v58 = vpop.f32.mrf.mxu0  ;;  %v2358_v12 = vpop.f32.mrf.mxu1  ;;  %v2365_v30 = vadd.f32 %v2356_v0, %v7066_v15  ;;  %v5928_v15 = vld [vmem:[#allocation3 + $0x20] ss:$16 sps:$4 sm:$0xff]  }
 0x580   :  { %v3808_v16 = vmul.f32 -1.442695, %v2363_v2  ;;  %v2364_v52 = vadd.f32 %v2317_v58, %v7065_v31  ;;  %v7067_v58 = vld [vmem:[#allocation84_spill] sm:$0xff]  ;;  %7080 = vst [vmem:[#allocation20_spill] sm:$0xff] %v5928_v15 }
 0x581   :  { %v4165_v8 = vpop.eup %4164  ;;  %v2319_v4 = vpop.f32.mrf.mxu0  ;;  %v3810_v2 = vmul.f32 -1.442695, %v2365_v30  ;;  %v2366_v31 = vadd.f32 %v2358_v12, %v7067_v58  ;;  %v5931_v30 = vld [vmem:[#allocation3 + $0x28] ss:$16 sps:$4 sm:$0xff]   ;;  %v5937_v58 = vld [vmem:[#allocation3 + $0xc] ss:$16 sps:$4 sm:$0xff]  }
 0x582   :  { %v2360_v26 = vpop.f32.mrf.mxu1  ;;  %v4167_v63 = vpop.eup %4166  ;;  %4170 = vpow2.f32 %v3808_v16  ;;  %v3809_v46 = vmul.f32 -1.442695, %v2364_v52  ;;  %7081 = vst [vmem:[#allocation19_spill] sm:$0xff] %v5931_v30  ;;  %7083 = vst [vmem:[#allocation21_spill] sm:$0xff] %v5937_v58 }
 0x583   :  { %v4169_v57 = vpop.eup %4168  ;;  %v2320_v7 = vpop.f32.mrf.mxu0  ;;  %v2263_v29 = vmul.f32 %v4167_v63, %v4165_v8 }
 0x584   :  { %v2361_v36 = vpop.f32.mrf.mxu1  ;;  %4172 = vpow2.f32 %v3809_v46  ;;  %v2262_v17 = vmul.f32 %v4169_v57, %v5676_v5  ;;  %v2272_v26 = vpop.permute.xlu1 %2271 }
 0x585   :  { %4174 = vrcp.f32 %v2254_v56  ;;  %v5919_v36 = vld [vmem:[#allocation3 + $0x48] ss:$16 sps:$4 sm:$0xff]  }
 0x586   :  { %v5800_v59 = vadd.f32 %v2263_v29, %v2262_v17  ;;  %7077 = vst [vmem:[#allocation15_spill] sm:$0xff] %v5919_v36  ;;  %v5922_v29 = vld [vmem:[#allocation3 + $0x24] ss:$16 sps:$4 sm:$0xff]   ;;  %v5925_v17 = vld [vmem:[#allocation3 + $0x2c] ss:$16 sps:$4 sm:$0xff]  }
 0x587   :  { %7078 = vst [vmem:[#allocation18_spill] sm:$0xff] %v5922_v29  ;;  %7079 = vst [vmem:[#allocation17_spill] sm:$0xff] %v5925_v17 }
 0x588   :  { %4176 = vtanh.f32 %v5800_v59 }
 0x589   :  { %4178 = vpow2.f32 %v3810_v2  ;;  %v5934_v2 = vld [vmem:[#allocation3 + $0x4] ss:$16 sps:$4 sm:$0xff]  }
 0x58a   :  { %4180 = vtanh.f32 %v2366_v31  ;;  %7082 = vst [vmem:[#allocation22_spill] sm:$0xff] %v5934_v2  ;;  %v5940_v31 = vld [vmem:[#allocation3] ss:$16 sps:$4 sm:$0xff]  }
 0x58b   :  { %7084 = vst [vmem:[#allocation24_spill] sm:$0xff] %v5940_v31 }
 0x58f   :  { %v4171_v16 = vpop.eup %4170 }
 0x590   :  { %v2376_v52 = vadd.f32 1.0, %v4171_v16  ;;  %v5943_v16 = vld [vmem:[#allocation3 + $0x8] ss:$16 sps:$4 sm:$0xff]  }
 0x591   :  { %v4173_v61 = vpop.eup %4172  ;;  %7085 = vst [vmem:[#allocation23_spill] sm:$0xff] %v5943_v16 }
 0x592   :  { %4182 = vrcp.f32 %v2376_v52  ;;  %v2377_v8 = vadd.f32 1.0, %v4173_v61  ;;  %v4175_v4 = vpop.eup %4174  ;;  %v7086_v52 = vld [vmem:[#allocation40_spill] sm:$0xff]  ;;  %v7087_v61 = vld [vmem:[#allocation41_spill] sm:$0xff] }
 0x594   :  { %4184 = vrcp.f32 %v2377_v8  ;;  %v7088_v8 = vld [vmem:[#allocation42_spill] sm:$0xff] }
 0x595   :  { %v4177_v5 = vpop.eup %4176 }
 0x596   :  { %v2266_v63 = vmul.f32 %v4177_v5, %v4175_v4  ;;  %v4179_v12 = vpop.eup %4178  ;;  %v7091_v4 = vld [vmem:[#allocation45_spill] sm:$0xff]  ;;  %v7092_v5 = vld [vmem:[#allocation46_spill] sm:$0xff] }
 0x597   :  { %v4181_v56 = vpop.eup %4180 }
 0x598   :  { %v2274_v46 = vmul.f32 %v2272_v26, %v2266_v63  ;;  %v2392_v57 = vpack.c.bf16 %v2266_v63, %v2266_v63  ;;  %v7095_v26 = vld [vmem:[#allocation49_spill] sm:$0xff]  ;;  %v7096_v63 = vld [vmem:[#allocation50_spill] sm:$0xff] }
 0x59a   :  { %v5806_v0 = vadd.f32 %v2274_v46, %v5682_v25  ;;  %2426 = vmatmul.mubr.bf16.vlgmr.msra.gmra.mxu0 %v2392_v57  ;;  %2467 = vmatmul.mubr.bf16.vlgmr.msra.gmra.mxu1 %v2392_v57  ;;  %v7097_v46 = vld [vmem:[#allocation51_spill] sm:$0xff]  ;;  %v7098_v57 = vld [vmem:[#allocation52_spill] sm:$0xff] }
 0x59b   :  { %2476 = vmatpush1.bf16.msra.mxu0 %v5432_v48  ;;  %2517 = vmatpush1.bf16.msra.mxu1 %v5435_v47  ;;  %v2378_v47 = vadd.f32 1.0, %v4179_v12  ;;  %v7099_v12 = vld [vmem:[#allocation53_spill] sm:$0xff] }
 0x59c   :  { %2477 = vmatprep.subr.bf16.mxu0 %v5438_v50  ;;  %2518 = vmatprep.subr.bf16.mxu1 %v5441_v51 }
 0x59d   :  { %2507 = vmatprep.mubr.bf16.mxu0 %v6795_v21  ;;  %2548 = vmatprep.mubr.bf16.mxu1 %v6795_v21  ;;  %4186 = vrcp.f32 %v2378_v47  ;;  %v7104_v47 = vld [vmem:[#allocation58_spill] sm:$0xff] }
 0x59f   :  { %v4183_v7 = vpop.eup %4182  ;;  %2478 = vmatpush1.bf16.msra.mxu0 %v5446_v53  ;;  %2519 = vmatpush1.bf16.msra.mxu1 %v5449_v54 }
 0x5a0   :  { %v2387_v25 = vmul.f32 %v4183_v7, %v4181_v56  ;;  %2479 = vmatprep.subr.bf16.mxu0 %v5452_v20  ;;  %2520 = vmatprep.subr.bf16.mxu1 %v5455_v22  ;;  %v7100_v56 = vld [vmem:[#allocation54_spill] sm:$0xff]  ;;  %v7101_v7 = vld [vmem:[#allocation55_spill] sm:$0xff] }
 0x5a1   :  { %v4185_v48 = vpop.eup %4184 }
 0x5a2   :  { %v2386_v50 = vmul.f32 %v4185_v48, %v5697_v14  ;;  %v5916_v14 = vld [vmem:[#allocation3 + $0x40] ss:$16 sps:$4 sm:$0xff]   ;;  %v7103_v48 = vld [vmem:[#allocation57_spill] sm:$0xff] }
 0x5a3   :  { %2480 = vmatpush1.bf16.msra.mxu0 %v5459_v27  ;;  %2521 = vmatpush1.bf16.msra.mxu1 %v5462_v28  ;;  %v5846_v27 = vld [vmem:[#allocation3 + $0xe4] ss:$16 sps:$4 sm:$0xff]   ;;  %v5849_v28 = vld [vmem:[#allocation3 + $0xec] ss:$16 sps:$4 sm:$0xff]   ;;  %7076 = vst [vmem:[#allocation16_spill] sm:$0xff] %v5916_v14 }
 0x5a4   :  { %v5821_v51 = vadd.f32 %v2387_v25, %v2386_v50  ;;  %2481 = vmatprep.subr.bf16.mxu0 %v5467_v32  ;;  %2522 = vmatprep.subr.bf16.mxu1 %v5470_v33  ;;  %v5854_v32 = vld [vmem:[#allocation3 + $0xe0] ss:$16 sps:$4 sm:$0xff]   ;;  %v5857_v33 = vld [vmem:[#allocation3 + $0xe8] ss:$16 sps:$4 sm:$0xff]  }
 0x5a5   :  { %v7102_v25 = vld [vmem:[#allocation56_spill] sm:$0xff]  ;;  %v7105_v50 = vld [vmem:[#allocation59_spill] sm:$0xff] }
 0x5a6   :  { %4188 = vtanh.f32 %v5821_v51 }
 0x5a7   :  { %2482 = vmatpush1.bf16.msra.mxu0 %v5474_v41  ;;  %2523 = vmatpush1.bf16.msra.mxu1 %v5477_v34  ;;  %v5860_v41 = vld [vmem:[#allocation3 + $0xc4] ss:$16 sps:$4 sm:$0xff]   ;;  %v5863_v34 = vld [vmem:[#allocation3 + $0xcc] ss:$16 sps:$4 sm:$0xff]  }
 0x5a8   :  { %2483 = vmatprep.subr.bf16.mxu0 %v5480_v35  ;;  %2524 = vmatprep.subr.bf16.mxu1 %v5483_v37  ;;  %v5868_v35 = vld [vmem:[#allocation3 + $0xc0] ss:$16 sps:$4 sm:$0xff]   ;;  %v5871_v37 = vld [vmem:[#allocation3 + $0xc8] ss:$16 sps:$4 sm:$0xff]  }
 0x5aa   :  { %v4187_v53 = vpop.eup %4186 }
 0x5ab   :  { %2484 = vmatpush1.bf16.msra.mxu0 %v5486_v38  ;;  %2525 = vmatpush1.bf16.msra.mxu1 %v5489_v39  ;;  %v5874_v38 = vld [vmem:[#allocation3 + $0xa4] ss:$16 sps:$4 sm:$0xff]   ;;  %v5877_v39 = vld [vmem:[#allocation3 + $0xac] ss:$16 sps:$4 sm:$0xff]  }
 0x5ac   :  { %2485 = vmatprep.subr.bf16.mxu0 %v5492_v40  ;;  %2526 = vmatprep.subr.bf16.mxu1 %v5495_v42  ;;  %v5880_v40 = vld [vmem:[#allocation3 + $0xa0] ss:$16 sps:$4 sm:$0xff]   ;;  %v5883_v42 = vld [vmem:[#allocation3 + $0xa8] ss:$16 sps:$4 sm:$0xff]  }
 0x5af   :  { %2486 = vmatpush1.bf16.msra.mxu0 %v5498_v43  ;;  %2527 = vmatpush1.bf16.msra.mxu1 %v5501_v44  ;;  %v5886_v43 = vld [vmem:[#allocation3 + $0x84] ss:$16 sps:$4 sm:$0xff]   ;;  %v5889_v44 = vld [vmem:[#allocation3 + $0x8c] ss:$16 sps:$4 sm:$0xff]  }
 0x5b0   :  { %2487 = vmatprep.subr.bf16.mxu0 %v5504_v6  ;;  %2528 = vmatprep.subr.bf16.mxu1 %v5507_v45  ;;  %v5892_v6 = vld [vmem:[#allocation3 + $0x80] ss:$16 sps:$4 sm:$0xff]   ;;  %v5895_v45 = vld [vmem:[#allocation3 + $0x88] ss:$16 sps:$4 sm:$0xff]  }
 0x5b1   :  { %7068 = vst [vmem:[#allocation74_spill] sm:$0xff] %v5892_v6  ;;  %7069 = vst [vmem:[#allocation76_spill] sm:$0xff] %v5895_v45 }
 0x5b3   :  { %v4189_v54 = vpop.eup %4188  ;;  %2488 = vmatpush1.bf16.msra.mxu0 %v5510_v3  ;;  %2529 = vmatpush1.bf16.msra.mxu1 %v5513_v13  ;;  %v5898_v3 = vld [vmem:[#allocation3 + $0x64] ss:$16 sps:$4 sm:$0xff]   ;;  %v5901_v13 = vld [vmem:[#allocation3 + $0x6c] ss:$16 sps:$4 sm:$0xff]  }
 0x5b4   :  { %2489 = vmatprep.subr.bf16.mxu0 %v5516_v9  ;;  %2530 = vmatprep.subr.bf16.mxu1 %v5519_v49  ;;  %v2390_v20 = vmul.f32 %v4189_v54, %v4187_v53  ;;  %7070 = vst [vmem:[#allocation77_spill] sm:$0xff] %v5898_v3  ;;  %7071 = vst [vmem:[#allocation79_spill] sm:$0xff] %v5901_v13  ;;  %v5904_v9 = vld [vmem:[#allocation3 + $0x60] ss:$16 sps:$4 sm:$0xff]   ;;  %v5907_v49 = vld [vmem:[#allocation3 + $0x68] ss:$16 sps:$4 sm:$0xff]  }
 0x5b5   :  { %7072 = vst [vmem:[#allocation78_spill] sm:$0xff] %v5904_v9  ;;  %7073 = vst [vmem:[#allocation80_spill] sm:$0xff] %v5907_v49  ;;  %v7106_v53 = vld [vmem:[#allocation60_spill] sm:$0xff]  ;;  %v7107_v54 = vld [vmem:[#allocation61_spill] sm:$0xff] }
 0x5b6   :  { %v5842_v22 = vpack.c.bf16 %v2390_v20, %v2390_v20  ;;  %v7108_v20 = vld [vmem:[#allocation62_spill] sm:$0xff] }
 0x5b7   :  { %2490 = vmatpush1.bf16.msra.mxu0 %v5522_v23  ;;  %2531 = vmatpush1.bf16.msra.mxu1 %v5525_v24  ;;  %v5910_v23 = vld [vmem:[#allocation3 + $0x44] ss:$16 sps:$4 sm:$0xff]   ;;  %v5913_v24 = vld [vmem:[#allocation3 + $0x4c] ss:$16 sps:$4 sm:$0xff]  }
 0x5b8   :  { %2599 = vmatprep.subr.bf16.mxu0 %v5846_v27  ;;  %2640 = vmatprep.subr.bf16.mxu1 %v5849_v28  ;;  %7074 = vst [vmem:[#allocation14_spill] sm:$0xff] %v5910_v23  ;;  %7075 = vst [vmem:[#allocation13_spill] sm:$0xff] %v5913_v24 }
 0x5ba   :  { %2508 = vmatmul.mubr.bf16.vlgmr.msra.gmra.mxu0 %v5842_v22  ;;  %2549 = vmatmul.mubr.bf16.vlgmr.msra.gmra.mxu1 %v5842_v22 }
 0x5bb   :  { %2600 = vmatpush1.bf16.msra.mxu0 %v5854_v32  ;;  %2641 = vmatpush1.bf16.msra.mxu1 %v5857_v33 }
 0x5bc   :  { %2601 = vmatprep.subr.bf16.mxu0 %v5860_v41  ;;  %2642 = vmatprep.subr.bf16.mxu1 %v5863_v34 }
 0x5bd   :  { %2631 = vmatprep.mubr.bf16.mxu0 %v6795_v21  ;;  %2672 = vmatprep.mubr.bf16.mxu1 %v6795_v21 }
 0x5bf   :  { %2602 = vmatpush1.bf16.msra.mxu0 %v5868_v35  ;;  %2643 = vmatpush1.bf16.msra.mxu1 %v5871_v37 }
 0x5c0   :  { %2603 = vmatprep.subr.bf16.mxu0 %v5874_v38  ;;  %2644 = vmatprep.subr.bf16.mxu1 %v5877_v39 }
 0x5c3   :  { %2604 = vmatpush1.bf16.msra.mxu0 %v5880_v40  ;;  %2645 = vmatpush1.bf16.msra.mxu1 %v5883_v42 }
 0x5c4   :  { %2605 = vmatprep.subr.bf16.mxu0 %v5886_v43  ;;  %2646 = vmatprep.subr.bf16.mxu1 %v5889_v44 }
 0x5c7   :  { %2606 = vmatpush1.bf16.msra.mxu0 %v5892_v6  ;;  %2647 = vmatpush1.bf16.msra.mxu1 %v5895_v45 }
 0x5c8   :  { %2607 = vmatprep.subr.bf16.mxu0 %v5898_v3  ;;  %2648 = vmatprep.subr.bf16.mxu1 %v5901_v13 }
 0x5cb   :  { %2608 = vmatpush1.bf16.msra.mxu0 %v5904_v9  ;;  %2649 = vmatpush1.bf16.msra.mxu1 %v5907_v49 }
 0x5cc   :  { %2609 = vmatprep.subr.bf16.mxu0 %v5910_v23  ;;  %2650 = vmatprep.subr.bf16.mxu1 %v5913_v24 }
 0x5cf   :  { %2610 = vmatpush1.bf16.msra.mxu0 %v5916_v14  ;;  %2651 = vmatpush1.bf16.msra.mxu1 %v5919_v36 }
 0x5d0   :  { %2611 = vmatprep.subr.bf16.mxu0 %v5922_v29  ;;  %2652 = vmatprep.subr.bf16.mxu1 %v5925_v17 }
 0x5d3   :  { %2612 = vmatpush1.bf16.msra.mxu0 %v5928_v15  ;;  %2653 = vmatpush1.bf16.msra.mxu1 %v5931_v30 }
 0x5d4   :  { %2613 = vmatprep.subr.bf16.mxu0 %v5934_v2  ;;  %2654 = vmatprep.subr.bf16.mxu1 %v5937_v58 }
 0x5d7   :  { %2614 = vmatpush1.bf16.msra.mxu0 %v5940_v31  ;;  %2655 = vmatpush1.bf16.msra.mxu1 %v5943_v16 }
 0x5d8   :  { %2711 = vmatprep.subr.bf16.mxu0 %v7030_v55  ;;  %2752 = vmatprep.subr.bf16.mxu1 %v7031_v19  ;;  %v7089_v55 = vld [vmem:[#allocation43_spill] sm:$0xff]  ;;  %v7090_v19 = vld [vmem:[#allocation44_spill] sm:$0xff] }
 0x5da   :  { %2632 = vmatmul.mubr.bf16.vlgmr.msra.gmra.mxu0 %v5842_v22  ;;  %2673 = vmatmul.mubr.bf16.vlgmr.msra.gmra.mxu1 %v5842_v22  ;;  %v7109_v22 = vld [vmem:[#allocation63_spill] sm:$0xff] }
 0x5db   :  { %2712 = vmatpush1.bf16.msra.mxu0 %v7032_v1  ;;  %2753 = vmatpush1.bf16.msra.mxu1 %v7033_v11  ;;  %v7093_v1 = vld [vmem:[#allocation47_spill] sm:$0xff]  ;;  %v7094_v11 = vld [vmem:[#allocation48_spill] sm:$0xff] }
 0x5dc   :  { %2713 = vmatprep.subr.bf16.mxu0 %v7086_v52  ;;  %2754 = vmatprep.subr.bf16.mxu1 %v7087_v61  ;;  %v7110_v52 = vld [vmem:[#allocation64_spill] sm:$0xff]  ;;  %v7111_v61 = vld [vmem:[#allocation65_spill] sm:$0xff] }
 0x5dd   :  { %2743 = vmatprep.mubr.bf16.mxu0 %v6795_v21  ;;  %2784 = vmatprep.mubr.bf16.mxu1 %v6795_v21 }
 0x5df   :  { %2714 = vmatpush1.bf16.msra.mxu0 %v7088_v8  ;;  %2755 = vmatpush1.bf16.msra.mxu1 %v7089_v55  ;;  %v7112_v8 = vld [vmem:[#allocation66_spill] sm:$0xff]  ;;  %v7113_v55 = vld [vmem:[#allocation67_spill] sm:$0xff] }
 0x5e0   :  { %2715 = vmatprep.subr.bf16.mxu0 %v7090_v19  ;;  %2756 = vmatprep.subr.bf16.mxu1 %v7091_v4  ;;  %v7114_v19 = vld [vmem:[#allocation73_spill] sm:$0xff]  ;;  %v7115_v4 = vld [vmem:[#allocation75_spill] sm:$0xff] }
 0x5e3   :  { %2716 = vmatpush1.bf16.msra.mxu0 %v7092_v5  ;;  %2757 = vmatpush1.bf16.msra.mxu1 %v7093_v1 }
 0x5e4   :  { %2717 = vmatprep.subr.bf16.mxu0 %v7094_v11  ;;  %2758 = vmatprep.subr.bf16.mxu1 %v7095_v26 }
 0x5e7   :  { %2718 = vmatpush1.bf16.msra.mxu0 %v7096_v63  ;;  %2759 = vmatpush1.bf16.msra.mxu1 %v7097_v46 }
 0x5e8   :  { %2719 = vmatprep.subr.bf16.mxu0 %v7098_v57  ;;  %2760 = vmatprep.subr.bf16.mxu1 %v7099_v12 }
 0x5eb   :  { %2720 = vmatpush1.bf16.msra.mxu0 %v7100_v56  ;;  %2761 = vmatpush1.bf16.msra.mxu1 %v7101_v7  ;;  %v3821_v56 = vld [vmem:[%s6492_s1 + $0x28] sm:$0xff] }
 0x5ec   :  { %2721 = vmatprep.subr.bf16.mxu0 %v7102_v25  ;;  %2762 = vmatprep.subr.bf16.mxu1 %v7103_v48 }
 0x5ed   :  { %2907 = vperm.xlu1 %3899, %v3821_v56  }
 0x5ef   :  { %2722 = vmatpush1.bf16.msra.mxu0 %v7104_v47  ;;  %2763 = vmatpush1.bf16.msra.mxu1 %v7105_v50 }
 0x5f0   :  { %2723 = vmatprep.subr.bf16.mxu0 %v7106_v53  ;;  %2764 = vmatprep.subr.bf16.mxu1 %v7107_v54 }
 0x5f3   :  { %2724 = vmatpush1.bf16.msra.mxu0 %v7108_v20  ;;  %2765 = vmatpush1.bf16.msra.mxu1 %v7109_v22 }
 0x5f4   :  { %2725 = vmatprep.subr.bf16.mxu0 %v7110_v52  ;;  %2766 = vmatprep.subr.bf16.mxu1 %v7111_v61 }
 0x5f7   :  { %2726 = vmatpush1.bf16.msra.mxu0 %v7112_v8  ;;  %2767 = vmatpush1.bf16.msra.mxu1 %v7113_v55 }
 0x5f8   :  { %2793 = vmatprep.subr.bf16.mxu0 %v7114_v19  ;;  %2834 = vmatprep.subr.bf16.mxu1 %v7115_v4 }
 0x65a   :  { %v2427_v5 = vpop.f32.mrf.mxu0  ;;  %v2468_v1 = vpop.f32.mrf.mxu1 }
 0x65c   :  { %v2429_v11 = vpop.f32.mrf.mxu0  ;;  %v2470_v26 = vpop.f32.mrf.mxu1 }
 0x65e   :  { %v2431_v63 = vpop.f32.mrf.mxu0  ;;  %v2472_v46 = vpop.f32.mrf.mxu1 }
 0x660   :  { %v2432_v57 = vpop.f32.mrf.mxu0  ;;  %v2473_v12 = vpop.f32.mrf.mxu1 }
 0x67a   :  { %v2509_v7 = vpop.f32.mrf.mxu0  ;;  %v2550_v25 = vpop.f32.mrf.mxu1 }
 0x67b   :  { %v2510_v48 = vadd.f32 %v2509_v7, %v2427_v5  ;;  %v2551_v4 = vadd.f32 %v2550_v25, %v2468_v1 }
 0x67c   :  { %v2511_v47 = vpop.f32.mrf.mxu0  ;;  %v2552_v50 = vpop.f32.mrf.mxu1 }
 0x67d   :  { %v2557_v53 = vadd.f32 %v2510_v48, %v5209_v62  ;;  %v2512_v54 = vadd.f32 %v2511_v47, %v2429_v11  ;;  %v2559_v63 = vadd.f32 %v2551_v4, %v5219_v18  ;;  %v2553_v46 = vadd.f32 %v2552_v50, %v2470_v26  ;;  %v7117_v26 = vld [vmem:[#allocation87_spill] sm:$0xff] }
 0x67e   :  { %v2513_v20 = vpop.f32.mrf.mxu0  ;;  %v2554_v22 = vpop.f32.mrf.mxu1 }
 0x67f   :  { %v3811_v52 = vmul.f32 -1.442695, %v2557_v53  ;;  %v2558_v61 = vadd.f32 %v2512_v54, %v5213_v60  ;;  %v3813_v5 = vmul.f32 -1.442695, %v2559_v63  ;;  %v2560_v12 = vadd.f32 %v2553_v46, %v5224_v10  ;;  %v7116_v53 = vld [vmem:[#allocation85_spill] sm:$0xff] }
 0x680   :  { %v2514_v8 = vpop.f32.mrf.mxu0  ;;  %v2555_v55 = vpop.f32.mrf.mxu1 }
 0x681   :  { %4190 = vpow2.f32 %v3811_v52  ;;  %v3812_v19 = vmul.f32 -1.442695, %v2558_v61 }
 0x683   :  { %4192 = vpow2.f32 %v3812_v19 }
 0x684   :  { %4194 = vpow2.f32 %v3813_v5 }
 0x68e   :  { %v4191_v57 = vpop.eup %4190 }
 0x68f   :  { %v2570_v56 = vadd.f32 1.0, %v4191_v57 }
 0x690   :  { %v4193_v11 = vpop.eup %4192 }
 0x691   :  { %4196 = vrcp.f32 %v2570_v56  ;;  %v2571_v7 = vadd.f32 1.0, %v4193_v11  ;;  %v4195_v25 = vpop.eup %4194  ;;  %v7118_v11 = vld [vmem:[#allocation86_spill] sm:$0xff] }
 0x692   :  { %4198 = vtanh.f32 %v2560_v12  ;;  %v2572_v63 = vadd.f32 1.0, %v4195_v25 }
 0x693   :  { %4200 = vrcp.f32 %v2571_v7 }
 0x69a   :  { %v2633_v48 = vpop.f32.mrf.mxu0  ;;  %v2674_v47 = vpop.f32.mrf.mxu1 }
 0x69b   :  { %v2681_v54 = vadd.f32 %v2633_v48, %v7116_v53  ;;  %v2683_v7 = vadd.f32 %v2674_v47, %v7118_v11  ;;  %v7119_v53 = vld [vmem:[#allocation88_spill] sm:$0xff] }
 0x69c   :  { %v2635_v20 = vpop.f32.mrf.mxu0  ;;  %v2676_v1 = vpop.f32.mrf.mxu1 }
 0x69d   :  { %v3815_v22 = vmul.f32 -1.442695, %v2681_v54  ;;  %v2682_v50 = vadd.f32 %v2635_v20, %v7117_v26  ;;  %v3817_v48 = vmul.f32 -1.442695, %v2683_v7  ;;  %v2684_v54 = vadd.f32 %v2676_v1, %v7119_v53  ;;  %v6002_v1 = vld [vmem:[#allocation6 + $0xe0] ss:$16 sps:$4 sm:$0xff]  }
 0x69e   :  { %v4197_v52 = vpop.eup %4196  ;;  %v2637_v61 = vpop.f32.mrf.mxu0  ;;  %v6022_v7 = vld [vmem:[#allocation6 + $0xa4] ss:$16 sps:$4 sm:$0xff]  }
 0x69f   :  { %v2678_v8 = vpop.f32.mrf.mxu1  ;;  %v4199_v55 = vpop.eup %4198  ;;  %4202 = vpow2.f32 %v3815_v22  ;;  %v3816_v19 = vmul.f32 -1.442695, %v2682_v50 }
 0x6a0   :  { %v4201_v4 = vpop.eup %4200  ;;  %v2638_v46 = vpop.f32.mrf.mxu0  ;;  %v2581_v57 = vmul.f32 %v4199_v55, %v4197_v52 }
 0x6a1   :  { %v2679_v5 = vpop.f32.mrf.mxu1  ;;  %4204 = vpow2.f32 %v3816_v19  ;;  %v2580_v12 = vmul.f32 %v4201_v4, %v5800_v59  ;;  %v2590_v52 = vpop.permute.xlu0 %2589  ;;  %v6005_v19 = vld [vmem:[#allocation6 + $0xe8] ss:$16 sps:$4 sm:$0xff]   ;;  %v6008_v4 = vld [vmem:[#allocation6 + $0xc4] ss:$16 sps:$4 sm:$0xff]  }
 0x6a2   :  { %4206 = vrcp.f32 %v2572_v63  ;;  %v6011_v63 = vld [vmem:[#allocation6 + $0xcc] ss:$16 sps:$4 sm:$0xff]  }
 0x6a3   :  { %v5994_v56 = vadd.f32 %v2581_v57, %v2580_v12  ;;  %v6016_v57 = vld [vmem:[#allocation6 + $0xc0] ss:$16 sps:$4 sm:$0xff]   ;;  %v6019_v12 = vld [vmem:[#allocation6 + $0xc8] ss:$16 sps:$4 sm:$0xff]  }
 0x6a5   :  { %4208 = vtanh.f32 %v5994_v56 }
 0x6a6   :  { %4210 = vpow2.f32 %v3817_v48  ;;  %v6025_v48 = vld [vmem:[#allocation6 + $0xac] ss:$16 sps:$4 sm:$0xff]  }
 0x6a7   :  { %4212 = vtanh.f32 %v2684_v54 }
 0x6ac   :  { %v4203_v20 = vpop.eup %4202 }
 0x6ad   :  { %v2694_v22 = vadd.f32 1.0, %v4203_v20 }
 0x6ae   :  { %v4205_v25 = vpop.eup %4204 }
 0x6af   :  { %4214 = vrcp.f32 %v2694_v22  ;;  %v2695_v26 = vadd.f32 1.0, %v4205_v25  ;;  %v4207_v50 = vpop.eup %4206  ;;  %v6029_v22 = vld [vmem:[#allocation6 + $0xa0] ss:$16 sps:$4 sm:$0xff]   ;;  %v6032_v25 = vld [vmem:[#allocation6 + $0xa8] ss:$16 sps:$4 sm:$0xff]  }
 0x6b1   :  { %4216 = vrcp.f32 %v2695_v26 }
 0x6b2   :  { %v4209_v59 = vpop.eup %4208 }
 0x6b3   :  { %v2584_v61 = vmul.f32 %v4209_v59, %v4207_v50  ;;  %v6037_v50 = vld [vmem:[#allocation6 + $0x84] ss:$16 sps:$4 sm:$0xff]   ;;  %v6040_v59 = vld [vmem:[#allocation6 + $0x8c] ss:$16 sps:$4 sm:$0xff]  }
 0x6b5   :  { %v2592_v8 = vmul.f32 %v2590_v52, %v2584_v61  ;;  %v2710_v55 = vpack.c.bf16 %v2584_v61, %v2584_v61  ;;  %v6047_v52 = vld [vmem:[#allocation6 + $0x88] ss:$16 sps:$4 sm:$0xff]   ;;  %v6050_v61 = vld [vmem:[#allocation6 + $0x64] ss:$16 sps:$4 sm:$0xff]  }
 0x6b6   :  { %7120 = vst [vmem:[#allocation26_spill] sm:$0xff] %v6050_v61 }
 0x6b7   :  { %v6000_v47 = vadd.f32 %v2592_v8, %v5806_v0  ;;  %2744 = vmatmul.mubr.bf16.vlgmr.msra.gmra.mxu0 %v2710_v55  ;;  %2785 = vmatmul.mubr.bf16.vlgmr.msra.gmra.mxu1 %v2710_v55  ;;  %v4211_v0 = vpop.eup %4210  ;;  %v6053_v8 = vld [vmem:[#allocation6 + $0x6c] ss:$16 sps:$4 sm:$0xff]   ;;  %v6056_v55 = vld [vmem:[#allocation6 + $0x60] ss:$16 sps:$4 sm:$0xff]  }
 0x6b8   :  { %2794 = vmatpush1.bf16.msra.mxu0 %v6002_v1  ;;  %2835 = vmatpush1.bf16.msra.mxu1 %v6005_v19  ;;  %v4213_v46 = vpop.eup %4212  ;;  %v2696_v54 = vadd.f32 1.0, %v4211_v0  ;;  %7121 = vst [vmem:[#allocation25_spill] sm:$0xff] %v6053_v8  ;;  %7122 = vst [vmem:[#allocation28_spill] sm:$0xff] %v6056_v55  ;;  %v6059_v0 = vld [vmem:[#allocation6 + $0x68] ss:$16 sps:$4 sm:$0xff]  }
 0x6b9   :  { %2795 = vmatprep.subr.bf16.mxu0 %v6008_v4  ;;  %2836 = vmatprep.subr.bf16.mxu1 %v6011_v63  ;;  %7123 = vst [vmem:[#allocation27_spill] sm:$0xff] %v6059_v0 }
 0x6ba   :  { %2825 = vmatprep.mubr.bf16.mxu0 %v6795_v21  ;;  %2866 = vmatprep.mubr.bf16.mxu1 %v6795_v21  ;;  %4218 = vrcp.f32 %v2696_v54  ;;  %v6074_v54 = vld [vmem:[#allocation6 + $0x24] ss:$16 sps:$4 sm:$0xff]  }
 0x6bb   :  { %7128 = vst [vmem:[#allocation34_spill] sm:$0xff] %v6074_v54 }
 0x6bc   :  { %v4215_v5 = vpop.eup %4214  ;;  %2796 = vmatpush1.bf16.msra.mxu0 %v6016_v57  ;;  %2837 = vmatpush1.bf16.msra.mxu1 %v6019_v12 }
 0x6bd   :  { %v2705_v11 = vmul.f32 %v4215_v5, %v4213_v46  ;;  %2797 = vmatprep.subr.bf16.mxu0 %v6022_v7  ;;  %2838 = vmatprep.subr.bf16.mxu1 %v6025_v48  ;;  %v6062_v46 = vld [vmem:[#allocation6 + $0x44] ss:$16 sps:$4 sm:$0xff]   ;;  %v6065_v5 = vld [vmem:[#allocation6 + $0x4c] ss:$16 sps:$4 sm:$0xff]  }
 0x6be   :  { %v4217_v53 = vpop.eup %4216  ;;  %7124 = vst [vmem:[#allocation30_spill] sm:$0xff] %v6062_v46  ;;  %7125 = vst [vmem:[#allocation29_spill] sm:$0xff] %v6065_v5 }
 0x6bf   :  { %v2704_v20 = vmul.f32 %v4217_v53, %v5821_v51  ;;  %v6044_v51 = vld [vmem:[#allocation6 + $0x80] ss:$16 sps:$4 sm:$0xff]   ;;  %v6071_v53 = vld [vmem:[#allocation6 + $0x48] ss:$16 sps:$4 sm:$0xff]  }
 0x6c0   :  { %2798 = vmatpush1.bf16.msra.mxu0 %v6029_v22  ;;  %2839 = vmatpush1.bf16.msra.mxu1 %v6032_v25  ;;  %7127 = vst [vmem:[#allocation31_spill] sm:$0xff] %v6071_v53 }
 0x6c1   :  { %v6035_v26 = vadd.f32 %v2705_v11, %v2704_v20  ;;  %2799 = vmatprep.subr.bf16.mxu0 %v6037_v50  ;;  %2840 = vmatprep.subr.bf16.mxu1 %v6040_v59  ;;  %v6068_v11 = vld [vmem:[#allocation6 + $0x40] ss:$16 sps:$4 sm:$0xff]   ;;  %v6077_v20 = vld [vmem:[#allocation6 + $0x2c] ss:$16 sps:$4 sm:$0xff]  }
 0x6c2   :  { %7126 = vst [vmem:[#allocation32_spill] sm:$0xff] %v6068_v11  ;;  %7129 = vst [vmem:[#allocation33_spill] sm:$0xff] %v6077_v20 }
 0x6c3   :  { %4220 = vtanh.f32 %v6035_v26 }
 0x6c4   :  { %2800 = vmatpush1.bf16.msra.mxu0 %v6044_v51  ;;  %2841 = vmatpush1.bf16.msra.mxu1 %v6047_v52 }
 0x6c5   :  { %2801 = vmatprep.subr.bf16.mxu0 %v6050_v61  ;;  %2842 = vmatprep.subr.bf16.mxu1 %v6053_v8  ;;  %v6092_v8 = vld [vmem:[#allocation6] ss:$16 sps:$4 sm:$0xff]   ;;  %v6095_v61 = vld [vmem:[#allocation6 + $0x8] ss:$16 sps:$4 sm:$0xff]  }
 0x6c8   :  { %2802 = vmatpush1.bf16.msra.mxu0 %v6056_v55  ;;  %2843 = vmatpush1.bf16.msra.mxu1 %v6059_v0  ;;  %v6080_v55 = vld [vmem:[#allocation6 + $0x20] ss:$16 sps:$4 sm:$0xff]  }
 0x6c9   :  { %2803 = vmatprep.subr.bf16.mxu0 %v6062_v46  ;;  %2844 = vmatprep.subr.bf16.mxu1 %v6065_v5  ;;  %v4219_v46 = vpop.eup %4218  ;;  %v6083_v5 = vld [vmem:[#allocation6 + $0x28] ss:$16 sps:$4 sm:$0xff]  }
 0x6cc   :  { %2804 = vmatpush1.bf16.msra.mxu0 %v6068_v11  ;;  %2845 = vmatpush1.bf16.msra.mxu1 %v6071_v53  ;;  %v6086_v11 = vld [vmem:[#allocation6 + $0x4] ss:$16 sps:$4 sm:$0xff]   ;;  %v6089_v53 = vld [vmem:[#allocation6 + $0xc] ss:$16 sps:$4 sm:$0xff]  }
 0x6cd   :  { %2805 = vmatprep.subr.bf16.mxu0 %v6074_v54  ;;  %2846 = vmatprep.subr.bf16.mxu1 %v6077_v20 }
 0x6d0   :  { %v4221_v0 = vpop.eup %4220  ;;  %2806 = vmatpush1.bf16.msra.mxu0 %v6080_v55  ;;  %2847 = vmatpush1.bf16.msra.mxu1 %v6083_v5 }
 0x6d1   :  { %2807 = vmatprep.subr.bf16.mxu0 %v6086_v11  ;;  %2848 = vmatprep.subr.bf16.mxu1 %v6089_v53  ;;  %v2708_v54 = vmul.f32 %v4221_v0, %v4219_v46  ;;  %v6132_v0 = vld [vmem:[#allocation8 + $0xe4] ss:$16 sps:$4 sm:$0xff]   ;;  %v6135_v46 = vld [vmem:[#allocation8 + $0xec] ss:$16 sps:$4 sm:$0xff]  }
 0x6d2   :  { %7130 = vst [vmem:[#allocation35_spill] sm:$0xff] %v6132_v0  ;;  %7131 = vst [vmem:[#allocation36_spill] sm:$0xff] %v6135_v46 }
 0x6d3   :  { %v2709_v20 = vpack.c.bf16 %v2708_v54, %v2708_v54  ;;  %v6138_v54 = vld [vmem:[#allocation8 + $0xe0] ss:$16 sps:$4 sm:$0xff]  }
 0x6d4   :  { %2808 = vmatpush1.bf16.msra.mxu0 %v6092_v8  ;;  %2849 = vmatpush1.bf16.msra.mxu1 %v6095_v61  ;;  %7132 = vst [vmem:[#allocation37_spill] sm:$0xff] %v6138_v54 }
 0x6d5   :  { %2917 = vmatprep.subr.bf16.mxu0 %v5846_v27  ;;  %2958 = vmatprep.subr.bf16.mxu1 %v5849_v28 }
 0x6d7   :  { %2826 = vmatmul.mubr.bf16.vlgmr.msra.gmra.mxu0 %v2709_v20  ;;  %2867 = vmatmul.mubr.bf16.vlgmr.msra.gmra.mxu1 %v2709_v20 }
 0x6d8   :  { %2918 = vmatpush1.bf16.msra.mxu0 %v5854_v32  ;;  %2959 = vmatpush1.bf16.msra.mxu1 %v5857_v33 }
 0x6d9   :  { %2919 = vmatprep.subr.bf16.mxu0 %v5860_v41  ;;  %2960 = vmatprep.subr.bf16.mxu1 %v5863_v34 }
 0x6da   :  { %2949 = vmatprep.mubr.bf16.mxu0 %v6795_v21  ;;  %2990 = vmatprep.mubr.bf16.mxu1 %v6795_v21 }
 0x6dc   :  { %2920 = vmatpush1.bf16.msra.mxu0 %v5868_v35  ;;  %2961 = vmatpush1.bf16.msra.mxu1 %v5871_v37 }
 0x6dd   :  { %2921 = vmatprep.subr.bf16.mxu0 %v5874_v38  ;;  %2962 = vmatprep.subr.bf16.mxu1 %v5877_v39 }
 0x6e0   :  { %2922 = vmatpush1.bf16.msra.mxu0 %v5880_v40  ;;  %2963 = vmatpush1.bf16.msra.mxu1 %v5883_v42 }
 0x6e1   :  { %2923 = vmatprep.subr.bf16.mxu0 %v5886_v43  ;;  %2964 = vmatprep.subr.bf16.mxu1 %v5889_v44 }
 0x6e4   :  { %2924 = vmatpush1.bf16.msra.mxu0 %v5892_v6  ;;  %2965 = vmatpush1.bf16.msra.mxu1 %v5895_v45 }
 0x6e5   :  { %2925 = vmatprep.subr.bf16.mxu0 %v5898_v3  ;;  %2966 = vmatprep.subr.bf16.mxu1 %v5901_v13 }
 0x6e8   :  { %2926 = vmatpush1.bf16.msra.mxu0 %v5904_v9  ;;  %2967 = vmatpush1.bf16.msra.mxu1 %v5907_v49 }
 0x6e9   :  { %2927 = vmatprep.subr.bf16.mxu0 %v5910_v23  ;;  %2968 = vmatprep.subr.bf16.mxu1 %v5913_v24 }
 0x6ec   :  { %2928 = vmatpush1.bf16.msra.mxu0 %v5916_v14  ;;  %2969 = vmatpush1.bf16.msra.mxu1 %v5919_v36 }
 0x6ed   :  { %2929 = vmatprep.subr.bf16.mxu0 %v5922_v29  ;;  %2970 = vmatprep.subr.bf16.mxu1 %v5925_v17 }
 0x6f0   :  { %2930 = vmatpush1.bf16.msra.mxu0 %v5928_v15  ;;  %2971 = vmatpush1.bf16.msra.mxu1 %v5931_v30 }
 0x6f1   :  { %2931 = vmatprep.subr.bf16.mxu0 %v5934_v2  ;;  %2972 = vmatprep.subr.bf16.mxu1 %v5937_v58  ;;  %v6141_v2 = vld [vmem:[#allocation8 + $0xe8] ss:$16 sps:$4 sm:$0xff]  }
 0x6f2   :  { %7133 = vst [vmem:[#allocation68_spill] sm:$0xff] %v6141_v2 }
 0x6f4   :  { %2932 = vmatpush1.bf16.msra.mxu0 %v5940_v31  ;;  %2973 = vmatpush1.bf16.msra.mxu1 %v5943_v16  ;;  %v6144_v31 = vld [vmem:[#allocation8 + $0xc4] ss:$16 sps:$4 sm:$0xff]   ;;  %v6147_v16 = vld [vmem:[#allocation8 + $0xcc] ss:$16 sps:$4 sm:$0xff]  }
 0x6f5   :  { %3029 = vmatprep.subr.bf16.mxu0 %v6132_v0  ;;  %3070 = vmatprep.subr.bf16.mxu1 %v6135_v46  ;;  %7134 = vst [vmem:[#allocation69_spill] sm:$0xff] %v6144_v31  ;;  %7135 = vst [vmem:[#allocation71_spill] sm:$0xff] %v6147_v16  ;;  %v6167_v46 = vld [vmem:[#allocation8 + $0xa8] ss:$16 sps:$4 sm:$0xff]  }
 0x6f6   :  { %7141 = vst [vmem:[#allocation83_spill] sm:$0xff] %v6167_v46 }
 0x6f7   :  { %2950 = vmatmul.mubr.bf16.vlgmr.msra.gmra.mxu0 %v2709_v20  ;;  %2991 = vmatmul.mubr.bf16.vlgmr.msra.gmra.mxu1 %v2709_v20  ;;  %v6152_v20 = vld [vmem:[#allocation8 + $0xc0] ss:$16 sps:$4 sm:$0xff]  }
 0x6f8   :  { %3030 = vmatpush1.bf16.msra.mxu0 %v6138_v54  ;;  %3071 = vmatpush1.bf16.msra.mxu1 %v6141_v2  ;;  %7136 = vst [vmem:[#allocation70_spill] sm:$0xff] %v6152_v20  ;;  %v6155_v54 = vld [vmem:[#allocation8 + $0xc8] ss:$16 sps:$4 sm:$0xff]   ;;  %v6158_v2 = vld [vmem:[#allocation8 + $0xa4] ss:$16 sps:$4 sm:$0xff]  }
 0x6f9   :  { %3031 = vmatprep.subr.bf16.mxu0 %v6144_v31  ;;  %3072 = vmatprep.subr.bf16.mxu1 %v6147_v16  ;;  %7137 = vst [vmem:[#allocation72_spill] sm:$0xff] %v6155_v54  ;;  %7138 = vst [vmem:[#allocation38_spill] sm:$0xff] %v6158_v2  ;;  %v6161_v31 = vld [vmem:[#allocation8 + $0xac] ss:$16 sps:$4 sm:$0xff]   ;;  %v6164_v16 = vld [vmem:[#allocation8 + $0xa0] ss:$16 sps:$4 sm:$0xff]  }
 0x6fa   :  { %3061 = vmatprep.mubr.bf16.mxu0 %v6795_v21  ;;  %3102 = vmatprep.mubr.bf16.mxu1 %v6795_v21  ;;  %7139 = vst [vmem:[#allocation39_spill] sm:$0xff] %v6161_v31  ;;  %7140 = vst [vmem:[#allocation81_spill] sm:$0xff] %v6164_v16 }
 0x6fc   :  { %3032 = vmatpush1.bf16.msra.mxu0 %v6152_v20  ;;  %3073 = vmatpush1.bf16.msra.mxu1 %v6155_v54  ;;  %v6170_v20 = vld [vmem:[#allocation8 + $0x84] ss:$16 sps:$4 sm:$0xff]   ;;  %v6173_v54 = vld [vmem:[#allocation8 + $0x8c] ss:$16 sps:$4 sm:$0xff]  }
 0x6fd   :  { %3033 = vmatprep.subr.bf16.mxu0 %v6158_v2  ;;  %3074 = vmatprep.subr.bf16.mxu1 %v6161_v31  ;;  %7142 = vst [vmem:[#allocation82_spill] sm:$0xff] %v6170_v20  ;;  %7143 = vst [vmem:[#allocation84_spill] sm:$0xff] %v6173_v54  ;;  %v6176_v2 = vld [vmem:[#allocation8 + $0x80] ss:$16 sps:$4 sm:$0xff]   ;;  %v6179_v31 = vld [vmem:[#allocation8 + $0x88] ss:$16 sps:$4 sm:$0xff]  }
 0x6fe   :  { %7144 = vst [vmem:[#allocation40_spill] sm:$0xff] %v6176_v2  ;;  %7145 = vst [vmem:[#allocation41_spill] sm:$0xff] %v6179_v31 }
 0x700   :  { %3034 = vmatpush1.bf16.msra.mxu0 %v6164_v16  ;;  %3075 = vmatpush1.bf16.msra.mxu1 %v6167_v46  ;;  %v6182_v16 = vld [vmem:[#allocation8 + $0x64] ss:$16 sps:$4 sm:$0xff]   ;;  %v6185_v46 = vld [vmem:[#allocation8 + $0x6c] ss:$16 sps:$4 sm:$0xff]  }
 0x701   :  { %3035 = vmatprep.subr.bf16.mxu0 %v6170_v20  ;;  %3076 = vmatprep.subr.bf16.mxu1 %v6173_v54  ;;  %7146 = vst [vmem:[#allocation42_spill] sm:$0xff] %v6182_v16  ;;  %7147 = vst [vmem:[#allocation43_spill] sm:$0xff] %v6185_v46  ;;  %v6188_v20 = vld [vmem:[#allocation8 + $0x60] ss:$16 sps:$4 sm:$0xff]   ;;  %v6191_v54 = vld [vmem:[#allocation8 + $0x68] ss:$16 sps:$4 sm:$0xff]  }
 0x702   :  { %7148 = vst [vmem:[#allocation44_spill] sm:$0xff] %v6188_v20  ;;  %7149 = vst [vmem:[#allocation45_spill] sm:$0xff] %v6191_v54 }
 0x704   :  { %3036 = vmatpush1.bf16.msra.mxu0 %v6176_v2  ;;  %3077 = vmatpush1.bf16.msra.mxu1 %v6179_v31  ;;  %v6194_v2 = vld [vmem:[#allocation8 + $0x44] ss:$16 sps:$4 sm:$0xff]   ;;  %v6197_v31 = vld [vmem:[#allocation8 + $0x4c] ss:$16 sps:$4 sm:$0xff]  }
 0x705   :  { %3037 = vmatprep.subr.bf16.mxu0 %v6182_v16  ;;  %3078 = vmatprep.subr.bf16.mxu1 %v6185_v46  ;;  %7150 = vst [vmem:[#allocation46_spill] sm:$0xff] %v6194_v2  ;;  %7151 = vst [vmem:[#allocation47_spill] sm:$0xff] %v6197_v31  ;;  %v6200_v16 = vld [vmem:[#allocation8 + $0x40] ss:$16 sps:$4 sm:$0xff]   ;;  %v6203_v46 = vld [vmem:[#allocation8 + $0x48] ss:$16 sps:$4 sm:$0xff]  }
 0x706   :  { %7152 = vst [vmem:[#allocation48_spill] sm:$0xff] %v6200_v16  ;;  %7153 = vst [vmem:[#allocation49_spill] sm:$0xff] %v6203_v46 }
 0x708   :  { %3038 = vmatpush1.bf16.msra.mxu0 %v6188_v20  ;;  %3079 = vmatpush1.bf16.msra.mxu1 %v6191_v54  ;;  %v6206_v20 = vld [vmem:[#allocation8 + $0x24] ss:$16 sps:$4 sm:$0xff]   ;;  %v6209_v54 = vld [vmem:[#allocation8 + $0x2c] ss:$16 sps:$4 sm:$0xff]  }
 0x709   :  { %3039 = vmatprep.subr.bf16.mxu0 %v6194_v2  ;;  %3080 = vmatprep.subr.bf16.mxu1 %v6197_v31  ;;  %7154 = vst [vmem:[#allocation50_spill] sm:$0xff] %v6206_v20  ;;  %7155 = vst [vmem:[#allocation51_spill] sm:$0xff] %v6209_v54  ;;  %v6212_v2 = vld [vmem:[#allocation8 + $0x20] ss:$16 sps:$4 sm:$0xff]   ;;  %v6215_v31 = vld [vmem:[#allocation8 + $0x28] ss:$16 sps:$4 sm:$0xff]  }
 0x70a   :  { %7156 = vst [vmem:[#allocation52_spill] sm:$0xff] %v6212_v2  ;;  %7157 = vst [vmem:[#allocation53_spill] sm:$0xff] %v6215_v31 }
 0x70c   :  { %3040 = vmatpush1.bf16.msra.mxu0 %v6200_v16  ;;  %3081 = vmatpush1.bf16.msra.mxu1 %v6203_v46  ;;  %v6218_v16 = vld [vmem:[#allocation8 + $0x4] ss:$16 sps:$4 sm:$0xff]   ;;  %v6221_v46 = vld [vmem:[#allocation8 + $0xc] ss:$16 sps:$4 sm:$0xff]  }
 0x70d   :  { %3041 = vmatprep.subr.bf16.mxu0 %v6206_v20  ;;  %3082 = vmatprep.subr.bf16.mxu1 %v6209_v54  ;;  %7158 = vst [vmem:[#allocation54_spill] sm:$0xff] %v6218_v16  ;;  %7159 = vst [vmem:[#allocation55_spill] sm:$0xff] %v6221_v46  ;;  %v6224_v20 = vld [vmem:[#allocation8] ss:$16 sps:$4 sm:$0xff]   ;;  %v6227_v54 = vld [vmem:[#allocation8 + $0x8] ss:$16 sps:$4 sm:$0xff]  }
 0x70e   :  { %7160 = vst [vmem:[#allocation56_spill] sm:$0xff] %v6224_v20  ;;  %7161 = vst [vmem:[#allocation57_spill] sm:$0xff] %v6227_v54 }
 0x710   :  { %3042 = vmatpush1.bf16.msra.mxu0 %v6212_v2  ;;  %3083 = vmatpush1.bf16.msra.mxu1 %v6215_v31  ;;  %v6230_v2 = vld [vmem:[#allocation6 + $0xe4] ss:$16 sps:$4 sm:$0xff]   ;;  %v6233_v31 = vld [vmem:[#allocation6 + $0xec] ss:$16 sps:$4 sm:$0xff]  }
 0x711   :  { %3043 = vmatprep.subr.bf16.mxu0 %v6218_v16  ;;  %3084 = vmatprep.subr.bf16.mxu1 %v6221_v46  ;;  %7162 = vst [vmem:[#allocation58_spill] sm:$0xff] %v6230_v2  ;;  %7163 = vst [vmem:[#allocation59_spill] sm:$0xff] %v6233_v31 }
 0x714   :  { %3044 = vmatpush1.bf16.msra.mxu0 %v6224_v20  ;;  %3085 = vmatpush1.bf16.msra.mxu1 %v6227_v54  ;;  %v3828_v54 = vld [vmem:[%s6492_s1 + $0x30] sm:$0xff] }
 0x715   :  { %3111 = vmatprep.subr.bf16.mxu0 %v6230_v2  ;;  %3152 = vmatprep.subr.bf16.mxu1 %v6233_v31 }
 0x716   :  { %3225 = vperm.xlu0 %3898, %v3828_v54  }
 0x777   :  { %v2745_v16 = vpop.f32.mrf.mxu0  ;;  %v2786_v0 = vpop.f32.mrf.mxu1 }
 0x779   :  { %v2747_v58 = vpop.f32.mrf.mxu0  ;;  %v2788_v46 = vpop.f32.mrf.mxu1 }
 0x77b   :  { %v2749_v30 = vpop.f32.mrf.mxu0  ;;  %v2790_v15 = vpop.f32.mrf.mxu1 }
 0x77d   :  { %v2750_v17 = vpop.f32.mrf.mxu0  ;;  %v2791_v20 = vpop.f32.mrf.mxu1 }
 0x797   :  { %v2827_v29 = vpop.f32.mrf.mxu0  ;;  %v2868_v36 = vpop.f32.mrf.mxu1 }
 0x798   :  { %v2828_v2 = vadd.f32 %v2827_v29, %v2745_v16  ;;  %v2869_v3 = vadd.f32 %v2868_v36, %v2786_v0 }
 0x799   :  { %v2829_v14 = vpop.f32.mrf.mxu0  ;;  %v2870_v24 = vpop.f32.mrf.mxu1 }
 0x79a   :  { %v2875_v31 = vadd.f32 %v2828_v2, %v5209_v62  ;;  %v2830_v23 = vadd.f32 %v2829_v14, %v2747_v58  ;;  %v2877_v54 = vadd.f32 %v2869_v3, %v5219_v18  ;;  %v2871_v45 = vadd.f32 %v2870_v24, %v2788_v46  ;;  %v7165_v24 = vld [vmem:[#allocation91_spill] sm:$0xff] }
 0x79b   :  { %v2831_v49 = vpop.f32.mrf.mxu0  ;;  %v2872_v9 = vpop.f32.mrf.mxu1 }
 0x79c   :  { %v3818_v13 = vmul.f32 -1.442695, %v2875_v31  ;;  %v2876_v15 = vadd.f32 %v2830_v23, %v5213_v60  ;;  %v3820_v29 = vmul.f32 -1.442695, %v2877_v54  ;;  %v2878_v6 = vadd.f32 %v2871_v45, %v5224_v10 }
 0x79d   :  { %v2832_v17 = vpop.f32.mrf.mxu0  ;;  %v2873_v30 = vpop.f32.mrf.mxu1 }
 0x79e   :  { %4222 = vpow2.f32 %v3818_v13  ;;  %v3819_v20 = vmul.f32 -1.442695, %v2876_v15  ;;  %v7164_v13 = vld [vmem:[#allocation89_spill] sm:$0xff] }
 0x7a0   :  { %4224 = vpow2.f32 %v3819_v20 }
 0x7a1   :  { %4226 = vpow2.f32 %v3820_v29 }
 0x7ab   :  { %v4223_v16 = vpop.eup %4222 }
 0x7ac   :  { %v2888_v2 = vadd.f32 1.0, %v4223_v16 }
 0x7ad   :  { %v4225_v14 = vpop.eup %4224 }
 0x7ae   :  { %4228 = vrcp.f32 %v2888_v2  ;;  %v2889_v9 = vadd.f32 1.0, %v4225_v14  ;;  %v4227_v0 = vpop.eup %4226 }
 0x7af   :  { %4230 = vtanh.f32 %v2878_v6  ;;  %v2890_v29 = vadd.f32 1.0, %v4227_v0 }
 0x7b0   :  { %4232 = vrcp.f32 %v2889_v9 }
 0x7b7   :  { %v2951_v49 = vpop.f32.mrf.mxu0  ;;  %v2992_v23 = vpop.f32.mrf.mxu1 }
 0x7b8   :  { %v2999_v58 = vadd.f32 %v2951_v49, %v7164_v13  ;;  %v7166_v49 = vld [vmem:[#allocation90_spill] sm:$0xff] }
 0x7b9   :  { %v2953_v31 = vpop.f32.mrf.mxu0  ;;  %v2994_v36 = vpop.f32.mrf.mxu1  ;;  %v3001_v13 = vadd.f32 %v2992_v23, %v7166_v49 }
 0x7ba   :  { %v3822_v3 = vmul.f32 -1.442695, %v2999_v58  ;;  %v3000_v46 = vadd.f32 %v2953_v31, %v7165_v24  ;;  %v7167_v31 = vld [vmem:[#allocation92_spill] sm:$0xff] }
 0x7bb   :  { %v4229_v15 = vpop.eup %4228  ;;  %v2955_v17 = vpop.f32.mrf.mxu0  ;;  %v3824_v58 = vmul.f32 -1.442695, %v3001_v13  ;;  %v3002_v24 = vadd.f32 %v2994_v36, %v7167_v31  ;;  %v7168_v13 = vld [vmem:[#allocation26_spill] sm:$0xff]  ;;  %v7171_v31 = vld [vmem:[#allocation27_spill] sm:$0xff] }
 0x7bc   :  { %v2996_v45 = vpop.f32.mrf.mxu1  ;;  %v4231_v30 = vpop.eup %4230  ;;  %4234 = vpow2.f32 %v3822_v3  ;;  %v3823_v20 = vmul.f32 -1.442695, %v3000_v46 }
 0x7bd   :  { %v4233_v54 = vpop.eup %4232  ;;  %v2956_v6 = vpop.f32.mrf.mxu0  ;;  %v2899_v2 = vmul.f32 %v4231_v30, %v4229_v15 }
 0x7be   :  { %v2997_v16 = vpop.f32.mrf.mxu1  ;;  %4236 = vpow2.f32 %v3823_v20  ;;  %v2898_v14 = vmul.f32 %v4233_v54, %v5994_v56  ;;  %v2908_v45 = vpop.permute.xlu1 %2907 }
 0x7bf   :  { %4238 = vrcp.f32 %v2890_v29 }
 0x7c0   :  { %v6246_v9 = vadd.f32 %v2899_v2, %v2898_v14 }
 0x7c2   :  { %4240 = vtanh.f32 %v6246_v9 }
 0x7c3   :  { %4242 = vpow2.f32 %v3824_v58  ;;  %v7170_v58 = vld [vmem:[#allocation28_spill] sm:$0xff] }
 0x7c4   :  { %4244 = vtanh.f32 %v3002_v24  ;;  %v7172_v24 = vld [vmem:[#allocation30_spill] sm:$0xff] }
 0x7c9   :  { %v4235_v3 = vpop.eup %4234 }
 0x7ca   :  { %v3012_v46 = vadd.f32 1.0, %v4235_v3  ;;  %v7173_v3 = vld [vmem:[#allocation29_spill] sm:$0xff] }
 0x7cb   :  { %v4237_v0 = vpop.eup %4236 }
 0x7cc   :  { %4246 = vrcp.f32 %v3012_v46  ;;  %v3013_v15 = vadd.f32 1.0, %v4237_v0  ;;  %v4239_v17 = vpop.eup %4238  ;;  %v7174_v46 = vld [vmem:[#allocation32_spill] sm:$0xff]  ;;  %v7175_v0 = vld [vmem:[#allocation31_spill] sm:$0xff] }
 0x7ce   :  { %4248 = vrcp.f32 %v3013_v15  ;;  %v7176_v15 = vld [vmem:[#allocation34_spill] sm:$0xff] }
 0x7cf   :  { %v4241_v56 = vpop.eup %4240 }
 0x7d0   :  { %v2902_v30 = vmul.f32 %v4241_v56, %v4239_v17  ;;  %v4243_v36 = vpop.eup %4242  ;;  %v7177_v17 = vld [vmem:[#allocation33_spill] sm:$0xff] }
 0x7d1   :  { %v4245_v29 = vpop.eup %4244  ;;  %v3014_v2 = vadd.f32 1.0, %v4243_v36  ;;  %v7193_v36 = vld [vmem:[#allocation21_spill] sm:$0xff] }
 0x7d2   :  { %v2910_v20 = vmul.f32 %v2908_v45, %v2902_v30  ;;  %v3028_v54 = vpack.c.bf16 %v2902_v30, %v2902_v30 }
 0x7d3   :  { %4250 = vrcp.f32 %v3014_v2  ;;  %v7198_v2 = vld [vmem:[#allocation37_spill] sm:$0xff] }
 0x7d4   :  { %v6252_v23 = vadd.f32 %v2910_v20, %v6000_v47  ;;  %3062 = vmatmul.mubr.bf16.vlgmr.msra.gmra.mxu0 %v3028_v54  ;;  %3103 = vmatmul.mubr.bf16.vlgmr.msra.gmra.mxu1 %v3028_v54  ;;  %v7192_v54 = vld [vmem:[#allocation22_spill] sm:$0xff] }
 0x7d5   :  { %3112 = vmatpush1.bf16.msra.mxu0 %v6002_v1  ;;  %3153 = vmatpush1.bf16.msra.mxu1 %v6005_v19 }
 0x7d6   :  { %3113 = vmatprep.subr.bf16.mxu0 %v6008_v4  ;;  %3154 = vmatprep.subr.bf16.mxu1 %v6011_v63 }
 0x7d7   :  { %3143 = vmatprep.mubr.bf16.mxu0 %v6795_v21  ;;  %3184 = vmatprep.mubr.bf16.mxu1 %v6795_v21 }
 0x7d9   :  { %v4247_v6 = vpop.eup %4246  ;;  %3114 = vmatpush1.bf16.msra.mxu0 %v6016_v57  ;;  %3155 = vmatpush1.bf16.msra.mxu1 %v6019_v12 }
 0x7da   :  { %v3023_v47 = vmul.f32 %v4247_v6, %v4245_v29  ;;  %3115 = vmatprep.subr.bf16.mxu0 %v6022_v7  ;;  %3156 = vmatprep.subr.bf16.mxu1 %v6025_v48  ;;  %v7194_v29 = vld [vmem:[#allocation24_spill] sm:$0xff]  ;;  %v7195_v6 = vld [vmem:[#allocation23_spill] sm:$0xff] }
 0x7db   :  { %v4249_v16 = vpop.eup %4248 }
 0x7dc   :  { %v3022_v14 = vmul.f32 %v4249_v16, %v6035_v26  ;;  %v7169_v26 = vld [vmem:[#allocation25_spill] sm:$0xff]  ;;  %v7197_v16 = vld [vmem:[#allocation36_spill] sm:$0xff] }
 0x7dd   :  { %3116 = vmatpush1.bf16.msra.mxu0 %v6029_v22  ;;  %3157 = vmatpush1.bf16.msra.mxu1 %v6032_v25 }
 0x7de   :  { %v6267_v49 = vadd.f32 %v3023_v47, %v3022_v14  ;;  %3117 = vmatprep.subr.bf16.mxu0 %v6037_v50  ;;  %3158 = vmatprep.subr.bf16.mxu1 %v6040_v59  ;;  %v7196_v47 = vld [vmem:[#allocation35_spill] sm:$0xff]  ;;  %v7199_v14 = vld [vmem:[#allocation68_spill] sm:$0xff] }
 0x7e0   :  { %4252 = vtanh.f32 %v6267_v49  ;;  %v4251_v56 = vpop.eup %4250 }
 0x7e1   :  { %3118 = vmatpush1.bf16.msra.mxu0 %v6044_v51  ;;  %3159 = vmatpush1.bf16.msra.mxu1 %v6047_v52 }
 0x7e2   :  { %3119 = vmatprep.subr.bf16.mxu0 %v7168_v13  ;;  %3160 = vmatprep.subr.bf16.mxu1 %v7169_v26 }
 0x7e5   :  { %3120 = vmatpush1.bf16.msra.mxu0 %v7170_v58  ;;  %3161 = vmatpush1.bf16.msra.mxu1 %v7171_v31 }
 0x7e6   :  { %3121 = vmatprep.subr.bf16.mxu0 %v7172_v24  ;;  %3162 = vmatprep.subr.bf16.mxu1 %v7173_v3 }
 0x7e9   :  { %3122 = vmatpush1.bf16.msra.mxu0 %v7174_v46  ;;  %3163 = vmatpush1.bf16.msra.mxu1 %v7175_v0 }
 0x7ea   :  { %3123 = vmatprep.subr.bf16.mxu0 %v7176_v15  ;;  %3164 = vmatprep.subr.bf16.mxu1 %v7177_v17 }
 0x7ed   :  { %v4253_v45 = vpop.eup %4252  ;;  %3124 = vmatpush1.bf16.msra.mxu0 %v6080_v55  ;;  %3165 = vmatpush1.bf16.msra.mxu1 %v6083_v5 }
 0x7ee   :  { %3125 = vmatprep.subr.bf16.mxu0 %v6086_v11  ;;  %3166 = vmatprep.subr.bf16.mxu1 %v6089_v53  ;;  %v3026_v30 = vmul.f32 %v4253_v45, %v4251_v56  ;;  %v7200_v56 = vld [vmem:[#allocation69_spill] sm:$0xff]  ;;  %v7201_v45 = vld [vmem:[#allocation71_spill] sm:$0xff] }
 0x7f0   :  { %v3027_v20 = vpack.c.bf16 %v3026_v30, %v3026_v30  ;;  %v7202_v30 = vld [vmem:[#allocation70_spill] sm:$0xff] }
 0x7f1   :  { %3126 = vmatpush1.bf16.msra.mxu0 %v6092_v8  ;;  %3167 = vmatpush1.bf16.msra.mxu1 %v6095_v61 }
 0x7f2   :  { %3235 = vmatprep.subr.bf16.mxu0 %v5846_v27  ;;  %3276 = vmatprep.subr.bf16.mxu1 %v5849_v28  ;;  %v7178_v27 = vld [vmem:[#allocation74_spill] sm:$0xff]  ;;  %v7179_v28 = vld [vmem:[#allocation76_spill] sm:$0xff] }
 0x7f4   :  { %3144 = vmatmul.mubr.bf16.vlgmr.msra.gmra.mxu0 %v3027_v20  ;;  %3185 = vmatmul.mubr.bf16.vlgmr.msra.gmra.mxu1 %v3027_v20 }
 0x7f5   :  { %3236 = vmatpush1.bf16.msra.mxu0 %v5854_v32  ;;  %3277 = vmatpush1.bf16.msra.mxu1 %v5857_v33  ;;  %v7180_v32 = vld [vmem:[#allocation77_spill] sm:$0xff]  ;;  %v7181_v33 = vld [vmem:[#allocation79_spill] sm:$0xff] }
 0x7f6   :  { %3237 = vmatprep.subr.bf16.mxu0 %v5860_v41  ;;  %3278 = vmatprep.subr.bf16.mxu1 %v5863_v34  ;;  %v7182_v41 = vld [vmem:[#allocation78_spill] sm:$0xff]  ;;  %v7183_v34 = vld [vmem:[#allocation80_spill] sm:$0xff] }
 0x7f7   :  { %3267 = vmatprep.mubr.bf16.mxu0 %v6795_v21  ;;  %3308 = vmatprep.mubr.bf16.mxu1 %v6795_v21 }
 0x7f9   :  { %3238 = vmatpush1.bf16.msra.mxu0 %v5868_v35  ;;  %3279 = vmatpush1.bf16.msra.mxu1 %v5871_v37  ;;  %v7184_v35 = vld [vmem:[#allocation14_spill] sm:$0xff]  ;;  %v7185_v37 = vld [vmem:[#allocation13_spill] sm:$0xff] }
 0x7fa   :  { %3239 = vmatprep.subr.bf16.mxu0 %v5874_v38  ;;  %3280 = vmatprep.subr.bf16.mxu1 %v5877_v39  ;;  %v7186_v38 = vld [vmem:[#allocation16_spill] sm:$0xff]  ;;  %v7187_v39 = vld [vmem:[#allocation15_spill] sm:$0xff] }
 0x7fd   :  { %3240 = vmatpush1.bf16.msra.mxu0 %v5880_v40  ;;  %3281 = vmatpush1.bf16.msra.mxu1 %v5883_v42  ;;  %v7188_v40 = vld [vmem:[#allocation18_spill] sm:$0xff]  ;;  %v7189_v42 = vld [vmem:[#allocation17_spill] sm:$0xff] }
 0x7fe   :  { %3241 = vmatprep.subr.bf16.mxu0 %v5886_v43  ;;  %3282 = vmatprep.subr.bf16.mxu1 %v5889_v44  ;;  %v7190_v43 = vld [vmem:[#allocation20_spill] sm:$0xff]  ;;  %v7191_v44 = vld [vmem:[#allocation19_spill] sm:$0xff] }
 0x801   :  { %3242 = vmatpush1.bf16.msra.mxu0 %v7178_v27  ;;  %3283 = vmatpush1.bf16.msra.mxu1 %v7179_v28  ;;  %v7203_v27 = vld [vmem:[#allocation72_spill] sm:$0xff]  ;;  %v7204_v28 = vld [vmem:[#allocation38_spill] sm:$0xff] }
 0x802   :  { %3243 = vmatprep.subr.bf16.mxu0 %v7180_v32  ;;  %3284 = vmatprep.subr.bf16.mxu1 %v7181_v33  ;;  %v7205_v32 = vld [vmem:[#allocation39_spill] sm:$0xff] }
 0x803   :  { %v7207_v33 = vld [vmem:[#allocation83_spill] sm:$0xff] }
 0x805   :  { %3244 = vmatpush1.bf16.msra.mxu0 %v7182_v41  ;;  %3285 = vmatpush1.bf16.msra.mxu1 %v7183_v34  ;;  %v7208_v41 = vld [vmem:[#allocation82_spill] sm:$0xff]  ;;  %v7209_v34 = vld [vmem:[#allocation84_spill] sm:$0xff] }
 0x806   :  { %3245 = vmatprep.subr.bf16.mxu0 %v7184_v35  ;;  %3286 = vmatprep.subr.bf16.mxu1 %v7185_v37  ;;  %v7210_v35 = vld [vmem:[#allocation40_spill] sm:$0xff]  ;;  %v7211_v37 = vld [vmem:[#allocation41_spill] sm:$0xff] }
 0x809   :  { %3246 = vmatpush1.bf16.msra.mxu0 %v7186_v38  ;;  %3287 = vmatpush1.bf16.msra.mxu1 %v7187_v39  ;;  %v7212_v38 = vld [vmem:[#allocation42_spill] sm:$0xff]  ;;  %v7213_v39 = vld [vmem:[#allocation43_spill] sm:$0xff] }
 0x80a   :  { %3247 = vmatprep.subr.bf16.mxu0 %v7188_v40  ;;  %3288 = vmatprep.subr.bf16.mxu1 %v7189_v42  ;;  %v7214_v40 = vld [vmem:[#allocation44_spill] sm:$0xff]  ;;  %v7215_v42 = vld [vmem:[#allocation45_spill] sm:$0xff] }
 0x80d   :  { %3248 = vmatpush1.bf16.msra.mxu0 %v7190_v43  ;;  %3289 = vmatpush1.bf16.msra.mxu1 %v7191_v44  ;;  %v7216_v43 = vld [vmem:[#allocation46_spill] sm:$0xff]  ;;  %v7217_v44 = vld [vmem:[#allocation47_spill] sm:$0xff] }
 0x80e   :  { %3249 = vmatprep.subr.bf16.mxu0 %v7192_v54  ;;  %3290 = vmatprep.subr.bf16.mxu1 %v7193_v36  ;;  %v7218_v54 = vld [vmem:[#allocation48_spill] sm:$0xff]  ;;  %v7219_v36 = vld [vmem:[#allocation49_spill] sm:$0xff] }
 0x811   :  { %3250 = vmatpush1.bf16.msra.mxu0 %v7194_v29  ;;  %3291 = vmatpush1.bf16.msra.mxu1 %v7195_v6  ;;  %v7220_v29 = vld [vmem:[#allocation50_spill] sm:$0xff]  ;;  %v7221_v6 = vld [vmem:[#allocation51_spill] sm:$0xff] }
 0x812   :  { %3347 = vmatprep.subr.bf16.mxu0 %v7196_v47  ;;  %3388 = vmatprep.subr.bf16.mxu1 %v7197_v16  ;;  %v7222_v47 = vld [vmem:[#allocation52_spill] sm:$0xff]  ;;  %v7223_v16 = vld [vmem:[#allocation53_spill] sm:$0xff] }
 0x814   :  { %3268 = vmatmul.mubr.bf16.vlgmr.msra.gmra.mxu0 %v3027_v20  ;;  %3309 = vmatmul.mubr.bf16.vlgmr.msra.gmra.mxu1 %v3027_v20  ;;  %v7206_v20 = vld [vmem:[#allocation81_spill] sm:$0xff] }
 0x815   :  { %3348 = vmatpush1.bf16.msra.mxu0 %v7198_v2  ;;  %3389 = vmatpush1.bf16.msra.mxu1 %v7199_v14  ;;  %v7224_v2 = vld [vmem:[#allocation54_spill] sm:$0xff]  ;;  %v7225_v14 = vld [vmem:[#allocation55_spill] sm:$0xff] }
 0x816   :  { %3349 = vmatprep.subr.bf16.mxu0 %v7200_v56  ;;  %3390 = vmatprep.subr.bf16.mxu1 %v7201_v45  ;;  %v7226_v56 = vld [vmem:[#allocation56_spill] sm:$0xff]  ;;  %v7227_v45 = vld [vmem:[#allocation57_spill] sm:$0xff] }
 0x817   :  { %3379 = vmatprep.mubr.bf16.mxu0 %v6795_v21  ;;  %3420 = vmatprep.mubr.bf16.mxu1 %v6795_v21 }
 0x819   :  { %3350 = vmatpush1.bf16.msra.mxu0 %v7202_v30  ;;  %3391 = vmatpush1.bf16.msra.mxu1 %v7203_v27  ;;  %v7228_v30 = vld [vmem:[#allocation58_spill] sm:$0xff]  ;;  %v7229_v27 = vld [vmem:[#allocation59_spill] sm:$0xff] }
 0x81a   :  { %3351 = vmatprep.subr.bf16.mxu0 %v7204_v28  ;;  %3392 = vmatprep.subr.bf16.mxu1 %v7205_v32  ;;  %v3548_v28 = vld [vmem:[%s6493_s2] sm:$0xff]  ;;  %v3835_v32 = vld [vmem:[%s6492_s1 + $0x38] sm:$0xff] }
 0x81b   :  { %3551 = vperm.xlu0 %3898, %v3548_v28   ;;  %3543 = vperm.xlu1 %3899, %v3835_v32  }
 0x81d   :  { %3352 = vmatpush1.bf16.msra.mxu0 %v7206_v20  ;;  %3393 = vmatpush1.bf16.msra.mxu1 %v7207_v33 }
 0x81e   :  { %3353 = vmatprep.subr.bf16.mxu0 %v7208_v41  ;;  %3394 = vmatprep.subr.bf16.mxu1 %v7209_v34 }
 0x821   :  { %3354 = vmatpush1.bf16.msra.mxu0 %v7210_v35  ;;  %3395 = vmatpush1.bf16.msra.mxu1 %v7211_v37 }
 0x822   :  { %3355 = vmatprep.subr.bf16.mxu0 %v7212_v38  ;;  %3396 = vmatprep.subr.bf16.mxu1 %v7213_v39 }
 0x825   :  { %3356 = vmatpush1.bf16.msra.mxu0 %v7214_v40  ;;  %3397 = vmatpush1.bf16.msra.mxu1 %v7215_v42 }
 0x826   :  { %3357 = vmatprep.subr.bf16.mxu0 %v7216_v43  ;;  %3398 = vmatprep.subr.bf16.mxu1 %v7217_v44 }
 0x829   :  { %3358 = vmatpush1.bf16.msra.mxu0 %v7218_v54  ;;  %3399 = vmatpush1.bf16.msra.mxu1 %v7219_v36 }
 0x82a   :  { %3359 = vmatprep.subr.bf16.mxu0 %v7220_v29  ;;  %3400 = vmatprep.subr.bf16.mxu1 %v7221_v6 }
 0x82d   :  { %3360 = vmatpush1.bf16.msra.mxu0 %v7222_v47  ;;  %3401 = vmatpush1.bf16.msra.mxu1 %v7223_v16 }
 0x82e   :  { %3361 = vmatprep.subr.bf16.mxu0 %v7224_v2  ;;  %3402 = vmatprep.subr.bf16.mxu1 %v7225_v14 }
 0x831   :  { %3362 = vmatpush1.bf16.msra.mxu0 %v7226_v56  ;;  %3403 = vmatpush1.bf16.msra.mxu1 %v7227_v45 }
 0x832   :  { %3429 = vmatprep.subr.bf16.mxu0 %v7228_v30  ;;  %3470 = vmatprep.subr.bf16.mxu1 %v7229_v27 }
 0x894   :  { %v3063_v20 = vpop.f32.mrf.mxu0  ;;  %v3104_v33 = vpop.f32.mrf.mxu1 }
 0x896   :  { %v3065_v41 = vpop.f32.mrf.mxu0  ;;  %v3106_v34 = vpop.f32.mrf.mxu1 }
 0x898   :  { %v3067_v35 = vpop.f32.mrf.mxu0  ;;  %v3108_v37 = vpop.f32.mrf.mxu1 }
 0x89a   :  { %v3068_v38 = vpop.f32.mrf.mxu0  ;;  %v3109_v39 = vpop.f32.mrf.mxu1 }
 0x8b4   :  { %v3145_v40 = vpop.f32.mrf.mxu0  ;;  %v3186_v42 = vpop.f32.mrf.mxu1 }
 0x8b5   :  { %v3146_v43 = vadd.f32 %v3145_v40, %v3063_v20  ;;  %v3187_v30 = vadd.f32 %v3186_v42, %v3104_v33 }
 0x8b6   :  { %v3147_v44 = vpop.f32.mrf.mxu0  ;;  %v3188_v54 = vpop.f32.mrf.mxu1 }
 0x8b7   :  { %v3193_v36 = vadd.f32 %v3146_v43, %v5209_v62  ;;  %v3148_v29 = vadd.f32 %v3147_v44, %v3065_v41  ;;  %v3195_v27 = vadd.f32 %v3187_v30, %v5219_v18  ;;  %v3189_v28 = vadd.f32 %v3188_v54, %v3106_v34  ;;  %v7230_v43 = vld [vmem:[#allocation93_spill] sm:$0xff]  ;;  %v7231_v34 = vld [vmem:[#allocation95_spill] sm:$0xff] }
 0x8b8   :  { %v3149_v6 = vpop.f32.mrf.mxu0  ;;  %v3190_v47 = vpop.f32.mrf.mxu1 }
 0x8b9   :  { %v3825_v16 = vmul.f32 -1.442695, %v3193_v36  ;;  %v3194_v2 = vadd.f32 %v3148_v29, %v5213_v60  ;;  %v3827_v32 = vmul.f32 -1.442695, %v3195_v27  ;;  %v3196_v35 = vadd.f32 %v3189_v28, %v5224_v10 }
 0x8ba   :  { %v3150_v14 = vpop.f32.mrf.mxu0  ;;  %v3191_v56 = vpop.f32.mrf.mxu1 }
 0x8bb   :  { %4254 = vpow2.f32 %v3825_v16  ;;  %v3826_v45 = vmul.f32 -1.442695, %v3194_v2 }
 0x8bd   :  { %4256 = vpow2.f32 %v3826_v45 }
 0x8be   :  { %4258 = vpow2.f32 %v3827_v32 }
 0x8c8   :  { %v4255_v20 = vpop.eup %4254 }
 0x8c9   :  { %v3206_v37 = vadd.f32 1.0, %v4255_v20 }
 0x8ca   :  { %v4257_v41 = vpop.eup %4256 }
 0x8cb   :  { %4260 = vrcp.f32 %v3206_v37  ;;  %v3207_v38 = vadd.f32 1.0, %v4257_v41  ;;  %v4259_v42 = vpop.eup %4258 }
 0x8cc   :  { %4262 = vtanh.f32 %v3196_v35  ;;  %v3208_v45 = vadd.f32 1.0, %v4259_v42  ;;  %v7232_v35 = vld [vmem:[#allocation94_spill] sm:$0xff] }
 0x8cd   :  { %4264 = vrcp.f32 %v3207_v38  ;;  %v7233_v38 = vld [vmem:[#allocation96_spill] sm:$0xff] }
 0x8d4   :  { %v3269_v39 = vpop.f32.mrf.mxu0  ;;  %v3310_v40 = vpop.f32.mrf.mxu1 }
 0x8d5   :  { %v3317_v44 = vadd.f32 %v3269_v39, %v7230_v43  ;;  %v3319_v37 = vadd.f32 %v3310_v40, %v7232_v35 }
 0x8d6   :  { %v3271_v36 = vpop.f32.mrf.mxu0  ;;  %v3312_v33 = vpop.f32.mrf.mxu1 }
 0x8d7   :  { %v3829_v29 = vmul.f32 -1.442695, %v3317_v44  ;;  %v3318_v54 = vadd.f32 %v3271_v36, %v7231_v34  ;;  %v3831_v41 = vmul.f32 -1.442695, %v3319_v37  ;;  %v3320_v39 = vadd.f32 %v3312_v33, %v7233_v38  ;;  %v3226_v34 = vpop.permute.xlu0 %3225 }
 0x8d8   :  { %v4261_v6 = vpop.eup %4260  ;;  %v3273_v47 = vpop.f32.mrf.mxu0 }
 0x8d9   :  { %v3314_v16 = vpop.f32.mrf.mxu1  ;;  %v4263_v2 = vpop.eup %4262  ;;  %4266 = vpow2.f32 %v3829_v29  ;;  %v3830_v14 = vmul.f32 -1.442695, %v3318_v54 }
 0x8da   :  { %v4265_v56 = vpop.eup %4264  ;;  %v3274_v30 = vpop.f32.mrf.mxu0  ;;  %v3217_v28 = vmul.f32 %v4263_v2, %v4261_v6 }
 0x8db   :  { %v3315_v27 = vpop.f32.mrf.mxu1  ;;  %4268 = vpow2.f32 %v3830_v14  ;;  %v3216_v32 = vmul.f32 %v4265_v56, %v6246_v9 }
 0x8dc   :  { %4270 = vrcp.f32 %v3208_v45 }
 0x8dd   :  { %v6373_v20 = vadd.f32 %v3217_v28, %v3216_v32 }
 0x8df   :  { %4272 = vtanh.f32 %v6373_v20 }
 0x8e0   :  { %4274 = vpow2.f32 %v3831_v41 }
 0x8e1   :  { %4276 = vtanh.f32 %v3320_v39 }
 0x8e6   :  { %v4267_v43 = vpop.eup %4266 }
 0x8e7   :  { %v3330_v44 = vadd.f32 1.0, %v4267_v43 }
 0x8e8   :  { %v4269_v36 = vpop.eup %4268 }
 0x8e9   :  { %4278 = vrcp.f32 %v3330_v44  ;;  %v3331_v42 = vadd.f32 1.0, %v4269_v36  ;;  %v4271_v29 = vpop.eup %4270 }
 0x8eb   :  { %4280 = vrcp.f32 %v3331_v42 }
 0x8ec   :  { %v4273_v9 = vpop.eup %4272 }
 0x8ed   :  { %v3220_v54 = vmul.f32 %v4273_v9, %v4271_v29  ;;  %v4275_v33 = vpop.eup %4274 }
 0x8ee   :  { %v4277_v16 = vpop.eup %4276 }
 0x8ef   :  { %v3228_v6 = vmul.f32 %v3226_v34, %v3220_v54  ;;  %v3346_v47 = vpack.c.bf16 %v3220_v54, %v3220_v54 }
 0x8f1   :  { %v6379_v40 = vadd.f32 %v3228_v6, %v6252_v23  ;;  %3380 = vmatmul.mubr.bf16.vlgmr.msra.gmra.mxu0 %v3346_v47  ;;  %3421 = vmatmul.mubr.bf16.vlgmr.msra.gmra.mxu1 %v3346_v47 }
 0x8f2   :  { %3430 = vmatpush1.bf16.msra.mxu0 %v6002_v1  ;;  %3471 = vmatpush1.bf16.msra.mxu1 %v6005_v19  ;;  %v3332_v19 = vadd.f32 1.0, %v4275_v33 }
 0x8f3   :  { %3431 = vmatprep.subr.bf16.mxu0 %v6008_v4  ;;  %3472 = vmatprep.subr.bf16.mxu1 %v6011_v63 }
 0x8f4   :  { %3461 = vmatprep.mubr.bf16.mxu0 %v6795_v21  ;;  %3502 = vmatprep.mubr.bf16.mxu1 %v6795_v21  ;;  %4282 = vrcp.f32 %v3332_v19 }
 0x8f6   :  { %v4279_v2 = vpop.eup %4278  ;;  %3432 = vmatpush1.bf16.msra.mxu0 %v6016_v57  ;;  %3473 = vmatpush1.bf16.msra.mxu1 %v6019_v12 }
 0x8f7   :  { %v3341_v23 = vmul.f32 %v4279_v2, %v4277_v16  ;;  %3433 = vmatprep.subr.bf16.mxu0 %v6022_v7  ;;  %3474 = vmatprep.subr.bf16.mxu1 %v6025_v48  ;;  %v7234_v48 = vmov 0.0  }
 0x8f8   :  { %v4281_v1 = vpop.eup %4280 }
 0x8f9   :  { %v3340_v4 = vmul.f32 %v4281_v1, %v6267_v49  ;;  %v3558_v49 = vld [vmem:[%s6500_s9 + $0x18] sm:$0xff] }
 0x8fa   :  { %3434 = vmatpush1.bf16.msra.mxu0 %v6029_v22  ;;  %3475 = vmatpush1.bf16.msra.mxu1 %v6032_v25  ;;  %v3570_v22 = vld [vmem:[%s6500_s9 + $0x78] sm:$0xff]  ;;  %v3569_v25 = vld [vmem:[%s6500_s9 + $0x70] sm:$0xff] }
 0x8fb   :  { %v3342_v21 = vadd.f32 %v3341_v23, %v3340_v4  ;;  %3435 = vmatprep.subr.bf16.mxu0 %v6037_v50  ;;  %3476 = vmatprep.subr.bf16.mxu1 %v6040_v59  ;;  %v3568_v50 = vld [vmem:[%s6500_s9 + $0x68] sm:$0xff]  ;;  %v3567_v59 = vld [vmem:[%s6500_s9 + $0x60] sm:$0xff] }
 0x8fd   :  { %4284 = vtanh.f32 %v3342_v21 }
 0x8fe   :  { %3436 = vmatpush1.bf16.msra.mxu0 %v6044_v51  ;;  %3477 = vmatpush1.bf16.msra.mxu1 %v6047_v52  ;;  %v3566_v51 = vld [vmem:[%s6500_s9 + $0x58] sm:$0xff]  ;;  %v3565_v52 = vld [vmem:[%s6500_s9 + $0x50] sm:$0xff] }
 0x8ff   :  { %3437 = vmatprep.subr.bf16.mxu0 %v7168_v13  ;;  %3478 = vmatprep.subr.bf16.mxu1 %v7169_v26  ;;  %v3557_v13 = vld [vmem:[%s6500_s9 + $0x10] sm:$0xff]  ;;  %v3556_v26 = vld [vmem:[%s6500_s9 + $0x8] sm:$0xff] }
 0x901   :  { %v4283_v63 = vpop.eup %4282 }
 0x902   :  { %3438 = vmatpush1.bf16.msra.mxu0 %v7170_v58  ;;  %3479 = vmatpush1.bf16.msra.mxu1 %v7171_v31  ;;  %v3555_v58 = vld [vmem:[%s6500_s9] sm:$0xff] }
 0x903   :  { %3439 = vmatprep.subr.bf16.mxu0 %v7172_v24  ;;  %3480 = vmatprep.subr.bf16.mxu1 %v7173_v3 }
 0x906   :  { %3440 = vmatpush1.bf16.msra.mxu0 %v7174_v46  ;;  %3481 = vmatpush1.bf16.msra.mxu1 %v7175_v0 }
 0x907   :  { %3441 = vmatprep.subr.bf16.mxu0 %v7176_v15  ;;  %3482 = vmatprep.subr.bf16.mxu1 %v7177_v17 }
 0x90a   :  { %v4285_v57 = vpop.eup %4284  ;;  %3442 = vmatpush1.bf16.msra.mxu0 %v6080_v55  ;;  %3483 = vmatpush1.bf16.msra.mxu1 %v6083_v5  ;;  %v3562_v55 = vld [vmem:[%s6500_s9 + $0x38] sm:$0xff]  ;;  %v3561_v5 = vld [vmem:[%s6500_s9 + $0x30] sm:$0xff] }
 0x90b   :  { %3443 = vmatprep.subr.bf16.mxu0 %v6086_v11  ;;  %3484 = vmatprep.subr.bf16.mxu1 %v6089_v53  ;;  %v3344_v12 = vmul.f32 %v4285_v57, %v4283_v63  ;;  %v3560_v11 = vld [vmem:[%s6500_s9 + $0x28] sm:$0xff]  ;;  %v3559_v53 = vld [vmem:[%s6500_s9 + $0x20] sm:$0xff]  ;;  %v3544_v57 = vpop.permute.xlu1 %3543 }
 0x90d   :  { %v3345_v7 = vpack.c.bf16 %v3344_v12, %v3344_v12 }
 0x90e   :  { %3444 = vmatpush1.bf16.msra.mxu0 %v6092_v8  ;;  %3485 = vmatpush1.bf16.msra.mxu1 %v6095_v61  ;;  %v3564_v61 = vld [vmem:[%s6500_s9 + $0x48] sm:$0xff]  ;;  %v3563_v8 = vld [vmem:[%s6500_s9 + $0x40] sm:$0xff] }
 0x90f   :  { %3854 = vmatprep.subr.mxu0 %v7234_v48 }
 0x911   :  { %3462 = vmatmul.mubr.bf16.vlgmr.msra.gmra.mxu0 %v3345_v7  ;;  %3503 = vmatmul.mubr.bf16.vlgmr.msra.gmra.mxu1 %v3345_v7 }
 0x912   :  { %3855 = vmatpush3.msra.mxu0 %v3570_v22  ;;  %3886 = vmatprep.mubr.msk.f32.mxu0 %vm4587_vm2, %v7234_v48 }
 0x913   :  { %3856 = vmatprep.subr.mxu0 %v7234_v48 }
 0x914   :  { %3857 = vmatpush3.msra.mxu0 %v3569_v25  ;;  %v3836_v25 = vld [vmem:[%s6501_s10] ss:$0 sm:$0xff] }
 0x915   :  { %3858 = vmatprep.subr.mxu0 %v7234_v48 }
 0x916   :  { %3859 = vmatpush3.msra.mxu0 %v3568_v50 }
 0x917   :  { %3860 = vmatprep.subr.mxu0 %v7234_v48 }
 0x918   :  { %3861 = vmatpush3.msra.mxu0 %v3567_v59 }
 0x919   :  { %3862 = vmatprep.subr.mxu0 %v7234_v48 }
 0x91a   :  { %3863 = vmatpush3.msra.mxu0 %v3566_v51 }
 0x91b   :  { %3864 = vmatprep.subr.mxu0 %v7234_v48 }
 0x91c   :  { %3865 = vmatpush3.msra.mxu0 %v3565_v52 }
 0x91d   :  { %3866 = vmatprep.subr.mxu0 %v7234_v48 }
 0x91e   :  { %3867 = vmatpush3.msra.mxu0 %v3564_v61 }
 0x91f   :  { %3868 = vmatprep.subr.mxu0 %v7234_v48 }
 0x920   :  { %3869 = vmatpush3.msra.mxu0 %v3563_v8 }
 0x921   :  { %3870 = vmatprep.subr.mxu0 %v7234_v48 }
 0x922   :  { %3871 = vmatpush3.msra.mxu0 %v3562_v55 }
 0x923   :  { %3872 = vmatprep.subr.mxu0 %v7234_v48 }
 0x924   :  { %3873 = vmatpush3.msra.mxu0 %v3561_v5 }
 0x925   :  { %3874 = vmatprep.subr.mxu0 %v7234_v48 }
 0x926   :  { %3875 = vmatpush3.msra.mxu0 %v3560_v11 }
 0x927   :  { %3876 = vmatprep.subr.mxu0 %v7234_v48 }
 0x928   :  { %3877 = vmatpush3.msra.mxu0 %v3559_v53 }
 0x929   :  { %3878 = vmatprep.subr.mxu0 %v7234_v48 }
 0x92a   :  { %3879 = vmatpush3.msra.mxu0 %v3558_v49 }
 0x92b   :  { %3880 = vmatprep.subr.mxu0 %v7234_v48 }
 0x92c   :  { %3881 = vmatpush3.msra.mxu0 %v3557_v13 }
 0x92d   :  { %3882 = vmatprep.subr.mxu0 %v7234_v48 }
 0x92e   :  { %3883 = vmatpush3.msra.mxu0 %v3556_v26 }
 0x92f   :  { %3884 = vmatprep.subr.mxu0 %v7234_v48  ;;  %v3552_v48 = vpop.permute.xlu0 %3551 }
 0x930   :  { %3885 = vmatpush3.msra.mxu0 %v3555_v58 }
 0x9b1   :  { %v3381_v31 = vpop.f32.mrf.mxu0  ;;  %v3422_v24 = vpop.f32.mrf.mxu1 }
 0x9b3   :  { %v3383_v3 = vpop.f32.mrf.mxu0  ;;  %v3424_v46 = vpop.f32.mrf.mxu1 }
 0x9b5   :  { %v3385_v0 = vpop.f32.mrf.mxu0  ;;  %v3426_v15 = vpop.f32.mrf.mxu1 }
 0x9b7   :  { %v3386_v17 = vpop.f32.mrf.mxu0  ;;  %v3427_v14 = vpop.f32.mrf.mxu1 }
 0x9d1   :  { %v3463_v56 = vpop.f32.mrf.mxu0  ;;  %v3504_v45 = vpop.f32.mrf.mxu1 }
 0x9d2   :  { %v3464_v30 = vadd.f32 %v3463_v56, %v3381_v31  ;;  %v3505_v42 = vadd.f32 %v3504_v45, %v3422_v24 }
 0x9d3   :  { %v3465_v27 = vpop.f32.mrf.mxu0  ;;  %v3506_v28 = vpop.f32.mrf.mxu1 }
 0x9d4   :  { %v3511_v32 = vadd.f32 %v3464_v30, %v5209_v62  ;;  %v3466_v35 = vadd.f32 %v3465_v27, %v3383_v3  ;;  %v3513_v29 = vadd.f32 %v3505_v42, %v5219_v18  ;;  %v3507_v9 = vadd.f32 %v3506_v28, %v3424_v46 }
 0x9d5   :  { %v3467_v37 = vpop.f32.mrf.mxu0  ;;  %v3508_v41 = vpop.f32.mrf.mxu1 }
 0x9d6   :  { %v3832_v38 = vmul.f32 -1.442695, %v3511_v32  ;;  %v3512_v39 = vadd.f32 %v3466_v35, %v5213_v60  ;;  %v3834_v34 = vmul.f32 -1.442695, %v3513_v29  ;;  %v3514_v6 = vadd.f32 %v3507_v9, %v5224_v10 }
 0x9d7   :  { %v3468_v43 = vpop.f32.mrf.mxu0  ;;  %v3509_v44 = vpop.f32.mrf.mxu1 }
 0x9d8   :  { %4286 = vpow2.f32 %v3832_v38  ;;  %v3833_v36 = vmul.f32 -1.442695, %v3512_v39 }
 0x9da   :  { %4288 = vpow2.f32 %v3833_v36 }
 0x9db   :  { %4290 = vpow2.f32 %v3834_v34 }
 0x9e5   :  { %v4287_v54 = vpop.eup %4286 }
 0x9e6   :  { %v3524_v62 = vadd.f32 1.0, %v4287_v54 }
 0x9e7   :  { %v4289_v47 = vpop.eup %4288 }
 0x9e8   :  { %4292 = vrcp.f32 %v3524_v62  ;;  %v3525_v33 = vadd.f32 1.0, %v4289_v47  ;;  %v4291_v60 = vpop.eup %4290 }
 0x9e9   :  { %4294 = vtanh.f32 %v3514_v6  ;;  %v3526_v1 = vadd.f32 1.0, %v4291_v60 }
 0x9ea   :  { %4296 = vrcp.f32 %v3525_v33 }
 0x9eb   :  { %4298 = vrcp.f32 %v3526_v1 }
 0x9f5   :  { %v4293_v16 = vpop.eup %4292 }
 0x9f6   :  { %v4295_v2 = vpop.eup %4294 }
 0x9f7   :  { %v4297_v23 = vpop.eup %4296  ;;  %v3535_v19 = vmul.f32 %v4295_v2, %v4293_v16 }
 0x9f8   :  { %v3534_v18 = vmul.f32 %v4297_v23, %v6373_v20  ;;  %v4299_v21 = vpop.eup %4298 }
 0x9fa   :  { %v3536_v4 = vadd.f32 %v3535_v19, %v3534_v18 }
 0x9fc   :  { %4300 = vtanh.f32 %v3536_v4 }
 0xa09   :  { %v4301_v10 = vpop.eup %4300 }
 0xa0a   :  { %v3538_v63 = vmul.f32 %v4301_v10, %v4299_v21 }
 0xa0c   :  { %v3546_v12 = vmul.f32 %v3544_v57, %v3538_v63 }
 0xa0e   :  { %v3547_v7 = vadd.f32 %v3546_v12, %v6379_v40 }
 0xa10   :  { %v3554_v22 = vmul.f32 %v3552_v48, %v3547_v7 }
 0xa12   :  { %3887 = vmatmul.mubr.f32.vlgmr.msra.gmra.mxu0 %v3554_v22 }
 0xad2   :  { %v3644_v20 = vpop.f32.mrf.mxu0 }
 0xad3   :  { %v3645_v50 = vadd.f32 %v3836_v25, %v3644_v20 }
 0xad4   :  { %v3888_v59 = vpop.f32.mrf.mxu0 }
 0xad5   :  { %3648 = vst [vmem:[#allocation9] sm:$0xff] %v3645_v50 }
 0xad6   :  { %4565 = shalt.err (!%p4562_p5)
}
 0xad7   :  { %3658 = dma.vmem_to_hbm [thread:$0]  %s3656_s0, 128, %s6502_s11, [#allocation5]  }
 0xad8   :  { %4578 = dma.done.wait [#allocation5], 128  }
 0xad9   :  { %4579 = vsyncadd [#allocation5], 4294967168 }
 0xada   :  { %3662 = vsyncpa [#allocation4], 1 }
 0xadb   :  { %3663 = vsyncpa [#allocation7], 1 }
 0xadc   :  { %3664 = vsyncpa [#allocation5], 1 }

</bundles_post_ra>
